<compile_context>
chip_gen: v6e
topology: v6e:2x2x1
jax: 0.10.0
libtpu: 0.0.40
codegen_flags: <defaults>
</compile_context>

<pallas_src>
from functools import partial

import numpy as np
import jax
import jax.numpy as jnp
from jax.experimental import pallas as pl
from jax.experimental.pallas import tpu as pltpu

NEG_SLOPE = 0.01   # LeakyReLU negative_slope (nonlin_kwargs default)
BN_EPS = 1e-5      # BatchNorm2d eps (norm_op_kwargs default)


def _round_up(x, m):
    return (x + m - 1) // m * m


def _conv_bn_lrelu_kernel(x_ref, w_ref, b_ref, o_ref, *, width):
    # x_ref: (1, (TH+4)*W, Cin)   flat padded pixel stream for this row block
    # w_ref: (9, Cin, Cout_p)     BN-folded conv weights, one slice per tap
    # b_ref: (1, Cout_p)          BN-folded bias
    # o_ref: (1, TH*W, Cout_p)
    m = o_ref.shape[1]
    cout_p = o_ref.shape[2]

    xb = x_ref[0]                                     # ((TH+4)*W, Cin)
    # width coordinate of every output pixel (for the zero-pad columns)
    wpos = jax.lax.broadcasted_iota(jnp.int32, (m, 1), 0) % width

    acc = jnp.broadcast_to(b_ref[...], (m, cout_p)).astype(jnp.float32)
    for k in range(9):                                # unrolled 3x3 taps
        kh, kw = k // 3, k % 3
        s = (kh + 1) * width + (kw - 1)               # static tap offset
        patch = xb[s:s + m, :]                        # (m, Cin) VMEM slice
        if kw == 0:                                   # left tap: w == 0 is conv pad
            patch = jnp.where(wpos == 0, 0.0, patch)
        elif kw == 2:                                 # right tap: w == W-1 is pad
            patch = jnp.where(wpos == width - 1, 0.0, patch)
        acc = acc + jnp.dot(patch, w_ref[k],
                            preferred_element_type=jnp.float32)

    # TODO(synk): nn.Dropout2d(p=0.5) is stochastic in train mode; this kernel
    # implements eval-mode semantics where dropout is the identity.
    o_ref[0] = jnp.where(acc >= 0.0, acc, NEG_SLOPE * acc)   # LeakyReLU(0.01)


def _vmem_estimate(tile_h, W, Cin, Cout_p):
    """Rough VMEM footprint (bytes) of one pipelined grid step."""
    lanes = lambda c: _round_up(c, 128)
    subl = lambda r: _round_up(r, 8)
    xin = subl((tile_h + 4) * W) * lanes(Cin) * 4      # one input block
    out = subl(tile_h * W) * lanes(Cout_p) * 4         # one output block
    wgt = 9 * subl(Cin) * lanes(Cout_p) * 4            # weight + bias
    # double-buffered in/out + accumulator + one patch temp + params + slack
    return 2 * (xin + out) + out + xin + 2 * wgt + (1 << 20)


def conv_dropout_norm_nonlin(x_nchw, weight, bias, gamma, beta,
                             running_mean, running_var, *,
                             tile_h=None, vmem_budget=40 * 2**20):
    """Forward of ConvDropoutNormNonlin (eval mode). x_nchw: (N, Cin, H, W)."""
    N, Cin, H, W = x_nchw.shape
    Cout, Cin_w, KH, KW = weight.shape
    assert Cin == Cin_w and KH == 3 and KW == 3

    Cout_p = _round_up(Cout, 128)                      # lane-dense stores

    if tile_h is None:
        tile_h = min(128, H)
        while tile_h > 8 and _vmem_estimate(tile_h, W, Cin, Cout_p) > vmem_budget:
            tile_h = max(8, tile_h // 2)
    tile_h = max(1, min(tile_h, H))
    n_hb = -(-H // tile_h)                             # ceil-div: no divisibility assert
    H_pad = n_hb * tile_h

    # ---- fold eval-mode BatchNorm + conv bias into the weights (trace time) ----
    scale = (gamma.astype(jnp.float32) *
             jax.lax.rsqrt(running_var.astype(jnp.float32) + BN_EPS))
    # (Cout, Cin, 3, 3) -> (kh, kw, Cin, Cout) -> (9, Cin, Cout), scaled, padded
    w_taps = jnp.transpose(weight.astype(jnp.float32), (2, 3, 1, 0)).reshape(9, Cin, Cout)
    w_taps = w_taps * scale[None, None, :]
    w_taps = jnp.pad(w_taps, ((0, 0), (0, 0), (0, Cout_p - Cout)))
    b_fused = ((bias.astype(jnp.float32) - running_mean.astype(jnp.float32)) * scale
               + beta.astype(jnp.float32))
    b_fused = jnp.pad(b_fused, (0, Cout_p - Cout)).reshape(1, Cout_p)

    # ---- layout: NHWC, pad height only, row blocks with a 4-row halo ----
    # TODO(synk): if chained with other NHWC Pallas layers, keep NHWC end to end
    # and drop the NCHW<->NHWC transposes (extra HBM round trips).
    x = jnp.transpose(x_nchw, (0, 2, 3, 1)).astype(jnp.float32)      # (N,H,W,Cin)
    xp = jnp.pad(x, ((0, 0), (2, 2 + H_pad - H), (0, 0), (0, 0)))    # (N,H_pad+4,W,Cin)
    blocks = [xp[:, j * tile_h: j * tile_h + tile_h + 4] for j in range(n_hb)]
    xb = jnp.stack(blocks, axis=1)                                   # (N,n_hb,TH+4,W,Cin)
    xb = xb.reshape(N * n_hb, (tile_h + 4) * W, Cin)

    nb = N * n_hb
    m = tile_h * W
    vmem_limit = int(min(max(2 * _vmem_estimate(tile_h, W, Cin, Cout_p),
                             16 * 2**20),
                         48 * 2**20))                  # stay v7x-safe (64 MiB VMEM)

    out_blocks = pl.pallas_call(
        partial(_conv_bn_lrelu_kernel, width=W),
        grid=(nb,),
        in_specs=[
            pl.BlockSpec((1, (tile_h + 4) * W, Cin), lambda i: (i, 0, 0)),
            pl.BlockSpec((9, Cin, Cout_p), lambda i: (0, 0, 0)),
            pl.BlockSpec((1, Cout_p), lambda i: (0, 0)),
        ],
        out_specs=pl.BlockSpec((1, m, Cout_p), lambda i: (i, 0, 0)),
        out_shape=jax.ShapeDtypeStruct((nb, m, Cout_p), jnp.float32),
        compiler_params=pltpu.CompilerParams(
            dimension_semantics=("parallel",),
            vmem_limit_bytes=vmem_limit),
    )(xb, w_taps, b_fused)

    out = out_blocks.reshape(N, H_pad, W, Cout_p)[:, :H, :, :Cout]
    return jnp.transpose(out, (0, 3, 1, 2))            # back to NCHW


def _reference(x, weight, bias, gamma, beta, mean, var):
    y = jax.lax.conv_general_dilated(
        x, weight, window_strides=(1, 1), padding=((1, 1), (1, 1)),
        dimension_numbers=("NCHW", "OIHW", "NCHW"))
    y = y + bias[None, :, None, None]
    inv = jax.lax.rsqrt(var + BN_EPS)
    y = (y - mean[None, :, None, None]) * (inv * gamma)[None, :, None, None] \
        + beta[None, :, None, None]
    return jnp.where(y >= 0.0, y, NEG_SLOPE * y)


if __name__ == "__main__":
    N, Cin, H, W = 2, 4, 16, 16
    Cout = 8

    key = jax.random.PRNGKey(0)
    kx, kw, kb, kg, kbeta, km, kv = jax.random.split(key, 7)

    x = jax.random.normal(kx, (N, Cin, H, W), dtype=jnp.float32)
    weight = 0.1 * jax.random.normal(kw, (Cout, Cin, 3, 3), dtype=jnp.float32)
    bias = 0.05 * jax.random.normal(kb, (Cout,), dtype=jnp.float32)
    gamma = jax.random.uniform(kg, (Cout,), minval=0.5, maxval=1.5, dtype=jnp.float32)
    beta = 0.1 * jax.random.normal(kbeta, (Cout,), dtype=jnp.float32)
    running_mean = 0.1 * jax.random.normal(km, (Cout,), dtype=jnp.float32)
    running_var = jax.random.uniform(kv, (Cout,), minval=0.5, maxval=1.5,
                                     dtype=jnp.float32)

    out = conv_dropout_norm_nonlin(x, weight, bias, gamma, beta,
                                   running_mean, running_var)
    out = jax.block_until_ready(out)

    ref = _reference(x, weight, bias, gamma, beta, running_mean, running_var)
    ref = jax.block_until_ready(ref)

    np.testing.assert_allclose(np.asarray(out), np.asarray(ref),
                               rtol=1e-4, atol=1e-4)
    print("KERNEL_OK")
</pallas_src>

<mosaic_0001>
module attributes {stable_mosaic.version = 11 : i64} {
  func.func @_conv_bn_lrelu_kernel(%arg0: i32, %arg1: memref<1x320x4xf32, #tpu.memory_space<vmem>>, %arg2: memref<9x4x128xf32, #tpu.memory_space<vmem>>, %arg3: memref<1x128xf32, #tpu.memory_space<vmem>>, %arg4: memref<1x256x128xf32, #tpu.memory_space<vmem>>) attributes {dimension_semantics = [#tpu.dimension_semantics<parallel>], iteration_bounds = array<i64: 2>, scalar_prefetch = 0 : i64, scratch_operands = 0 : i64, tpu.core_type = #tpu.core_type<tc>, window_params = [{transform_indices = @transform_0, window_bounds = array<i64: 1, 320, 4>}, {pipeline_mode = #tpu.pipeline_mode<synchronous>, transform_indices = @transform_1, window_bounds = array<i64: 9, 4, 128>}, {pipeline_mode = #tpu.pipeline_mode<synchronous>, transform_indices = @transform_2, window_bounds = array<i64: 1, 128>}, {transform_indices = @transform_3, window_bounds = array<i64: 1, 256, 128>}]} {
    %c0 = arith.constant 0 : index
    %c0_0 = arith.constant 0 : index
    %c0_1 = arith.constant 0 : index
    %0 = vector.load %arg1[%c0, %c0_0, %c0_1] : memref<1x320x4xf32, #tpu.memory_space<vmem>>, vector<1x320x4xf32>
    %1 = vector.shape_cast %0 : vector<1x320x4xf32> to vector<320x4xf32>
    %2 = tpu.iota {dimensions = array<i32: 0>} : vector<256x1xi32>
    %c16_i32 = arith.constant 16 : i32
    %c0_i32 = arith.constant 0 : i32
    %3 = arith.cmpi eq, %c16_i32, %c0_i32 : i32
    %c1_i32 = arith.constant 1 : i32
    %4 = arith.select %3, %c1_i32, %c16_i32 : i32
    %5 = vector.broadcast %4 : i32 to vector<256x1xi32>
    %6 = arith.remsi %2, %5 : vector<256x1xi32>
    %c0_i32_2 = arith.constant 0 : i32
    %7 = vector.broadcast %c0_i32_2 : i32 to vector<256x1xi32>
    %8 = arith.cmpi ne, %6, %7 : vector<256x1xi32>
    %c0_i32_3 = arith.constant 0 : i32
    %9 = vector.broadcast %c0_i32_3 : i32 to vector<256x1xi32>
    %10 = arith.cmpi slt, %6, %9 : vector<256x1xi32>
    %c0_i32_4 = arith.constant 0 : i32
    %11 = arith.cmpi slt, %4, %c0_i32_4 : i32
    %12 = vector.broadcast %11 : i1 to vector<256x1xi1>
    %13 = vector.broadcast %12 : vector<256x1xi1> to vector<256x1xi1>
    %14 = arith.xori %10, %13 : vector<256x1xi1>
    %15 = arith.andi %14, %8 : vector<256x1xi1>
    %16 = vector.broadcast %4 : i32 to vector<256x1xi32>
    %17 = arith.addi %6, %16 : vector<256x1xi32>
    %18 = arith.select %15, %17, %6 : vector<256x1xi1>, vector<256x1xi32>
    %c0_5 = arith.constant 0 : index
    %c0_6 = arith.constant 0 : index
    %19 = vector.load %arg3[%c0_5, %c0_6] : memref<1x128xf32, #tpu.memory_space<vmem>>, vector<1x128xf32>
    %20 = vector.shape_cast %19 : vector<1x128xf32> to vector<1x128xf32>
    %21 = vector.broadcast %20 : vector<1x128xf32> to vector<256x128xf32>
    %22 = vector.extract_strided_slice %1 {offsets = [15, 0], sizes = [256, 4], strides = [1, 1]} : vector<320x4xf32> to vector<256x4xf32>
    %c0_i32_7 = arith.constant 0 : i32
    %23 = vector.broadcast %c0_i32_7 : i32 to vector<256x1xi32>
    %24 = arith.cmpi eq, %18, %23 : vector<256x1xi32>
    %cst = arith.constant 0.000000e+00 : f32
    %25 = vector.shape_cast %24 : vector<256x1xi1> to vector<256x1xi1>
    %26 = vector.broadcast %25 : vector<256x1xi1> to vector<256x4xi1>
    %27 = vector.broadcast %cst : f32 to vector<256x4xf32>
    %28 = arith.select %26, %27, %22 : vector<256x4xi1>, vector<256x4xf32>
    %c0_8 = arith.constant 0 : index
    %c0_9 = arith.constant 0 : index
    %c0_10 = arith.constant 0 : index
    %29 = vector.load %arg2[%c0_8, %c0_9, %c0_10] : memref<9x4x128xf32, #tpu.memory_space<vmem>>, vector<1x4x128xf32>
    %30 = vector.shape_cast %29 : vector<1x4x128xf32> to vector<4x128xf32>
    %cst_11 = arith.constant dense<0.000000e+00> : vector<256x128xf32>
    %31 = tpu.matmul %28, %30, %cst_11 {dimension_numbers = #tpu.dot_dimension_numbers<[1], [0], [0], [1], [0, 0, 1, 1], [], []>} : vector<256x4xf32>, vector<4x128xf32>, vector<256x128xf32> -> vector<256x128xf32>
    %32 = arith.addf %21, %31 : vector<256x128xf32>
    %33 = vector.extract_strided_slice %1 {offsets = [16, 0], sizes = [256, 4], strides = [1, 1]} : vector<320x4xf32> to vector<256x4xf32>
    %c1 = arith.constant 1 : index
    %c0_12 = arith.constant 0 : index
    %c0_13 = arith.constant 0 : index
    %34 = vector.load %arg2[%c1, %c0_12, %c0_13] : memref<9x4x128xf32, #tpu.memory_space<vmem>>, vector<1x4x128xf32>
    %35 = vector.shape_cast %34 : vector<1x4x128xf32> to vector<4x128xf32>
    %cst_14 = arith.constant dense<0.000000e+00> : vector<256x128xf32>
    %36 = tpu.matmul %33, %35, %cst_14 {dimension_numbers = #tpu.dot_dimension_numbers<[1], [0], [0], [1], [0, 0, 1, 1], [], []>} : vector<256x4xf32>, vector<4x128xf32>, vector<256x128xf32> -> vector<256x128xf32>
    %37 = arith.addf %32, %36 : vector<256x128xf32>
    %38 = vector.extract_strided_slice %1 {offsets = [17, 0], sizes = [256, 4], strides = [1, 1]} : vector<320x4xf32> to vector<256x4xf32>
    %c15_i32 = arith.constant 15 : i32
    %39 = vector.broadcast %c15_i32 : i32 to vector<256x1xi32>
    %40 = arith.cmpi eq, %18, %39 : vector<256x1xi32>
    %cst_15 = arith.constant 0.000000e+00 : f32
    %41 = vector.shape_cast %40 : vector<256x1xi1> to vector<256x1xi1>
    %42 = vector.broadcast %41 : vector<256x1xi1> to vector<256x4xi1>
    %43 = vector.broadcast %cst_15 : f32 to vector<256x4xf32>
    %44 = arith.select %42, %43, %38 : vector<256x4xi1>, vector<256x4xf32>
    %c2 = arith.constant 2 : index
    %c0_16 = arith.constant 0 : index
    %c0_17 = arith.constant 0 : index
    %45 = vector.load %arg2[%c2, %c0_16, %c0_17] : memref<9x4x128xf32, #tpu.memory_space<vmem>>, vector<1x4x128xf32>
    %46 = vector.shape_cast %45 : vector<1x4x128xf32> to vector<4x128xf32>
    %cst_18 = arith.constant dense<0.000000e+00> : vector<256x128xf32>
    %47 = tpu.matmul %44, %46, %cst_18 {dimension_numbers = #tpu.dot_dimension_numbers<[1], [0], [0], [1], [0, 0, 1, 1], [], []>} : vector<256x4xf32>, vector<4x128xf32>, vector<256x128xf32> -> vector<256x128xf32>
    %48 = arith.addf %37, %47 : vector<256x128xf32>
    %49 = vector.extract_strided_slice %1 {offsets = [31, 0], sizes = [256, 4], strides = [1, 1]} : vector<320x4xf32> to vector<256x4xf32>
    %c0_i32_19 = arith.constant 0 : i32
    %50 = vector.broadcast %c0_i32_19 : i32 to vector<256x1xi32>
    %51 = arith.cmpi eq, %18, %50 : vector<256x1xi32>
    %cst_20 = arith.constant 0.000000e+00 : f32
    %52 = vector.shape_cast %51 : vector<256x1xi1> to vector<256x1xi1>
    %53 = vector.broadcast %52 : vector<256x1xi1> to vector<256x4xi1>
    %54 = vector.broadcast %cst_20 : f32 to vector<256x4xf32>
    %55 = arith.select %53, %54, %49 : vector<256x4xi1>, vector<256x4xf32>
    %c3 = arith.constant 3 : index
    %c0_21 = arith.constant 0 : index
    %c0_22 = arith.constant 0 : index
    %56 = vector.load %arg2[%c3, %c0_21, %c0_22] : memref<9x4x128xf32, #tpu.memory_space<vmem>>, vector<1x4x128xf32>
    %57 = vector.shape_cast %56 : vector<1x4x128xf32> to vector<4x128xf32>
    %cst_23 = arith.constant dense<0.000000e+00> : vector<256x128xf32>
    %58 = tpu.matmul %55, %57, %cst_23 {dimension_numbers = #tpu.dot_dimension_numbers<[1], [0], [0], [1], [0, 0, 1, 1], [], []>} : vector<256x4xf32>, vector<4x128xf32>, vector<256x128xf32> -> vector<256x128xf32>
    %59 = arith.addf %48, %58 : vector<256x128xf32>
    %60 = vector.extract_strided_slice %1 {offsets = [32, 0], sizes = [256, 4], strides = [1, 1]} : vector<320x4xf32> to vector<256x4xf32>
    %c4 = arith.constant 4 : index
    %c0_24 = arith.constant 0 : index
    %c0_25 = arith.constant 0 : index
    %61 = vector.load %arg2[%c4, %c0_24, %c0_25] : memref<9x4x128xf32, #tpu.memory_space<vmem>>, vector<1x4x128xf32>
    %62 = vector.shape_cast %61 : vector<1x4x128xf32> to vector<4x128xf32>
    %cst_26 = arith.constant dense<0.000000e+00> : vector<256x128xf32>
    %63 = tpu.matmul %60, %62, %cst_26 {dimension_numbers = #tpu.dot_dimension_numbers<[1], [0], [0], [1], [0, 0, 1, 1], [], []>} : vector<256x4xf32>, vector<4x128xf32>, vector<256x128xf32> -> vector<256x128xf32>
    %64 = arith.addf %59, %63 : vector<256x128xf32>
    %65 = vector.extract_strided_slice %1 {offsets = [33, 0], sizes = [256, 4], strides = [1, 1]} : vector<320x4xf32> to vector<256x4xf32>
    %c15_i32_27 = arith.constant 15 : i32
    %66 = vector.broadcast %c15_i32_27 : i32 to vector<256x1xi32>
    %67 = arith.cmpi eq, %18, %66 : vector<256x1xi32>
    %cst_28 = arith.constant 0.000000e+00 : f32
    %68 = vector.shape_cast %67 : vector<256x1xi1> to vector<256x1xi1>
    %69 = vector.broadcast %68 : vector<256x1xi1> to vector<256x4xi1>
    %70 = vector.broadcast %cst_28 : f32 to vector<256x4xf32>
    %71 = arith.select %69, %70, %65 : vector<256x4xi1>, vector<256x4xf32>
    %c5 = arith.constant 5 : index
    %c0_29 = arith.constant 0 : index
    %c0_30 = arith.constant 0 : index
    %72 = vector.load %arg2[%c5, %c0_29, %c0_30] : memref<9x4x128xf32, #tpu.memory_space<vmem>>, vector<1x4x128xf32>
    %73 = vector.shape_cast %72 : vector<1x4x128xf32> to vector<4x128xf32>
    %cst_31 = arith.constant dense<0.000000e+00> : vector<256x128xf32>
    %74 = tpu.matmul %71, %73, %cst_31 {dimension_numbers = #tpu.dot_dimension_numbers<[1], [0], [0], [1], [0, 0, 1, 1], [], []>} : vector<256x4xf32>, vector<4x128xf32>, vector<256x128xf32> -> vector<256x128xf32>
    %75 = arith.addf %64, %74 : vector<256x128xf32>
    %76 = vector.extract_strided_slice %1 {offsets = [47, 0], sizes = [256, 4], strides = [1, 1]} : vector<320x4xf32> to vector<256x4xf32>
    %c0_i32_32 = arith.constant 0 : i32
    %77 = vector.broadcast %c0_i32_32 : i32 to vector<256x1xi32>
    %78 = arith.cmpi eq, %18, %77 : vector<256x1xi32>
    %cst_33 = arith.constant 0.000000e+00 : f32
    %79 = vector.shape_cast %78 : vector<256x1xi1> to vector<256x1xi1>
    %80 = vector.broadcast %79 : vector<256x1xi1> to vector<256x4xi1>
    %81 = vector.broadcast %cst_33 : f32 to vector<256x4xf32>
    %82 = arith.select %80, %81, %76 : vector<256x4xi1>, vector<256x4xf32>
    %c6 = arith.constant 6 : index
    %c0_34 = arith.constant 0 : index
    %c0_35 = arith.constant 0 : index
    %83 = vector.load %arg2[%c6, %c0_34, %c0_35] : memref<9x4x128xf32, #tpu.memory_space<vmem>>, vector<1x4x128xf32>
    %84 = vector.shape_cast %83 : vector<1x4x128xf32> to vector<4x128xf32>
    %cst_36 = arith.constant dense<0.000000e+00> : vector<256x128xf32>
    %85 = tpu.matmul %82, %84, %cst_36 {dimension_numbers = #tpu.dot_dimension_numbers<[1], [0], [0], [1], [0, 0, 1, 1], [], []>} : vector<256x4xf32>, vector<4x128xf32>, vector<256x128xf32> -> vector<256x128xf32>
    %86 = arith.addf %75, %85 : vector<256x128xf32>
    %87 = vector.extract_strided_slice %1 {offsets = [48, 0], sizes = [256, 4], strides = [1, 1]} : vector<320x4xf32> to vector<256x4xf32>
    %c7 = arith.constant 7 : index
    %c0_37 = arith.constant 0 : index
    %c0_38 = arith.constant 0 : index
    %88 = vector.load %arg2[%c7, %c0_37, %c0_38] : memref<9x4x128xf32, #tpu.memory_space<vmem>>, vector<1x4x128xf32>
    %89 = vector.shape_cast %88 : vector<1x4x128xf32> to vector<4x128xf32>
    %cst_39 = arith.constant dense<0.000000e+00> : vector<256x128xf32>
    %90 = tpu.matmul %87, %89, %cst_39 {dimension_numbers = #tpu.dot_dimension_numbers<[1], [0], [0], [1], [0, 0, 1, 1], [], []>} : vector<256x4xf32>, vector<4x128xf32>, vector<256x128xf32> -> vector<256x128xf32>
    %91 = arith.addf %86, %90 : vector<256x128xf32>
    %92 = vector.extract_strided_slice %1 {offsets = [49, 0], sizes = [256, 4], strides = [1, 1]} : vector<320x4xf32> to vector<256x4xf32>
    %c15_i32_40 = arith.constant 15 : i32
    %93 = vector.broadcast %c15_i32_40 : i32 to vector<256x1xi32>
    %94 = arith.cmpi eq, %18, %93 : vector<256x1xi32>
    %cst_41 = arith.constant 0.000000e+00 : f32
    %95 = vector.shape_cast %94 : vector<256x1xi1> to vector<256x1xi1>
    %96 = vector.broadcast %95 : vector<256x1xi1> to vector<256x4xi1>
    %97 = vector.broadcast %cst_41 : f32 to vector<256x4xf32>
    %98 = arith.select %96, %97, %92 : vector<256x4xi1>, vector<256x4xf32>
    %c8 = arith.constant 8 : index
    %c0_42 = arith.constant 0 : index
    %c0_43 = arith.constant 0 : index
    %99 = vector.load %arg2[%c8, %c0_42, %c0_43] : memref<9x4x128xf32, #tpu.memory_space<vmem>>, vector<1x4x128xf32>
    %100 = vector.shape_cast %99 : vector<1x4x128xf32> to vector<4x128xf32>
    %cst_44 = arith.constant dense<0.000000e+00> : vector<256x128xf32>
    %101 = tpu.matmul %98, %100, %cst_44 {dimension_numbers = #tpu.dot_dimension_numbers<[1], [0], [0], [1], [0, 0, 1, 1], [], []>} : vector<256x4xf32>, vector<4x128xf32>, vector<256x128xf32> -> vector<256x128xf32>
    %102 = arith.addf %91, %101 : vector<256x128xf32>
    %cst_45 = arith.constant 0.000000e+00 : f32
    %103 = vector.broadcast %cst_45 : f32 to vector<256x128xf32>
    %104 = arith.cmpf oge, %102, %103 : vector<256x128xf32>
    %cst_46 = arith.constant 0.00999999977 : f32
    %105 = vector.broadcast %cst_46 : f32 to vector<256x128xf32>
    %106 = arith.mulf %105, %102 : vector<256x128xf32>
    %107 = arith.select %104, %102, %106 : vector<256x128xi1>, vector<256x128xf32>
    %c0_47 = arith.constant 0 : index
    %c0_48 = arith.constant 0 : index
    %c0_49 = arith.constant 0 : index
    %108 = vector.load %arg4[%c0_47, %c0_48, %c0_49] : memref<1x256x128xf32, #tpu.memory_space<vmem>>, vector<1x256x128xf32>
    %109 = vector.shape_cast %108 : vector<1x256x128xf32> to vector<256x128xf32>
    %110 = vector.shape_cast %107 : vector<256x128xf32> to vector<1x256x128xf32>
    tpu.vector_store %arg4[%c0_47, %c0_48, %c0_49], %110 {strides = array<i32>} : memref<1x256x128xf32, #tpu.memory_space<vmem>>, vector<1x256x128xf32>,
    return
  }
  func.func @transform_0(%arg0: i32) -> (i32, i32, i32) {
    %c0_i32 = arith.constant 0 : i32
    %c0_i32_0 = arith.constant 0 : i32
    %c0_i32_1 = arith.constant 0 : i32
    return %arg0, %c0_i32, %c0_i32_0 : i32, i32, i32
  }
  func.func @transform_1(%arg0: i32) -> (i32, i32, i32) {
    %c0_i32 = arith.constant 0 : i32
    %c0_i32_0 = arith.constant 0 : i32
    %c0_i32_1 = arith.constant 0 : i32
    %c0_i32_2 = arith.constant 0 : i32
    return %c0_i32, %c0_i32_0, %c0_i32_1 : i32, i32, i32
  }
  func.func @transform_2(%arg0: i32) -> (i32, i32) {
    %c0_i32 = arith.constant 0 : i32
    %c0_i32_0 = arith.constant 0 : i32
    %c0_i32_1 = arith.constant 0 : i32
    return %c0_i32, %c0_i32_0 : i32, i32
  }
  func.func @transform_3(%arg0: i32) -> (i32, i32, i32) {
    %c0_i32 = arith.constant 0 : i32
    %c0_i32_0 = arith.constant 0 : i32
    %c0_i32_1 = arith.constant 0 : i32
    return %arg0, %c0_i32, %c0_i32_0 : i32, i32, i32
  }
}

</mosaic_0001>

<bundles_post_ra>
// kernel: tpu_custom_call.1
= control target key start
LH: loop header
LB: loop body
LE: loop exit
PB: predicated region body
PF: predicated region fallthrough
CT: control target
= control target key end

     0   :  { %8 = vsyncpa [#allocation3], 0  ;;  %s7830_s0 = inlined_call_operand.vmem [shape: f32[2,320,4], index: 0, kind: input, shape index: {}]   ;;  %s7831_s1 = inlined_call_operand.vmem [shape: f32[9,4,128], index: 1, kind: input, shape index: {}]   ;;  %s7832_s2 = inlined_call_operand.vmem [shape: f32[1,128], index: 2, kind: input, shape index: {}]   ;;  %s7833_s3 = inlined_call_operand.hbm [shape: f32[2,256,128], index: 3, kind: output, shape index: {}]  }
   0x1   :  { %10 = vsyncpa [#allocation3 + $0x1], 0  ;;  %s5706_s12 = smov 0   ;;  %s5708_s13 = smov 0  }
   0x2   :  { %s5710_s14 = smov 0   ;;  %s5712_s15 = smov 0  }
   0x3 LB: > { %s5727_s16 = sadd.s32 4294967295, %s5681_s15   ;;  %s4484_s17 = sadd.s32 4294967294, %s5681_s15   ;;  %s5681_s15 = sphi %s5712_s15, %s8712_s15   ;;  %s5677_s14 = sphi %s5710_s14, %s8711_s14   ;;  %s5673_s13 = sphi %s5708_s13, %s8710_s13   ;;  %s5669_s12 = sphi %s5706_s12, %s8709_s12  }
   0x4   : > { %s5731_s18 = sadd.s32 1, %s5681_s15   ;;  %s91_s19 = sadd.s32 1, %s5677_s14 }
   0x5   : > { %s88_s20 = ssub.s32 %s5681_s15, %s5731_s18  ;;  %p101_p0 = scmp.ne.s32.totalorder %s5677_s14, %s5673_s13 }
   0x6   : > { %p89_p1 = scmp.eq.s32.totalorder %s88_s20, 0  ;;  %p102_p2 = scmp.eq.s32.totalorder %s5727_s16, 1 }
   0x7   : > { %p107_p3 = scmp.ne.s32.totalorder %s5673_s13, %s5669_s12  ;;  %p108_p4 = scmp.eq.s32.totalorder %s4484_s17, 1 }
   0x8   : > { %s5742_s21 = scalar_select %p89_p1, %s5677_s14, %s91_s19  }
   0x9   : > { %p5744_p5 = por %p102_p2, %p101_p0  ;;  %p5748_p6 = por %p108_p4, %p107_p3 }
   0xa   : > { %p4487_p7 = scmp.ge.s32.totalorder %s5681_s15, 1  ;;  %p140_p8 = scmp.lt.s32.totalorder %s5681_s15, 3 }
   0xc   : > { %p141_p9 = pnand %p4487_p7, %p140_p8 }
   0xe   : > { %144 = sbr.rel (%p141_p9) target bundleno = 551 (0x227), region = 32 }
  0x13   : > { %v890_v0 = vld [vmem:[%s7831_s1] sm:$0xf]  ;;  %vm7869_vm0 = vcmask 1043456   ;;  %p164_p10 = scmp.lt.s32.totalorder %s5727_s16, 1  ;;  %v207_v1 = vlaneseq  ;;  %v5763_v2 = vld [vmem:[%s7831_s1 + $0x4] sm:$0xf] }
  0x14   : > { %5549 = vmatprep.subr.msk.mxu1 %vm7869_vm0, %v890_v0  ;;  %5099 = vmatprep.subr.msk.mxu0 %vm7869_vm0, %v890_v0  ;;  %v5768_v3 = vld [vmem:[%s7831_s1 + $0x8] sm:$0xf]  ;;  %vm7889_vm1 = vcmask 1040384   ;;  %vm7892_vm2 = vcmask 31744   ;;  %v8040_v26 = vmov 0  ;;  %v8045_v38 = vmov 0 }
  0x15   : > { %5550 = vmatpush3.msk.msra.mxu1 %vm7869_vm0, %v890_v0  ;;  %5100 = vmatpush3.msk.msra.mxu0 %vm7869_vm0, %v890_v0  ;;  %s165_s30 = scalar_select %p164_p10, %s5727_s16, 1  ;;  %v5773_v4 = vshrl.u32 %v207_v1, 7  ;;  %v5899_v58 = vld [vmem:[%s7831_s1 + $0xc] sm:$0xf]  ;;  %v8053_v62 = vmov 0 }
  0x16   : > { %5149 = vmatprep.subr.msk.mxu1 %vm7869_vm0, %v5763_v2  ;;  %5199 = vmatprep.subr.msk.mxu0 %vm7869_vm0, %v5768_v3  ;;  %v5919_v63 = vld [vmem:[%s7831_s1 + $0x10] sm:$0xf]  ;;  %s5683_s19 = smov [#allocation2]  }
  0x17   : > { %s5551_s4 = smul.u32 320, %s165_s30  ;;  %v244_v5 = vand.u32 15, %v5773_v4  ;;  %v224_v6 = vadd.s32 128, %v5773_v4  ;;  %v210_v7 = vadd.s32 16, %v5773_v4  ;;  %v226_v8 = vadd.s32 144, %v5773_v4  ;;  %s5625_s20 = sshll.u32 %s5683_s19, 4  ;;  %s5626_s20 = int_to_ptr.vmem [resolvable:$false] %s5625_s20 }
  0x18   : > { %v212_v9 = vadd.s32 32, %v5773_v4  ;;  %v228_v10 = vadd.s32 160, %v5773_v4  ;;  %v5786_v11 = vadd.s32 48, %v5773_v4  ;;  %v5789_v12 = vadd.s32 176, %v5773_v4  ;;  %s5627_s24 = scalar_lea.vmem %s5626_s20, 8192 }
  0x19   : > { %s5794_s7 = scalar_lea.vmem %s7830_s0, %s5551_s4  ;;  %vm5796_vm3 = vcmp.eq.s32.totalorder %v244_v5, 0  ;;  %v356_v14 = vand.u32 15, %v224_v6  ;;  %v258_v15 = vand.u32 15, %v210_v7  ;;  %v370_v16 = vand.u32 15, %v226_v8  ;;  %s161_s4 = sand.u32 1, %s5673_s13  }
  0x1a   : > { %v169_v17 = vld [vmem:[%s5794_s7 + $0x8] sm:$0xff]  ;;  %v5802_v18 = vld [vmem:[%s5794_s7 + $0x10] sm:$0xff]  ;;  %v272_v20 = vand.u32 15, %v212_v9  ;;  %v384_v21 = vand.u32 15, %v228_v10  ;;  %v286_v22 = vand.u32 15, %v5786_v11  ;;  %v5818_v28 = vld [vmem:[%s5794_s7 + $0x18] sm:$0xff] }
  0x1b   : > { %v5805_v19 = vld [vmem:[%s5794_s7 + $0x88] sm:$0xff]  ;;  %v761_v23 = vrot.slane %v169_v17, 7  ;;  %v762_v24 = vrot.slane %v5802_v18, 7  ;;  %v5810_v25 = vld [vmem:[%s5794_s7 + $0x90] sm:$0xff]  ;;  %vm5812_vm4 = vcmp.eq.s32.totalorder %v356_v14, 0  ;;  %v764_v30 = vrot.slane %v5818_v28, 7 }
  0x1c   : > { %v8041_v26 = vsel %vm5812_vm4, 4294967295, %v8040_v26  ;;  %v7834_v27 = vrot.slane %v5805_v19, 7  ;;  %v794_v29 = vrot.slane %v5810_v25, 7  ;;  %v5823_v31 = vld [vmem:[%s5794_s7 + $0x98] sm:$0xff]  ;;  %v5826_v32 = vld [vmem:[%s5794_s7 + $0x20] sm:$0xff]  ;;  %vm5828_vm5 = vcmp.eq.s32.totalorder %v258_v15, 0 }
  0x1d   : > { %8042 = vst [vmem:[#allocation5_spill] sm:$0xff] %v8041_v26  ;;  %v5833_v34 = vld [vmem:[%s5794_s7 + $0xa0] sm:$0xff]  ;;  %v763_v35 = vsel %vm7889_vm1, %v761_v23, %v762_v24  ;;  %v796_v36 = vrot.slane %v5823_v31, 7  ;;  %v766_v37 = vrot.slane %v5826_v32, 7  ;;  %vm5838_vm6 = vcmp.eq.s32.totalorder %v370_v16, 0  ;;  %v5843_v39 = vld [vmem:[%s5794_s7 + $0x28] sm:$0xff] }
  0x1e   : > { %v8046_v38 = vsel %vm5838_vm6, 4294967295, %v8045_v38  ;;  %v5846_v40 = vld [vmem:[%s5794_s7 + $0xa8] sm:$0xff]  ;;  %v858_v41 = vsel %vm5796_vm3, 0.0, %v763_v35  ;;  %v5853_v42 = vsel %vm7889_vm1, %v7834_v27, %v794_v29  ;;  %v765_v43 = vsel %vm7889_vm1, %v762_v24, %v764_v30  ;;  %v5858_v45 = vld [vmem:[%s5794_s7 + $0x30] sm:$0xff]  ;;  %v5875_v51 = vld [vmem:[%s5794_s7 + $0x38] sm:$0xff]  ;;  %s4488_s5 = sshll.u32 %s161_s4, 8 }
  0x1f   : > { %8047 = vst [vmem:[#allocation6_spill] sm:$0xff] %v8046_v38  ;;  %8048 = vst [vmem:[#allocation7_spill] sm:$0xff] %v5853_v42  ;;  %v798_v44 = vrot.slane %v5833_v34, 7  ;;  %5101 = vmatprep.mubr.msk.f32.mxu0 %vm7892_vm2, %v858_v41  ;;  %v874_v46 = vsel %vm5812_vm4, 0.0, %v5853_v42  ;;  %v5865_v47 = vsel %vm7889_vm1, %v794_v29, %v796_v36  ;;  %v5868_v48 = vsel %vm7889_vm1, %v764_v30, %v766_v37  ;;  %v5872_v50 = vld [vmem:[%s5794_s7 + $0xb0] sm:$0xff]  ;;  %v5878_v52 = vld [vmem:[%s5794_s7 + $0xb8] sm:$0xff] }
  0x20   : > { %8049 = vst [vmem:[#allocation8_spill] sm:$0xff] %v5865_v47  ;;  %v768_v49 = vrot.slane %v5843_v39, 7  ;;  %5125 = vmatprep.mubr.msk.f32.mxu1 %vm7892_vm2, %v874_v46  ;;  %5102 = vmatmul.mubr.msk.f32.vlgmr.msra.gmra.mxu0 %vm7892_vm2, %v765_v43  ;;  %v860_v53 = vsel %vm5828_vm5, 0.0, %v5868_v48  ;;  %v800_v55 = vrot.slane %v5846_v40, 7  ;;  %vm5889_vm7 = vcmp.eq.s32.totalorder %v272_v20, 0  ;;  %v5894_v57 = vld [vmem:[%s5794_s7 + $0x40] sm:$0xff] }
  0x21   : > { %v5886_v54 = vsel %vm7889_vm1, %v796_v36, %v798_v44  ;;  %5126 = vmatmul.mubr.msk.f32.vlgmr.msra.gmra.mxu1 %vm7892_vm2, %v5865_v47  ;;  %5200 = vmatpush3.msk.msra.mxu0 %vm7869_vm0, %v5768_v3  ;;  %v770_v61 = vrot.slane %v5858_v45, 7  ;;  %vm5912_vm8 = vcmp.eq.s32.totalorder %v384_v21, 0  ;;  %v802_v1 = vrot.slane %v5872_v50, 7  ;;  %v5931_v6 = vld [vmem:[%s5794_s7 + $0xc0] sm:$0xff]  ;;  %v5944_v10 = vld [vmem:[%s5794_s7 + $0x48] sm:$0xff]  ;;  %v5966_v17 = vld [vmem:[%s5794_s7 + $0x50] sm:$0xff] }
  0x22   : > { %v876_v59 = vsel %vm5838_vm6, 0.0, %v5886_v54  ;;  %v5909_v60 = vsel %vm7889_vm1, %v766_v37, %v768_v49  ;;  %v8054_v62 = vsel %vm5912_vm8, 4294967295, %v8053_v62  ;;  %5150 = vmatpush3.msk.msra.mxu1 %vm7869_vm0, %v5763_v2  ;;  %5104 = vmatprep.mubr.msk.f32.mxu0 %vm7892_vm2, %v860_v53  ;;  %v5925_v0 = vsel %vm7889_vm1, %v798_v44, %v800_v55  ;;  %v5947_v11 = vld [vmem:[%s5794_s7 + $0xc8] sm:$0xff]  ;;  %v5969_v20 = vld [vmem:[%s5794_s7 + $0xd0] sm:$0xff]  ;;  %v5995_v37 = vld [vmem:[%s5794_s7 + $0x58] sm:$0xff]  ;;  %s7669_s6 = scalar_lea.vmem [#allocation2], %s4488_s5 }
  0x23   : > { %8052 = vst [vmem:[#allocation9_spill] sm:$0xff] %v5909_v60  ;;  %8055 = vst [vmem:[#allocation10_spill] sm:$0xff] %v8054_v62  ;;  %v772_v3 = vrot.slane %v5875_v51, 7  ;;  %v804_v5 = vrot.slane %v5878_v52, 7  ;;  %5128 = vmatprep.mubr.msk.f32.mxu1 %vm7892_vm2, %v876_v59  ;;  %v5935_v7 = vsel %vm7889_vm1, %v768_v49, %v770_v61  ;;  %vm5937_vm9 = vcmp.eq.s32.totalorder %v286_v22, 0  ;;  %5249 = vmatprep.subr.msk.mxu1 %vm7869_vm0, %v5899_v58  ;;  %v6004_v49 = vld [vmem:[%s5794_s7 + $0xd8] sm:$0xff] }
  0x24   : > { %8056 = vst [vmem:[#allocation11_spill] sm:$0xff] %v5925_v0  ;;  %v774_v8 = vrot.slane %v5894_v57, 7  ;;  %v398_v9 = vand.u32 15, %v5789_v12  ;;  %5105 = vmatmul.mubr.msk.f32.gmra.mxu0 %vm7892_vm2, %v5909_v60  ;;  %v862_v14 = vsel %vm5889_vm7, 0.0, %v5935_v7  ;;  %v5957_v15 = vsel %vm7889_vm1, %v800_v55, %v802_v1  ;;  %5299 = vmatprep.subr.msk.mxu0 %vm7869_vm0, %v5919_v63  ;;  %v6007_v53 = vld [vmem:[%s5794_s7 + $0x60] sm:$0xff]  ;;  %v6093_v38 = vld [vmem:[%s5794_s7 + $0xf8] sm:$0xff] }
  0x25   : > { %8059 = vst [vmem:[#allocation12_spill] sm:$0xff] %v5957_v15  ;;  %v5960_v16 = vsel %vm7889_vm1, %v770_v61, %v772_v3  ;;  %v5963_v12 = vsel %vm7889_vm1, %v802_v1, %v804_v5  ;;  %5129 = vmatmul.mubr.msk.f32.gmra.mxu1 %vm7892_vm2, %v5925_v0  ;;  %5107 = vmatprep.mubr.msk.f32.mxu0 %vm7892_vm2, %v862_v14  ;;  %v878_v21 = vsel %vm5912_vm8, 0.0, %v5957_v15  ;;  %v8062_v23 = vmov 0  ;;  %v6031_v14 = vld [vmem:[%s5794_s7 + $0xe0] sm:$0xff]  ;;  %8080 = vst [vmem:[#allocation25_spill] sm:$0xff] %v6093_v38  ;;  %s4422_s8 = sshll.u32 %s7669_s6, 4  ;;  %s7785_s8 = int_to_ptr.vmem [resolvable:$true] %s4422_s8 }
  0x26   : > { %8060 = vst [vmem:[#allocation13_spill] sm:$0xff] %v5960_v16  ;;  %8061 = vst [vmem:[#allocation14_spill] sm:$0xff] %v5963_v12  ;;  %v5980_v22 = vsel %vm7889_vm1, %v772_v3, %v774_v8  ;;  %vm5982_vm10 = vcmp.eq.s32.totalorder %v398_v9, 0  ;;  %v806_v24 = vrot.slane %v5931_v6, 7  ;;  %5131 = vmatprep.mubr.msk.f32.mxu1 %vm7892_vm2, %v878_v21  ;;  %v776_v30 = vrot.slane %v5944_v10, 7  ;;  %v6109_v26 = vld [vmem:[%s5794_s7 + $0x80] sm:$0xff]  ;;  %p5628_p0 = scmp.lt.s32.totalorder %s7785_s8, %s5626_s20 }
  0x27   : > { %v8063_v23 = vsel %vm5982_vm10, 4294967295, %v8062_v23  ;;  %v864_v29 = vsel %vm5937_vm9, 0.0, %v5980_v22  ;;  %v808_v35 = vrot.slane %v5947_v11, 7  ;;  %v216_v36 = vadd.s32 64, %v5773_v4  ;;  %s5621_s17 = scalar_lea.vmem %s7785_s8, 4096 }
  0x28   : > { %8064 = vst [vmem:[#allocation15_spill] sm:$0xff] %v8063_v23  ;;  %v5998_v41 = vsel %vm7889_vm1, %v804_v5, %v806_v24  ;;  %v778_v43 = vrot.slane %v5966_v17, 7  ;;  %v232_v44 = vadd.s32 192, %v5773_v4  ;;  %v810_v46 = vrot.slane %v5969_v20, 7  ;;  %5108 = vmatmul.mubr.msk.f32.gmra.mxu0 %vm7892_vm2, %v5960_v16  ;;  %v6059_v23 = vld [vmem:[%s5794_s7 + $0x70] sm:$0xff]  ;;  %p5622_p11 = scmp.ne.s32.totalorder %s7785_s8, %s5621_s17  ;;  %p5629_p1 = scmp.lt.s32.totalorder %s5627_s24, %s5621_s17 }
  0x29   : > { %8065 = vst [vmem:[#allocation16_spill] sm:$0xff] %v5998_v41  ;;  %v880_v55 = vsel %vm5982_vm10, 0.0, %v5998_v41  ;;  %v6015_v59 = vsel %vm7889_vm1, %v774_v8, %v776_v30  ;;  %v6018_v61 = vsel %vm7889_vm1, %v806_v24, %v808_v35  ;;  %v300_v1 = vand.u32 15, %v216_v36  ;;  %5132 = vmatmul.mubr.msk.f32.gmra.mxu1 %vm7892_vm2, %v5963_v12  ;;  %5110 = vmatprep.mubr.msk.f32.mxu0 %vm7892_vm2, %v864_v29  ;;  %v6042_v36 = vld [vmem:[%s5794_s7 + $0x68] sm:$0xff] }
  0x2a   : > { %8066 = vst [vmem:[#allocation17_spill] sm:$0xff] %v6015_v59  ;;  %8067 = vst [vmem:[#allocation18_spill] sm:$0xff] %v6018_v61  ;;  %v6024_v3 = vsel %vm7889_vm1, %v776_v30, %v778_v43  ;;  %v412_v5 = vand.u32 15, %v232_v44  ;;  %v6027_v9 = vsel %vm7889_vm1, %v808_v35, %v810_v46  ;;  %v780_v8 = vrot.slane %v5995_v37, 7  ;;  %5134 = vmatprep.mubr.msk.f32.mxu1 %vm7892_vm2, %v880_v55  ;;  %v6045_v35 = vld [vmem:[%s5794_s7 + $0xe8] sm:$0xff]  ;;  %p5623_p12 = pnand %p5622_p11, %p5744_p5  ;;  %p5630_p2 = por %p5629_p1, %p5628_p0 }
  0x2b   : > { %8068 = vst [vmem:[#allocation19_spill] sm:$0xff] %v6027_v9  ;;  %vm6034_vm11 = vcmp.eq.s32.totalorder %v300_v1, 0  ;;  %v812_v24 = vrot.slane %v6004_v49, 7  ;;  %v218_v29 = vadd.s32 80, %v5773_v4  ;;  %v782_v30 = vrot.slane %v6007_v53, 7  ;;  %8071 = vst [vmem:[#allocation20_spill] sm:$0xff] %v6045_v35 }
  0x2c   : > { %v866_v44 = vsel %vm6034_vm11, 0.0, %v6024_v3  ;;  %vm6050_vm12 = vcmp.eq.s32.totalorder %v412_v5, 0  ;;  %v8072_v55 = vmov 0  ;;  %v6055_v1 = vsel %vm7889_vm1, %v778_v43, %v780_v8  ;;  %5111 = vmatmul.mubr.msk.f32.gmra.mxu0 %vm7892_vm2, %v6015_v59  ;;  %p5624_p13 = pneg %p5623_p12 }
  0x2d   : > { %v8073_v55 = vsel %vm6050_vm12, 4294967295, %v8072_v55  ;;  %8075 = vst [vmem:[#allocation22_spill] sm:$0xff] %v6055_v1  ;;  %v234_v27 = vadd.s32 208, %v5773_v4  ;;  %v882_v12 = vsel %vm6050_vm12, 0.0, %v6027_v9  ;;  %v6067_v62 = vsel %vm7889_vm1, %v810_v46, %v812_v24  ;;  %5135 = vmatmul.mubr.msk.f32.gmra.mxu1 %vm7892_vm2, %v6018_v61  ;;  %5113 = vmatprep.mubr.msk.f32.mxu0 %vm7892_vm2, %v866_v44  ;;  %v6079_v9 = vld [vmem:[%s5794_s7 + $0xf0] sm:$0xff]  ;;  %v6090_v61 = vld [vmem:[%s5794_s7 + $0x78] sm:$0xff] }
  0x2e   : > { %8074 = vst [vmem:[#allocation21_spill] sm:$0xff] %v8073_v55  ;;  %8076 = vst [vmem:[#allocation23_spill] sm:$0xff] %v6067_v62  ;;  %v314_v5 = vand.u32 15, %v218_v29  ;;  %v6070_v43 = vsel %vm7889_vm1, %v780_v8, %v782_v30  ;;  %v814_v0 = vrot.slane %v6031_v14, 7  ;;  %v784_v55 = vrot.slane %v6042_v36, 7  ;;  %5137 = vmatprep.mubr.msk.f32.mxu1 %vm7892_vm2, %v882_v12  ;;  %p5631_p3 = pnand %p5630_p2, %p5624_p13 }
  0x2f   : > { %v426_v41 = vand.u32 15, %v234_v27  ;;  %v816_v46 = vrot.slane %v6045_v35, 7  ;;  %8077 = vst [vmem:[#allocation24_spill] sm:$0xff] %v6079_v9  ;;  %v220_v29 = vadd.s32 96, %v5773_v4  ;;  %v786_v27 = vrot.slane %v6059_v23, 7 }
  0x30   : > { %vm6082_vm14 = vcmp.eq.s32.totalorder %v314_v5, 0  ;;  %v236_v44 = vadd.s32 224, %v5773_v4  ;;  %v8081_v12 = vmov 0  ;;  %v6103_v5 = vsel %vm7889_vm1, %v812_v24, %v814_v0  ;;  %5114 = vmatmul.mubr.msk.f32.gmra.mxu0 %vm7892_vm2, %v6055_v1 }
  0x31   : > { %v868_v15 = vsel %vm6082_vm14, 0.0, %v6070_v43  ;;  %vm6098_vm15 = vcmp.eq.s32.totalorder %v426_v41, 0  ;;  %8084 = vst [vmem:[#allocation27_spill] sm:$0xff] %v6103_v5  ;;  %v6106_v47 = vsel %vm7889_vm1, %v782_v30, %v784_v55  ;;  %v6117_v41 = vsel %vm7889_vm1, %v814_v0, %v816_v46  ;;  %5138 = vmatmul.mubr.msk.f32.gmra.mxu1 %vm7892_vm2, %v6067_v62  ;;  %v6136_v62 = vld [vmem:[%s5794_s7 + $0x100] sm:$0xff] }
  0x32   : > { %v8082_v12 = vsel %vm6098_vm15, 4294967295, %v8081_v12  ;;  %8085 = vst [vmem:[#allocation28_spill] sm:$0xff] %v6106_v47  ;;  %v884_v42 = vsel %vm6098_vm15, 0.0, %v6103_v5  ;;  %8086 = vst [vmem:[#allocation29_spill] sm:$0xff] %v6117_v41  ;;  %v328_v59 = vand.u32 15, %v220_v29  ;;  %v6120_v24 = vsel %vm7889_vm1, %v784_v55, %v786_v27  ;;  %5116 = vmatprep.mubr.msk.f32.mxu0 %vm7892_vm2, %v868_v15 }
  0x33   : > { %8083 = vst [vmem:[#allocation26_spill] sm:$0xff] %v8082_v12  ;;  %v440_v30 = vand.u32 15, %v236_v44  ;;  %v818_v1 = vrot.slane %v6079_v9, 7  ;;  %v788_v16 = vrot.slane %v6090_v61, 7  ;;  %v820_v12 = vrot.slane %v6093_v38, 7  ;;  %5140 = vmatprep.mubr.msk.f32.mxu1 %vm7892_vm2, %v884_v42  ;;  %8089 = vst [vmem:[#allocation30_spill] sm:$0xff] %v6136_v62 }
  0x34   : > { %vm6129_vm0 = vcmp.eq.s32.totalorder %v328_v59, 0  ;;  %v222_v55 = vadd.s32 112, %v5773_v4  ;;  %v790_v29 = vrot.slane %v6109_v26, 7  ;;  %v238_v15 = vadd.s32 240, %v5773_v4  ;;  %v6140_v44 = vld [vmem:[%s5794_s7 + $0x108] sm:$0xff]  ;;  %5117 = vmatmul.mubr.msk.f32.gmra.mxu0 %vm7892_vm2, %v6106_v47 }
  0x35   : > { %8090 = vst [vmem:[#allocation31_spill] sm:$0xff] %v6140_v44  ;;  %v870_v5 = vsel %vm6129_vm0, 0.0, %v6120_v24  ;;  %vm6145_vm13 = vcmp.eq.s32.totalorder %v440_v30, 0  ;;  %v8091_v42 = vmov 0  ;;  %v6150_v59 = vsel %vm7889_vm1, %v816_v46, %v818_v1  ;;  %5141 = vmatmul.mubr.msk.f32.gmra.mxu1 %vm7892_vm2, %v6117_v41 }
  0x36   : > { %v8092_v42 = vsel %vm6145_vm13, 4294967295, %v8091_v42  ;;  %8094 = vst [vmem:[#allocation33_spill] sm:$0xff] %v6150_v59  ;;  %v6153_v60 = vsel %vm7889_vm1, %v786_v27, %v788_v16  ;;  %v886_v38 = vsel %vm6145_vm13, 0.0, %v6150_v59  ;;  %v6161_v9 = vsel %vm7889_vm1, %v818_v1, %v820_v12  ;;  %5119 = vmatprep.mubr.msk.f32.mxu0 %vm7892_vm2, %v870_v5 }
  0x37   : > { %8093 = vst [vmem:[#allocation32_spill] sm:$0xff] %v8092_v42  ;;  %8095 = vst [vmem:[#allocation34_spill] sm:$0xff] %v6153_v60  ;;  %v342_v30 = vand.u32 15, %v222_v55  ;;  %v6164_v35 = vsel %vm7889_vm1, %v788_v16, %v790_v29  ;;  %v454_v46 = vand.u32 15, %v238_v15  ;;  %v822_v27 = vrot.slane %v6136_v62, 7  ;;  %5143 = vmatprep.mubr.msk.f32.mxu1 %vm7892_vm2, %v886_v38 }
  0x38   : > { %8096 = vst [vmem:[#allocation35_spill] sm:$0xff] %v6161_v9  ;;  %v8097_v47 = vrot.slane %v5805_v19, 7  ;;  %v7903_v1 = vrot.slane %v6140_v44, 7  ;;  %v8099_v16 = vmov 0  ;;  %v1673_v55 = vrot.slane %v5802_v18, 1 }
  0x39   : > { %vm6177_vm13 = vcmp.eq.s32.totalorder %v342_v30, 0  ;;  %v1674_v5 = vrot.slane %v5818_v28, 1  ;;  %v209_v15 = vadd.s32 8, %v5773_v4  ;;  %vm8104_vm15 = vcmask 1040384  }
  0x3a   : > { %v6173_v42 = vsel %vm7889_vm1, %v790_v29, %v8097_v47  ;;  %v8100_v16 = vsel %vm6177_vm13, 4294967295, %v8099_v16  ;;  %v872_v41 = vsel %vm6177_vm13, 0.0, %v6164_v35  ;;  %vm6187_vm1 = vcmp.eq.s32.totalorder %v454_v46, 0  ;;  %vm8106_vm2 = vmmov %vm8104_vm15 }
  0x3b   : > { %8098 = vst [vmem:[#allocation36_spill] sm:$0xff] %v6173_v42  ;;  %v8101_v47 = vmov 0  ;;  %v6192_v38 = vsel %vm8104_vm15, %v820_v12, %v822_v27  ;;  %v6197_v29 = vsel %vm8106_vm2, %v822_v27, %v7903_v1  ;;  %vm8107_vm12 = vcmask 31744  }
  0x3c   : > { %v8102_v47 = vsel %vm6187_vm1, 4294967295, %v8101_v47  ;;  %8105 = vst [vmem:[#allocation38_spill] sm:$0xff] %v6192_v38  ;;  %5120 = vmatmul.mubr.msk.f32.gmra.mxu0 %vm8107_vm12, %v6153_v60  ;;  %v888_v30 = vsel %vm6187_vm1, 0.0, %v6192_v38  ;;  %vm8108_vm10 = vcmask 1046528   ;;  %v251_v59 = vand.u32 15, %v209_v15  ;;  %vm8109_vm15 = vmmov %vm8107_vm12 }
  0x3d   : > { %8103 = vst [vmem:[#allocation37_spill] sm:$0xff] %v8102_v47  ;;  %v1675_v46 = vsel %vm8108_vm10, %v1673_v55, %v1674_v5  ;;  %v1676_v62 = vrot.slane %v5826_v32, 1  ;;  %5144 = vmatmul.mubr.msk.f32.gmra.mxu1 %vm8109_vm15, %v6161_v9  ;;  %vm8110_vm8 = vmmov %vm8107_vm12  ;;  %v1678_v12 = vrot.slane %v5843_v39, 1  ;;  %v211_v27 = vadd.s32 24, %v5773_v4 }
  0x3e   : > { %5122 = vmatprep.mubr.msk.f32.mxu0 %vm8110_vm8, %v872_v41  ;;  %v1680_v1 = vrot.slane %v5858_v45, 1  ;;  %v1682_v60 = vrot.slane %v5875_v51, 1  ;;  %vm8111_vm2 = vmmov %vm8110_vm8  ;;  %vm6214_vm12 = vcmp.eq.s32.totalorder %v251_v59, 15  ;;  %v8112_v55 = vmov 0 }
  0x3f   : > { %5146 = vmatprep.mubr.msk.f32.mxu1 %vm8111_vm2, %v888_v30  ;;  %v8113_v55 = vsel %vm6214_vm12, 4294967295, %v8112_v55  ;;  %v1677_v15 = vsel %vm8108_vm10, %v1674_v5, %v1676_v62  ;;  %v213_v47 = vadd.s32 40, %v5773_v4  ;;  %v1684_v41 = vrot.slane %v5894_v57, 1  ;;  %vm8115_vm8 = vmmov %vm8108_vm10 }
  0x40   : > { %8114 = vst [vmem:[#allocation39_spill] sm:$0xff] %v8113_v55  ;;  %v265_v9 = vand.u32 15, %v211_v27  ;;  %v6222_v38 = vsel %vm8115_vm8, %v1678_v12, %v1680_v1  ;;  %vm8117_vm15 = vmmov %vm8111_vm2  ;;  %v1771_v5 = vsel %vm6214_vm12, 0.0, %v1677_v15  ;;  %v8123_v59 = vmov 0  ;;  %v6254_v15 = vld [vmem:[%s7831_s1 + $0x14] sm:$0xf] }
  0x41   : > { %8116 = vst [vmem:[#allocation40_spill] sm:$0xff] %v6222_v38  ;;  %5123 = vmatmul.mubr.msk.f32.gmra.mxu0 %vm8117_vm15, %v6173_v42  ;;  %vm8118_vm2 = vmmov %vm8115_vm8  ;;  %v279_v42 = vand.u32 15, %v213_v47  ;;  %v215_v44 = vadd.s32 56, %v5773_v4  ;;  %v6268_v47 = vld [vmem:[%s7831_s1 + $0x18] sm:$0xf]  ;;  %vm8144_vm4 = vcmask 1046528  }
  0x42   : > { %v6230_v30 = vsel %vm8118_vm2, %v1682_v60, %v1684_v41  ;;  %vm8120_vm10 = vmmov %vm8117_vm15  ;;  %vm6242_vm15 = vcmp.eq.s32.totalorder %v265_v9, 15  ;;  %v1686_v9 = vrot.slane %v5944_v10, 1  ;;  %v1692_v27 = vrot.slane %v6007_v53, 1 }
  0x43   : > { %8119 = vst [vmem:[#allocation41_spill] sm:$0xff] %v6230_v30  ;;  %5147 = vmatmul.mubr.msk.f32.gmra.mxu1 %vm8120_vm10, %v6197_v29  ;;  %vm8121_vm1 = vmmov %vm8120_vm10  ;;  %v8124_v59 = vsel %vm6242_vm15, 4294967295, %v8123_v59  ;;  %v8410_v56 = vsel %vm5937_vm9, 0.0, %v6070_v43  ;;  %v8418_v2 = vsel %vm6034_vm11, 0.0, %v6120_v24  ;;  %v8427_v21 = vsel %vm6082_vm14, 0.0, %v6164_v35 }
  0x44   : > { %5201 = vmatprep.mubr.msk.f32.mxu0 %vm8121_vm1, %v1675_v46  ;;  %vm8122_vm8 = vmmov %vm8121_vm1  ;;  %8125 = vst [vmem:[#allocation42_spill] sm:$0xff] %v8124_v59 }
  0x45   : > { %5151 = vmatprep.mubr.msk.f32.mxu1 %vm8122_vm8, %v5802_v18  ;;  %vm8126_vm2 = vmmov %vm8121_vm1  ;;  %vm8127_vm1 = vcmask 1046528   ;;  %vm8130_vm8 = vcmask 1043456   ;;  %v1773_v18 = vsel %vm6242_vm15, 0.0, %v6222_v38  ;;  %v8251_v38 = vld [vmem:[#allocation30_spill] sm:$0xff] }
  0x46   : > { %5202 = vmatmul.mubr.msk.f32.vlgmr.msra.gmra.mxu0 %vm8126_vm2, %v1771_v5  ;;  %v6249_v46 = vsel %vm8127_vm1, %v1676_v62, %v1678_v12  ;;  %vm8129_vm10 = vmmov %vm8126_vm2  ;;  %v1688_v62 = vrot.slane %v5966_v17, 1  ;;  %v293_v12 = vand.u32 15, %v215_v44  ;;  %v217_v5 = vadd.s32 72, %v5773_v4 }
  0x47   : > { %8128 = vst [vmem:[#allocation43_spill] sm:$0xff] %v6249_v46  ;;  %5152 = vmatmul.mubr.msk.f32.vlgmr.msra.gmra.mxu1 %vm8129_vm10, %v5818_v28  ;;  %5300 = vmatpush3.msk.msra.mxu0 %vm8130_vm8, %v5919_v63  ;;  %vm8131_vm2 = vmmov %vm8130_vm8  ;;  %vm6277_vm8 = vcmp.eq.s32.totalorder %v279_v42, 15  ;;  %v8135_v63 = vmov 0  ;;  %v1690_v42 = vrot.slane %v5995_v37, 1  ;;  %v1732_v55 = vrot.slane %v8251_v38, 1 }
  0x48   : > { %5250 = vmatpush3.msk.msra.mxu1 %vm8131_vm2, %v5899_v58  ;;  %vm8132_vm1 = vmmov %vm8129_vm10  ;;  %vm8133_vm10 = vcmask 1046528   ;;  %v8136_v63 = vsel %vm6277_vm8, 4294967295, %v8135_v63  ;;  %v1775_v58 = vsel %vm6277_vm8, 0.0, %v6230_v30  ;;  %v225_v30 = vadd.s32 136, %v5773_v4 }
  0x49   : > { %5154 = vmatprep.mubr.msk.f32.mxu1 %vm8132_vm1, %v5826_v32  ;;  %v6275_v28 = vsel %vm8133_vm10, %v1680_v1, %v1682_v60  ;;  %8137 = vst [vmem:[#allocation45_spill] sm:$0xff] %v8136_v63  ;;  %vm8138_vm15 = vmmov %vm8132_vm1  ;;  %v6297_v60 = vsel %vm8144_vm4, %v1684_v41, %v1686_v9  ;;  %v8149_v1 = vmov 0  ;;  %v219_v63 = vadd.s32 88, %v5773_v4 }
  0x4a   : > { %8134 = vst [vmem:[#allocation44_spill] sm:$0xff] %v6275_v28  ;;  %5204 = vmatprep.mubr.msk.f32.mxu0 %vm8138_vm15, %v6249_v46  ;;  %vm8139_vm12 = vmmov %vm8131_vm2 }
  0x4b   : > { %5349 = vmatprep.subr.msk.mxu1 %vm8139_vm12, %v6254_v15  ;;  %vm8140_vm2 = vmmov %vm8132_vm1  ;;  %8145 = vst [vmem:[#allocation46_spill] sm:$0xff] %v6297_v60  ;;  %v321_v59 = vand.u32 15, %v219_v63  ;;  %v1698_v63 = vrot.slane %v6090_v61, 1 }
  0x4c   : > { %5205 = vmatmul.mubr.msk.f32.gmra.mxu0 %vm8140_vm2, %v1773_v18  ;;  %vm8141_vm1 = vmmov %vm8139_vm12  ;;  %v307_v18 = vand.u32 15, %v217_v5  ;;  %v1696_v5 = vrot.slane %v6059_v23, 1 }
  0x4d   : > { %5399 = vmatprep.subr.msk.mxu0 %vm8141_vm1, %v6268_v47  ;;  %vm8142_vm10 = vmmov %vm8140_vm2 }
  0x4e   : > { %5155 = vmatmul.mubr.msk.f32.gmra.mxu1 %vm8142_vm10, %v5843_v39  ;;  %vm8143_vm6 = vmmov %vm8140_vm2 }
  0x4f   : > { %5207 = vmatprep.mubr.msk.f32.mxu0 %vm8143_vm6, %v6275_v28  ;;  %vm8146_vm15 = vmmov %vm8144_vm4 }
  0x50   : > { %v6300_v44 = vsel %vm8146_vm15, %v1686_v9, %v1688_v62  ;;  %vm8148_vm12 = vmmov %vm8140_vm2  ;;  %vm6305_vm2 = vcmp.eq.s32.totalorder %v293_v12, 15  ;;  %5208 = vmatmul.mubr.msk.f32.gmra.mxu0 %vm8143_vm6, %v1775_v58  ;;  %v1694_v12 = vrot.slane %v6042_v36, 1  ;;  %v8157_v58 = vmov 0 }
  0x51   : > { %8147 = vst [vmem:[#allocation47_spill] sm:$0xff] %v6300_v44  ;;  %5157 = vmatprep.mubr.msk.f32.mxu1 %vm8148_vm12, %v5858_v45  ;;  %v8150_v1 = vsel %vm6305_vm2, 4294967295, %v8149_v1  ;;  %vm8152_vm4 = vmmov %vm8143_vm6  ;;  %v1777_v41 = vsel %vm6305_vm2, 0.0, %v6300_v44  ;;  %vm6326_vm12 = vcmp.eq.s32.totalorder %v307_v18, 15  ;;  %vm6351_vm2 = vcmp.eq.s32.totalorder %v321_v59, 15  ;;  %v8393_v13 = vld [vmem:[#allocation44_spill] sm:$0xff] }
  0x52   : > { %8151 = vst [vmem:[#allocation48_spill] sm:$0xff] %v8150_v1  ;;  %5158 = vmatmul.mubr.msk.f32.gmra.mxu1 %vm8152_vm4, %v5875_v51  ;;  %vm8153_vm1 = vmmov %vm8152_vm4  ;;  %v8158_v58 = vsel %vm6326_vm12, 4294967295, %v8157_v58  ;;  %v221_v1 = vadd.s32 104, %v5773_v4  ;;  %v1700_v44 = vrot.slane %v6109_v26, 1 }
  0x53   : > { %5210 = vmatprep.mubr.msk.f32.mxu0 %vm8153_vm1, %v6297_v60  ;;  %vm8154_vm10 = vmmov %vm8146_vm15  ;;  %8159 = vst [vmem:[#allocation50_spill] sm:$0xff] %v8158_v58  ;;  %v223_v58 = vadd.s32 120, %v5773_v4 }
  0x54   : > { %v6320_v9 = vsel %vm8154_vm10, %v1688_v62, %v1690_v42  ;;  %vm8156_vm15 = vmmov %vm8153_vm1 }
  0x55   : > { %8155 = vst [vmem:[#allocation49_spill] sm:$0xff] %v6320_v9  ;;  %5160 = vmatprep.mubr.msk.f32.mxu1 %vm8156_vm15, %v5894_v57  ;;  %vm8160_vm6 = vmmov %vm8154_vm10 }
  0x56   : > { %v6331_v60 = vsel %vm8160_vm6, %v1690_v42, %v1692_v27  ;;  %vm8162_vm4 = vmmov %vm8153_vm1  ;;  %5161 = vmatmul.mubr.msk.f32.gmra.mxu1 %vm8153_vm1, %v5944_v10  ;;  %v6346_v42 = vsel %vm8160_vm6, %v1694_v12, %v1696_v5 }
  0x57   : > { %8161 = vst [vmem:[#allocation51_spill] sm:$0xff] %v6331_v60  ;;  %5211 = vmatmul.mubr.msk.f32.gmra.mxu0 %vm8162_vm4, %v1777_v41  ;;  %vm8163_vm10 = vmmov %vm8153_vm1  ;;  %v1779_v62 = vsel %vm6326_vm12, 0.0, %v6331_v60  ;;  %v8168_v41 = vmov 0  ;;  %v1781_v59 = vsel %vm6351_vm2, 0.0, %v6346_v42 }
  0x58   : > { %5213 = vmatprep.mubr.msk.f32.mxu0 %vm8163_vm10, %v6320_v9  ;;  %vm8164_vm15 = vmmov %vm8160_vm6  ;;  %8166 = vst [vmem:[#allocation53_spill] sm:$0xff] %v6346_v42  ;;  %v8169_v41 = vsel %vm6351_vm2, 4294967295, %v8168_v41  ;;  %v335_v9 = vand.u32 15, %v221_v1  ;;  %v6367_v1 = vsel %vm8160_vm6, %v1696_v5, %v1698_v63  ;;  %v1714_v42 = vrot.slane %v5878_v52, 1 }
  0x59   : > { %v6343_v18 = vsel %vm8164_vm15, %v1692_v27, %v1694_v12  ;;  %vm8167_vm4 = vmmov %vm8153_vm1  ;;  %8170 = vst [vmem:[#allocation54_spill] sm:$0xff] %v8169_v41  ;;  %v1702_v27 = vrot.slane %v5805_v19, 1  ;;  %v1704_v12 = vrot.slane %v5810_v25, 1  ;;  %v363_v41 = vand.u32 15, %v225_v30 }
  0x5a   : > { %8165 = vst [vmem:[#allocation52_spill] sm:$0xff] %v6343_v18  ;;  %5163 = vmatprep.mubr.msk.f32.mxu1 %vm8167_vm4, %v5966_v17  ;;  %vm8171_vm10 = vmmov %vm8153_vm1 }
  0x5b   : > { %5214 = vmatmul.mubr.msk.f32.gmra.mxu0 %vm8153_vm1, %v1779_v62  ;;  %5164 = vmatmul.mubr.msk.f32.gmra.mxu1 %vm8171_vm10, %v5995_v37  ;;  %vm8172_vm15 = vmmov %vm8153_vm1  ;;  %8173 = vst [vmem:[#allocation55_spill] sm:$0xff] %v6367_v1  ;;  %v8175_v62 = vmov 0 }
  0x5c   : > { %5216 = vmatprep.mubr.msk.f32.mxu0 %vm8172_vm15, %v6343_v18  ;;  %vm8174_vm4 = vmmov %vm8153_vm1  ;;  %vm6372_vm1 = vcmp.eq.s32.totalorder %v335_v9, 15  ;;  %v349_v18 = vand.u32 15, %v223_v58  ;;  %v1706_v58 = vrot.slane %v5823_v31, 1 }
  0x5d   : > { %5166 = vmatprep.mubr.msk.f32.mxu1 %vm8174_vm4, %v6007_v53  ;;  %v8176_v62 = vsel %vm6372_vm1, 4294967295, %v8175_v62  ;;  %vm8178_vm10 = vmmov %vm8160_vm6 }
  0x5e   : > { %8177 = vst [vmem:[#allocation56_spill] sm:$0xff] %v8176_v62  ;;  %v6377_v60 = vsel %vm8178_vm10, %v1698_v63, %v1700_v44  ;;  %vm8180_vm15 = vmmov %vm8174_vm4 }
  0x5f   : > { %8179 = vst [vmem:[#allocation57_spill] sm:$0xff] %v6377_v60  ;;  %5217 = vmatmul.mubr.msk.f32.gmra.mxu0 %vm8180_vm15, %v1781_v59  ;;  %vm8181_vm2 = vmmov %vm8160_vm6  ;;  %v1783_v9 = vsel %vm6372_vm1, 0.0, %v6377_v60  ;;  %v1708_v59 = vrot.slane %v5833_v34, 1  ;;  %vm6398_vm15 = vcmp.eq.s32.totalorder %v349_v18, 15  ;;  %v1712_v18 = vrot.slane %v5872_v50, 1 }
  0x60   : > { %v6382_v5 = vsel %vm8181_vm2, %v1700_v44, %v1702_v27  ;;  %vm8183_vm6 = vmmov %vm8174_vm4  ;;  %5219 = vmatprep.mubr.msk.f32.mxu0 %vm8174_vm4, %v6367_v1  ;;  %v8187_v44 = vmov 0  ;;  %v227_v1 = vadd.s32 152, %v5773_v4  ;;  %v8196_v60 = vmov 0 }
  0x61   : > { %8182 = vst [vmem:[#allocation58_spill] sm:$0xff] %v6382_v5  ;;  %5167 = vmatmul.mubr.msk.f32.gmra.mxu1 %vm8183_vm6, %v6042_v36  ;;  %vm8184_vm10 = vmmov %vm8181_vm2  ;;  %v8188_v44 = vsel %vm6398_vm15, 4294967295, %v8187_v44 }
  0x62   : > { %v6392_v63 = vsel %vm8184_vm10, %v1702_v27, %v1704_v12  ;;  %vm8186_vm2 = vmmov %vm8174_vm4  ;;  %8189 = vst [vmem:[#allocation60_spill] sm:$0xff] %v8188_v44  ;;  %v1710_v27 = vrot.slane %v5846_v40, 1 }
  0x63   : > { %8185 = vst [vmem:[#allocation59_spill] sm:$0xff] %v6392_v63  ;;  %5169 = vmatprep.mubr.msk.f32.mxu1 %vm8186_vm2, %v6059_v23  ;;  %vm8190_vm6 = vmmov %vm8186_vm2 }
  0x64   : > { %5220 = vmatmul.mubr.msk.f32.gmra.mxu0 %vm8190_vm6, %v1783_v9  ;;  %vm8191_vm4 = vmmov %vm8186_vm2  ;;  %v1785_v9 = vsel %vm6398_vm15, 0.0, %v6392_v63  ;;  %v229_v63 = vadd.s32 168, %v5773_v4 }
  0x65   : > { %5170 = vmatmul.mubr.msk.f32.gmra.mxu1 %vm8191_vm4, %v6090_v61  ;;  %vm8192_vm10 = vmmov %vm8186_vm2  ;;  %vm8193_vm2 = vcmask 1046528  }
  0x66   : > { %5222 = vmatprep.mubr.msk.f32.mxu0 %vm8192_vm10, %v6382_v5  ;;  %v6429_v30 = vsel %vm8193_vm2, %v1704_v12, %v1706_v58  ;;  %vm8195_vm6 = vmmov %vm8191_vm4  ;;  %vm6439_vm4 = vcmp.eq.s32.totalorder %v363_v41, 15  ;;  %v377_v12 = vand.u32 15, %v227_v1  ;;  %v6448_v5 = vsel %vm8193_vm2, %v1708_v59, %v1710_v27 }
  0x67   : > { %8194 = vst [vmem:[#allocation61_spill] sm:$0xff] %v6429_v30  ;;  %5172 = vmatprep.mubr.msk.f32.mxu1 %vm8195_vm6, %v6109_v26  ;;  %v8197_v60 = vsel %vm6439_vm4, 4294967295, %v8196_v60  ;;  %vm8199_vm10 = vmmov %vm8193_vm2  ;;  %v8207_v1 = vmov 0  ;;  %v391_v41 = vand.u32 15, %v229_v63 }
  0x68   : > { %8198 = vst [vmem:[#allocation62_spill] sm:$0xff] %v8197_v60  ;;  %v6444_v44 = vsel %vm8199_vm10, %v1706_v58, %v1708_v59  ;;  %8201 = vst [vmem:[#allocation64_spill] sm:$0xff] %v6448_v5  ;;  %v1716_v59 = vrot.slane %v5931_v6, 1  ;;  %v231_v60 = vadd.s32 184, %v5773_v4 }
  0x69   : > { %8200 = vst [vmem:[#allocation63_spill] sm:$0xff] %v6444_v44  ;;  %vm8202_vm15 = vmmov %vm8195_vm6  ;;  %5173 = vmatmul.mubr.msk.f32.gmra.mxu1 %vm8195_vm6, %v5805_v19  ;;  %v1787_v58 = vsel %vm6439_vm4, 0.0, %v6444_v44  ;;  %vm6506_vm4 = vcmp.eq.s32.totalorder %v391_v41, 15 }
  0x6a   : > { %5223 = vmatmul.mubr.msk.f32.gmra.mxu0 %vm8202_vm15, %v1785_v9  ;;  %vm8203_vm1 = vmmov %vm8193_vm2  ;;  %vm6477_vm15 = vcmp.eq.s32.totalorder %v377_v12, 15  ;;  %v8215_v12 = vmov 0  ;;  %v8438_v8 = vld [vmem:[#allocation59_spill] sm:$0xff] }
  0x6b   : > { %v6452_v62 = vsel %vm8203_vm1, %v1710_v27, %v1712_v18  ;;  %vm8205_vm10 = vmmov %vm8195_vm6  ;;  %v8208_v1 = vsel %vm6477_vm15, 4294967295, %v8207_v1  ;;  %v1718_v27 = vrot.slane %v5947_v11, 1  ;;  %v8216_v12 = vsel %vm6506_vm4, 4294967295, %v8215_v12 }
  0x6c   : > { %8204 = vst [vmem:[#allocation65_spill] sm:$0xff] %v6452_v62  ;;  %5225 = vmatprep.mubr.msk.f32.mxu0 %vm8205_vm10, %v6429_v30  ;;  %vm8206_vm1 = vmmov %vm8195_vm6  ;;  %v1789_v63 = vsel %vm6477_vm15, 0.0, %v6452_v62  ;;  %v1724_v62 = vrot.slane %v6031_v14, 1 }
  0x6d   : > { %5175 = vmatprep.mubr.msk.f32.mxu1 %vm8206_vm1, %v5810_v25  ;;  %8209 = vst [vmem:[#allocation66_spill] sm:$0xff] %v8208_v1  ;;  %vm8210_vm2 = vmmov %vm8206_vm1  ;;  %v233_v1 = vadd.s32 200, %v5773_v4 }
  0x6e   : > { %5226 = vmatmul.mubr.msk.f32.gmra.mxu0 %vm8210_vm2, %v1787_v58  ;;  %vm8211_vm6 = vmmov %vm8206_vm1  ;;  %v1720_v58 = vrot.slane %v5969_v20, 1  ;;  %8217 = vst [vmem:[#allocation68_spill] sm:$0xff] %v8216_v12  ;;  %v235_v12 = vadd.s32 216, %v5773_v4 }
  0x6f   : > { %5176 = vmatmul.mubr.msk.f32.gmra.mxu1 %vm8211_vm6, %v5823_v31  ;;  %vm8212_vm10 = vmmov %vm8206_vm1  ;;  %vm8213_vm1 = vcmask 1046528  }
  0x70   : > { %5228 = vmatprep.mubr.msk.f32.mxu0 %vm8212_vm10, %v6448_v5  ;;  %v6500_v44 = vsel %vm8213_vm1, %v1712_v18, %v1714_v42  ;;  %5178 = vmatprep.mubr.msk.f32.mxu1 %vm8210_vm2, %v5833_v34  ;;  %vm8218_vm6 = vmmov %vm8213_vm1  ;;  %v405_v5 = vand.u32 15, %v231_v60  ;;  %v1722_v60 = vrot.slane %v6004_v49, 1 }
  0x71   : > { %8214 = vst [vmem:[#allocation67_spill] sm:$0xff] %v6500_v44  ;;  %v6511_v9 = vsel %vm8218_vm6, %v1714_v42, %v1716_v59  ;;  %vm8220_vm10 = vmmov %vm8210_vm2 }
  0x72   : > { %8219 = vst [vmem:[#allocation69_spill] sm:$0xff] %v6511_v9  ;;  %5229 = vmatmul.mubr.msk.f32.gmra.mxu0 %vm8220_vm10, %v1789_v63  ;;  %vm8221_vm1 = vmmov %vm8210_vm2  ;;  %v1791_v18 = vsel %vm6506_vm4, 0.0, %v6511_v9  ;;  %vm6531_vm12 = vcmp.eq.s32.totalorder %v405_v5, 15  ;;  %v8228_v63 = vmov 0  ;;  %v8235_v9 = vld [vmem:[#allocation24_spill] sm:$0xff] }
  0x73   : > { %5179 = vmatmul.mubr.msk.f32.gmra.mxu1 %vm8221_vm1, %v5846_v40  ;;  %vm8222_vm15 = vmmov %vm8221_vm1  ;;  %v8229_v63 = vsel %vm6531_vm12, 4294967295, %v8228_v63  ;;  %v1728_v30 = vrot.slane %v8235_v9, 1 }
  0x74   : > { %5231 = vmatprep.mubr.msk.f32.mxu0 %vm8222_vm15, %v6500_v44  ;;  %vm8223_vm2 = vmmov %vm8218_vm6  ;;  %8230 = vst [vmem:[#allocation72_spill] sm:$0xff] %v8229_v63  ;;  %v419_v44 = vand.u32 15, %v233_v1  ;;  %v8234_v1 = vld [vmem:[#allocation20_spill] sm:$0xff]  ;;  %v433_v63 = vand.u32 15, %v235_v12  ;;  %v8247_v12 = vld [vmem:[#allocation25_spill] sm:$0xff] }
  0x75   : > { %v6523_v41 = vsel %vm8223_vm2, %v1716_v59, %v1718_v27  ;;  %vm8225_vm6 = vmmov %vm8223_vm2  ;;  %v1730_v28 = vrot.slane %v8247_v12, 1 }
  0x76   : > { %8224 = vst [vmem:[#allocation70_spill] sm:$0xff] %v6523_v41  ;;  %v6526_v42 = vsel %vm8225_vm6, %v1718_v27, %v1720_v58  ;;  %vm8227_vm10 = vmmov %vm8221_vm1  ;;  %v6546_v59 = vsel %vm8225_vm6, %v1720_v58, %v1722_v60  ;;  %v1726_v27 = vrot.slane %v8234_v1, 1  ;;  %vm6577_vm4 = vcmp.eq.s32.totalorder %v433_v63, 15  ;;  %v8257_v63 = vld [vmem:[#allocation31_spill] sm:$0xff] }
  0x77   : > { %8226 = vst [vmem:[#allocation71_spill] sm:$0xff] %v6526_v42  ;;  %5181 = vmatprep.mubr.msk.f32.mxu1 %vm8227_vm10, %v5872_v50  ;;  %vm8231_vm15 = vmmov %vm8221_vm1  ;;  %v1793_v5 = vsel %vm6531_vm12, 0.0, %v6526_v42  ;;  %v237_v42 = vadd.s32 232, %v5773_v4 }
  0x78   : > { %5232 = vmatmul.mubr.msk.f32.gmra.mxu0 %vm8231_vm15, %v1791_v18  ;;  %5182 = vmatmul.mubr.msk.f32.gmra.mxu1 %vm8221_vm1, %v5878_v52  ;;  %vm8232_vm2 = vmmov %vm8221_vm1  ;;  %8233 = vst [vmem:[#allocation73_spill] sm:$0xff] %v6546_v59  ;;  %vm6552_vm15 = vcmp.eq.s32.totalorder %v419_v44, 15  ;;  %v8237_v18 = vmov 0 }
  0x79   : > { %5234 = vmatprep.mubr.msk.f32.mxu0 %vm8232_vm2, %v6523_v41  ;;  %vm8236_vm10 = vmmov %vm8221_vm1  ;;  %v8238_v18 = vsel %vm6552_vm15, 4294967295, %v8237_v18 }
  0x7a   : > { %5184 = vmatprep.mubr.msk.f32.mxu1 %vm8236_vm10, %v5931_v6  ;;  %8239 = vst [vmem:[#allocation20_spill] sm:$0xff] %v8238_v18  ;;  %vm8240_vm1 = vmmov %vm8225_vm6  ;;  %v239_v18 = vadd.s32 248, %v5773_v4  ;;  %v8258_v4 = vmov 0 }
  0x7b   : > { %v6557_v41 = vsel %vm8240_vm1, %v1722_v60, %v1724_v62  ;;  %vm8242_vm6 = vmmov %vm8232_vm2  ;;  %v6572_v60 = vsel %vm8240_vm1, %v1726_v27, %v1728_v30 }
  0x7c   : > { %8241 = vst [vmem:[#allocation24_spill] sm:$0xff] %v6557_v41  ;;  %5235 = vmatmul.mubr.msk.f32.gmra.mxu0 %vm8232_vm2, %v1793_v5  ;;  %5185 = vmatmul.mubr.msk.f32.gmra.mxu1 %vm8242_vm6, %v5947_v11  ;;  %vm8243_vm12 = vmmov %vm8232_vm2  ;;  %v1795_v44 = vsel %vm6552_vm15, 0.0, %v6557_v41  ;;  %v8248_v5 = vmov 0  ;;  %v6584_v41 = vld [vmem:[%s5794_s7 + $0x110] sm:$0xff] }
  0x7d   : > { %5237 = vmatprep.mubr.msk.f32.mxu0 %vm8243_vm12, %v6546_v59  ;;  %vm8244_vm10 = vmmov %vm8240_vm1  ;;  %8246 = vst [vmem:[#allocation75_spill] sm:$0xff] %v6572_v60  ;;  %5187 = vmatprep.mubr.msk.f32.mxu1 %vm8232_vm2, %v5969_v20  ;;  %v8249_v5 = vsel %vm6577_vm4, 4294967295, %v8248_v5  ;;  %v447_v59 = vand.u32 15, %v237_v42  ;;  %v6595_v42 = vsel %vm8240_vm1, %v1728_v30, %v1730_v28  ;;  %v8027_v46 = vrot.slane %v6584_v41, 1 }
  0x7e   : > { %v6569_v58 = vsel %vm8244_vm10, %v1724_v62, %v1726_v27  ;;  %8250 = vst [vmem:[#allocation25_spill] sm:$0xff] %v8249_v5  ;;  %8252 = vst [vmem:[#allocation30_spill] sm:$0xff] %v6584_v41  ;;  %v1797_v62 = vsel %vm6577_vm4, 0.0, %v6572_v60  ;;  %v1734_v27 = vrot.slane %v8257_v63, 1 }
  0x7f   : > { %8245 = vst [vmem:[#allocation74_spill] sm:$0xff] %v6569_v58  ;;  %vm8253_vm12 = vmmov %vm8232_vm2  ;;  %vm6600_vm15 = vcmp.eq.s32.totalorder %v447_v59, 15  ;;  %v8265_v59 = vmov 0 }
  0x80   : > { %5238 = vmatmul.mubr.msk.f32.gmra.mxu0 %vm8253_vm12, %v1795_v44  ;;  %vm8254_vm6 = vmmov %vm8232_vm2  ;;  %8256 = vst [vmem:[#allocation76_spill] sm:$0xff] %v6595_v42  ;;  %v8259_v4 = vsel %vm6600_vm15, 4294967295, %v8258_v4 }
  0x81   : > { %5188 = vmatmul.mubr.msk.f32.gmra.mxu1 %vm8254_vm6, %v6004_v49  ;;  %vm8255_vm10 = vmmov %vm8232_vm2 }
  0x82   : > { %5240 = vmatprep.mubr.msk.f32.mxu0 %vm8255_vm10, %v6569_v58  ;;  %5190 = vmatprep.mubr.msk.f32.mxu1 %vm8232_vm2, %v6031_v14  ;;  %vm8260_vm12 = vmmov %vm8240_vm1  ;;  %v461_v58 = vand.u32 15, %v239_v18 }
  0x83   : > { %v6605_v44 = vsel %vm8260_vm12, %v1730_v28, %v1732_v55  ;;  %vm8261_vm6 = vmmov %vm8232_vm2  ;;  %v6619_v28 = vsel %vm8260_vm12, %v1732_v55, %v1734_v27 }
  0x84   : > { %5241 = vmatmul.mubr.msk.f32.gmra.mxu0 %vm8261_vm6, %v1797_v62  ;;  %vm8262_vm10 = vmmov %vm8232_vm2  ;;  %v1799_v30 = vsel %vm6600_vm15, 0.0, %v6605_v44  ;;  %vm6621_vm4 = vcmp.eq.s32.totalorder %v461_v58, 15  ;;  %v8275_v58 = vsel %vm5796_vm3, 0.0, %v5868_v48  ;;  %v6655_v62 = vld [vmem:[%s7831_s1 + $0x1c] sm:$0xf]  ;;  %v8286_v48 = vld [vmem:[#allocation13_spill] sm:$0xff] }
  0x85   : > { %5191 = vmatmul.mubr.msk.f32.gmra.mxu1 %vm8262_vm10, %v8234_v1  ;;  %vm8263_vm1 = vmmov %vm8232_vm2  ;;  %v8266_v59 = vsel %vm6621_vm4, 4294967295, %v8265_v59 }
  0x86   : > { %5243 = vmatprep.mubr.msk.f32.mxu0 %vm8263_vm1, %v6595_v42  ;;  %vm8264_vm2 = vmmov %vm8263_vm1  ;;  %8267 = vst [vmem:[#allocation31_spill] sm:$0xff] %v8266_v59 }
  0x87   : > { %5193 = vmatprep.mubr.msk.f32.mxu1 %vm8264_vm2, %v8235_v9  ;;  %vm8268_vm6 = vmmov %vm8260_vm12 }
  0x88   : > { %v6628_v18 = vsel %vm8268_vm6, %v1734_v27, %v8027_v46  ;;  %vm8269_vm10 = vmmov %vm8263_vm1  ;;  %v8277_v27 = vld [vmem:[#allocation9_spill] sm:$0xff]  ;;  %v8370_v46 = vld [vmem:[#allocation35_spill] sm:$0xff] }
  0x89   : > { %5244 = vmatmul.mubr.msk.f32.gmra.mxu0 %vm8269_vm10, %v1799_v30  ;;  %5194 = vmatmul.mubr.msk.f32.gmra.mxu1 %vm8263_vm1, %v8247_v12  ;;  %vm8270_vm15 = vmmov %vm8263_vm1  ;;  %v1801_v55 = vsel %vm6621_vm4, 0.0, %v6628_v18 }
  0x8a   : > { %5246 = vmatprep.mubr.msk.f32.mxu0 %vm8270_vm15, %v6619_v28  ;;  %vm8271_vm2 = vmmov %vm8263_vm1 }
  0x8b   : > { %5196 = vmatprep.mubr.msk.f32.mxu1 %vm8271_vm2, %v8251_v38  ;;  %vm8272_vm12 = vmmov %vm8263_vm1 }
  0x8c   : > { %vm8273_vm6 = vmmov %vm8263_vm1 }
  0x8d   : > { %5247 = vmatmul.mubr.msk.f32.gmra.mxu0 %vm8272_vm12, %v1801_v55  ;;  %5197 = vmatmul.mubr.msk.f32.gmra.mxu1 %vm8273_vm6, %v8257_v63  ;;  %vm8274_vm10 = vmmov %vm8263_vm1  ;;  %vm8279_vm12 = vcmask 1043456   ;;  %v8322_v55 = vld [vmem:[#allocation8_spill] sm:$0xff] }
  0x8e   : > { %5301 = vmatprep.mubr.msk.f32.mxu0 %vm8274_vm10, %v5826_v32  ;;  %vm8276_vm15 = vmmov %vm8263_vm1  ;;  %v6664_v32 = vld [vmem:[%s7831_s1 + $0x20] sm:$0xf] }
  0x8f   : > { %5251 = vmatprep.mubr.msk.f32.mxu1 %vm8276_vm15, %v8275_v58  ;;  %vm8278_vm2 = vmmov %vm8263_vm1  ;;  %v8326_v58 = vld [vmem:[#allocation6_spill] sm:$0xff] }
  0x90   : > { %vm8280_vm6 = vmmov %vm8279_vm12 }
  0x91   : > { %5302 = vmatmul.mubr.msk.f32.vlgmr.msra.gmra.mxu0 %vm8263_vm1, %v5843_v39  ;;  %5252 = vmatmul.mubr.msk.f32.vlgmr.msra.gmra.mxu1 %vm8278_vm2, %v8277_v27  ;;  %v8281_v39 = vsel %vm5828_vm5, 0.0, %v5935_v7  ;;  %vm8282_vm10 = vmmov %vm8263_vm1  ;;  %v8329_v27 = vld [vmem:[#allocation11_spill] sm:$0xff] }
  0x92   : > { %5400 = vmatpush3.msk.msra.mxu0 %vm8279_vm12, %v6268_v47  ;;  %5350 = vmatpush3.msk.msra.mxu1 %vm8280_vm6, %v6254_v15  ;;  %vm8283_vm15 = vmmov %vm8263_vm1  ;;  %v8289_v15 = vsel %vm5889_vm7, 0.0, %v5980_v22 }
  0x93   : > { %5254 = vmatprep.mubr.msk.f32.mxu1 %vm8282_vm10, %v8281_v39  ;;  %5304 = vmatprep.mubr.msk.f32.mxu0 %vm8283_vm15, %v5858_v45  ;;  %vm8284_vm1 = vmmov %vm8280_vm6  ;;  %v8292_v45 = vld [vmem:[#allocation17_spill] sm:$0xff]  ;;  %v8334_v39 = vld [vmem:[#allocation10_spill] sm:$0xff] }
  0x94   : > { %5449 = vmatprep.subr.msk.mxu1 %vm8284_vm1, %v6655_v62  ;;  %vm8285_vm12 = vmmov %vm8284_vm1 }
  0x95   : > { %5305 = vmatmul.mubr.msk.f32.gmra.mxu0 %vm8278_vm2, %v5875_v51  ;;  %5499 = vmatprep.subr.msk.mxu0 %vm8285_vm12, %v6664_v32  ;;  %vm8287_vm6 = vmmov %vm8278_vm2  ;;  %v8295_v51 = vsel %vm5937_vm9, 0.0, %v6024_v3 }
  0x96   : > { %5255 = vmatmul.mubr.msk.f32.gmra.mxu1 %vm8287_vm6, %v8286_v48  ;;  %vm8288_vm4 = vmmov %vm8278_vm2 }
  0x97   : > { %5307 = vmatprep.mubr.msk.f32.mxu0 %vm8288_vm4, %v5894_v57  ;;  %vm8290_vm10 = vmmov %vm8278_vm2  ;;  %v8298_v57 = vld [vmem:[#allocation22_spill] sm:$0xff] }
  0x98   : > { %5257 = vmatprep.mubr.msk.f32.mxu1 %vm8290_vm10, %v8289_v15  ;;  %vm8291_vm15 = vmmov %vm8278_vm2  ;;  %v8337_v15 = vld [vmem:[#allocation14_spill] sm:$0xff] }
  0x99   : > { %5308 = vmatmul.mubr.msk.f32.gmra.mxu0 %vm8291_vm15, %v5944_v10  ;;  %vm8293_vm1 = vmmov %vm8278_vm2  ;;  %v8301_v10 = vsel %vm6034_vm11, 0.0, %v6070_v43  ;;  %v8420_v43 = vld [vmem:[#allocation52_spill] sm:$0xff] }
  0x9a   : > { %5258 = vmatmul.mubr.msk.f32.gmra.mxu1 %vm8293_vm1, %v8292_v45  ;;  %vm8294_vm2 = vmmov %vm8293_vm1 }
  0x9b   : > { %5310 = vmatprep.mubr.msk.f32.mxu0 %vm8294_vm2, %v5966_v17  ;;  %vm8296_vm4 = vmmov %vm8293_vm1  ;;  %v8303_v17 = vld [vmem:[#allocation28_spill] sm:$0xff] }
  0x9c   : > { %5260 = vmatprep.mubr.msk.f32.mxu1 %vm8296_vm4, %v8295_v51  ;;  %vm8297_vm12 = vmmov %vm8293_vm1  ;;  %v8341_v51 = vld [vmem:[#allocation15_spill] sm:$0xff] }
  0x9d   : > { %5311 = vmatmul.mubr.msk.f32.gmra.mxu0 %vm8297_vm12, %v5995_v37  ;;  %vm8299_vm6 = vmmov %vm8293_vm1  ;;  %v8306_v37 = vsel %vm6082_vm14, 0.0, %v6120_v24  ;;  %v8429_v24 = vld [vmem:[#allocation55_spill] sm:$0xff] }
  0x9e   : > { %5261 = vmatmul.mubr.msk.f32.gmra.mxu1 %vm8299_vm6, %v8298_v57  ;;  %vm8300_vm10 = vmmov %vm8293_vm1 }
  0x9f   : > { %5313 = vmatprep.mubr.msk.f32.mxu0 %vm8300_vm10, %v6007_v53  ;;  %vm8302_vm15 = vmmov %vm8293_vm1  ;;  %v8309_v53 = vld [vmem:[#allocation34_spill] sm:$0xff] }
  0xa0   : > { %5263 = vmatprep.mubr.msk.f32.mxu1 %vm8302_vm15, %v8301_v10  ;;  %vm8304_vm2 = vmmov %vm8293_vm1  ;;  %v8344_v10 = vld [vmem:[#allocation18_spill] sm:$0xff] }
  0xa1   : > { %5314 = vmatmul.mubr.msk.f32.gmra.mxu0 %vm8293_vm1, %v6042_v36  ;;  %vm8305_vm4 = vmmov %vm8293_vm1  ;;  %v8312_v36 = vsel %vm6129_vm0, 0.0, %v6164_v35  ;;  %v8436_v35 = vld [vmem:[#allocation58_spill] sm:$0xff] }
  0xa2   : > { %5264 = vmatmul.mubr.msk.f32.gmra.mxu1 %vm8304_vm2, %v8303_v17  ;;  %5316 = vmatprep.mubr.msk.f32.mxu0 %vm8305_vm4, %v6059_v23  ;;  %vm8307_vm12 = vmmov %vm8293_vm1  ;;  %v8313_v23 = vld [vmem:[#allocation7_spill] sm:$0xff] }
  0xa3   : > { %5266 = vmatprep.mubr.msk.f32.mxu1 %vm8307_vm12, %v8306_v37  ;;  %vm8308_vm6 = vmmov %vm8293_vm1  ;;  %v2181_v47 = vsel %vm6177_vm13, 0.0, %v8313_v23 }
  0xa4   : > { %vm8310_vm10 = vmmov %vm8293_vm1 }
  0xa5   : > { %5317 = vmatmul.mubr.msk.f32.gmra.mxu0 %vm8308_vm6, %v6090_v61  ;;  %vm8311_vm15 = vmmov %vm8293_vm1  ;;  %v8315_v61 = vld [vmem:[#allocation36_spill] sm:$0xff] }
  0xa6   : > { %5267 = vmatmul.mubr.msk.f32.gmra.mxu1 %vm8310_vm10, %v8309_v53  ;;  %5319 = vmatprep.mubr.msk.f32.mxu0 %vm8311_vm15, %v6109_v26  ;;  %vm8314_vm2 = vmmov %vm8293_vm1  ;;  %v8319_v26 = vld [vmem:[#allocation5_spill] sm:$0xff] }
  0xa7   : > { %5269 = vmatprep.mubr.msk.f32.mxu1 %vm8293_vm1, %v8312_v36  ;;  %vm8316_vm4 = vmmov %vm8293_vm1  ;;  %vm8320_vm10 = vnez %v8319_v26  ;;  %v8351_v36 = vld [vmem:[#allocation23_spill] sm:$0xff] }
  0xa8   : > { %vm8317_vm12 = vmmov %vm8293_vm1  ;;  %v2183_v30 = vsel %vm8320_vm10, 0.0, %v5886_v54 }
  0xa9   : > { %5320 = vmatmul.mubr.msk.f32.gmra.mxu0 %vm8314_vm2, %v5805_v19  ;;  %vm8318_vm6 = vmmov %vm8293_vm1  ;;  %v8325_v19 = vld [vmem:[#allocation12_spill] sm:$0xff] }
  0xaa   : > { %5270 = vmatmul.mubr.msk.f32.gmra.mxu1 %vm8316_vm4, %v8315_v61  ;;  %5322 = vmatprep.mubr.msk.f32.mxu0 %vm8317_vm12, %v5810_v25  ;;  %vm8321_vm15 = vmmov %vm8293_vm1  ;;  %vm8327_vm4 = vnez %v8326_v58 }
  0xab   : > { %5272 = vmatprep.mubr.msk.f32.mxu1 %vm8318_vm6, %v2181_v47  ;;  %vm8323_vm2 = vmmov %vm8293_vm1  ;;  %v2185_v25 = vsel %vm8327_vm4, 0.0, %v8325_v19  ;;  %v8356_v47 = vld [vmem:[#allocation26_spill] sm:$0xff] }
  0xac   : > { %vm8324_vm13 = vmmov %vm8293_vm1 }
  0xad   : > { %5323 = vmatmul.mubr.msk.f32.gmra.mxu0 %vm8321_vm15, %v5823_v31  ;;  %vm8328_vm12 = vmmov %vm8293_vm1  ;;  %v8333_v31 = vld [vmem:[#allocation16_spill] sm:$0xff] }
  0xae   : > { %5273 = vmatmul.mubr.msk.f32.gmra.mxu1 %vm8293_vm1, %v8322_v55  ;;  %5325 = vmatprep.mubr.msk.f32.mxu0 %vm8323_vm2, %v5833_v34  ;;  %vm8330_vm6 = vmmov %vm8293_vm1 }
  0xaf   : > { %5275 = vmatprep.mubr.msk.f32.mxu1 %vm8324_vm13, %v2183_v30  ;;  %vm8331_vm15 = vmmov %vm8293_vm1  ;;  %v2161_v30 = vrot.slane %v6584_v41, 7 }
  0xb0   : > { %vm8332_vm10 = vmmov %vm8293_vm1  ;;  %vm8335_vm1 = vnez %v8334_v39 }
  0xb1   : > { %5326 = vmatmul.mubr.msk.f32.gmra.mxu0 %vm8328_vm12, %v5846_v40  ;;  %v2187_v34 = vsel %vm8335_vm1, 0.0, %v8333_v31  ;;  %vm8336_vm13 = vmmov %vm8323_vm2  ;;  %v8340_v40 = vld [vmem:[#allocation19_spill] sm:$0xff] }
  0xb2   : > { %5276 = vmatmul.mubr.msk.f32.gmra.mxu1 %vm8330_vm6, %v8329_v27  ;;  %5328 = vmatprep.mubr.msk.f32.mxu0 %vm8331_vm15, %v5872_v50  ;;  %vm8338_vm12 = vmmov %vm8323_vm2  ;;  %vm8342_vm6 = vnez %v8341_v51 }
  0xb3   : > { %5278 = vmatprep.mubr.msk.f32.mxu1 %vm8332_vm10, %v2185_v25  ;;  %vm8339_vm4 = vmmov %vm8323_vm2  ;;  %v2189_v50 = vsel %vm8342_vm6, 0.0, %v8340_v40  ;;  %v8359_v25 = vld [vmem:[#allocation29_spill] sm:$0xff] }
  0xb4   : > { %vm8343_vm10 = vmmov %vm8323_vm2 }
  0xb5   : > { %5329 = vmatmul.mubr.msk.f32.gmra.mxu0 %vm8336_vm13, %v5878_v52  ;;  %vm8345_vm15 = vmmov %vm8323_vm2  ;;  %v8347_v52 = vld [vmem:[#allocation27_spill] sm:$0xff] }
  0xb6   : > { %5279 = vmatmul.mubr.msk.f32.gmra.mxu1 %vm8323_vm2, %v8337_v15  ;;  %5331 = vmatprep.mubr.msk.f32.mxu0 %vm8338_vm12, %v5931_v6  ;;  %vm8346_vm13 = vmmov %vm8323_vm2  ;;  %v8348_v6 = vld [vmem:[#allocation21_spill] sm:$0xff] }
  0xb7   : > { %5281 = vmatprep.mubr.msk.f32.mxu1 %vm8339_vm4, %v2187_v34  ;;  %vm8349_vm12 = vnez %v8348_v6  ;;  %vm8350_vm4 = vmmov %vm8323_vm2  ;;  %v8493_v6 = vld [vmem:[#allocation74_spill] sm:$0xff] }
  0xb8   : > { %v2191_v37 = vsel %vm8349_vm12, 0.0, %v8347_v52  ;;  %vm8352_vm6 = vmmov %vm8323_vm2 }
  0xb9   : > { %5332 = vmatmul.mubr.msk.f32.gmra.mxu0 %vm8343_vm10, %v5947_v11  ;;  %vm8353_vm10 = vmmov %vm8323_vm2  ;;  %v8355_v11 = vld [vmem:[#allocation33_spill] sm:$0xff] }
  0xba   : > { %5282 = vmatmul.mubr.msk.f32.gmra.mxu1 %vm8345_vm15, %v8344_v10  ;;  %5334 = vmatprep.mubr.msk.f32.mxu0 %vm8346_vm13, %v5969_v20  ;;  %vm8354_vm1 = vmmov %vm8323_vm2  ;;  %vm8357_vm15 = vnez %v8356_v47 }
  0xbb   : > { %5284 = vmatprep.mubr.msk.f32.mxu1 %vm8323_vm2, %v2189_v50  ;;  %v2193_v20 = vsel %vm8357_vm15, 0.0, %v8355_v11  ;;  %vm8358_vm13 = vmmov %vm8354_vm1  ;;  %v6809_v50 = vld [vmem:[%s5794_s7 + $0x118] sm:$0xff] }
  0xbc   : > { %vm8360_vm2 = vmmov %vm8354_vm1  ;;  %8366 = vst [vmem:[#allocation9_spill] sm:$0xff] %v6809_v50 }
  0xbd   : > { %5335 = vmatmul.mubr.msk.f32.gmra.mxu0 %vm8350_vm4, %v6004_v49  ;;  %vm8361_vm4 = vmmov %vm8354_vm1  ;;  %v8363_v49 = vld [vmem:[#allocation38_spill] sm:$0xff] }
  0xbe   : > { %5285 = vmatmul.mubr.msk.f32.gmra.mxu1 %vm8352_vm6, %v8351_v36  ;;  %5337 = vmatprep.mubr.msk.f32.mxu0 %vm8353_vm10, %v6031_v14  ;;  %vm8362_vm6 = vmmov %vm8354_vm1  ;;  %v8364_v14 = vld [vmem:[#allocation32_spill] sm:$0xff] }
  0xbf   : > { %5287 = vmatprep.mubr.msk.f32.mxu1 %vm8354_vm1, %v2191_v37  ;;  %vm8365_vm1 = vnez %v8364_v14  ;;  %vm8367_vm10 = vmmov %vm8360_vm2 }
  0xc0   : > { %v2195_v34 = vsel %vm8365_vm1, 0.0, %v8363_v49  ;;  %vm8377_vm15 = vmmov %vm8360_vm2 }
  0xc1   : > { %5338 = vmatmul.mubr.msk.f32.gmra.mxu0 %vm8358_vm13, %v8234_v1  ;;  %v8368_v1 = vrot.slane %v8257_v63, 7  ;;  %vm8369_vm13 = vcmask 1040384  }
  0xc2   : > { %5288 = vmatmul.mubr.msk.f32.gmra.mxu1 %vm8360_vm2, %v8359_v25  ;;  %5340 = vmatprep.mubr.msk.f32.mxu0 %vm8361_vm4, %v8235_v9  ;;  %vm8371_vm4 = vmmov %vm8360_vm2  ;;  %v8030_v9 = vrot.slane %v6809_v50, 7 }
  0xc3   : > { %5290 = vmatprep.mubr.msk.f32.mxu1 %vm8362_vm6, %v2193_v20  ;;  %v6816_v37 = vsel %vm8369_vm13, %v8368_v1, %v2161_v30  ;;  %vm8372_vm6 = vmmov %vm8360_vm2  ;;  %v8373_v20 = vld [vmem:[#allocation37_spill] sm:$0xff]  ;;  %v8396_v1 = vld [vmem:[#allocation42_spill] sm:$0xff] }
  0xc4   : > { %vm8374_vm1 = vnez %v8373_v20  ;;  %vm8376_vm13 = vmmov %vm8360_vm2 }
  0xc5   : > { %5341 = vmatmul.mubr.msk.f32.gmra.mxu0 %vm8367_vm10, %v8247_v12  ;;  %v2197_v59 = vsel %vm8374_vm1, 0.0, %v6816_v37  ;;  %vm8375_vm10 = vmmov %vm8360_vm2  ;;  %v8381_v12 = vsel %vm5796_vm3, 0.0, %v5935_v7  ;;  %v8395_v7 = vld [vmem:[#allocation41_spill] sm:$0xff] }
  0xc6   : > { %5291 = vmatmul.mubr.msk.f32.gmra.mxu1 %vm8360_vm2, %v8370_v46  ;;  %5343 = vmatprep.mubr.msk.f32.mxu0 %vm8371_vm4, %v8251_v38  ;;  %vm8378_vm4 = vcmask 1040384   ;;  %vm8380_vm1 = vmmov %vm8360_vm2 }
  0xc7   : > { %5293 = vmatprep.mubr.msk.f32.mxu1 %vm8372_vm6, %v2195_v34  ;;  %v6837_v38 = vsel %vm8378_vm4, %v2161_v30, %v8030_v9  ;;  %vm8379_vm6 = vmmov %vm8360_vm2  ;;  %v8388_v30 = vld [vmem:[#allocation40_spill] sm:$0xff]  ;;  %v8474_v9 = vld [vmem:[#allocation70_spill] sm:$0xff] }
  0xc8   : > { %vm8390_vm4 = vmmov %vm8380_vm1 }
  0xc9   : > { %5344 = vmatmul.mubr.msk.f32.gmra.mxu0 %vm8375_vm10, %v8257_v63  ;;  %vm8382_vm10 = vmmov %vm8380_vm1  ;;  %v8383_v63 = vld [vmem:[#allocation43_spill] sm:$0xff] }
  0xca   : > { %5294 = vmatmul.mubr.msk.f32.gmra.mxu1 %vm8376_vm13, %v6197_v29  ;;  %5346 = vmatprep.mubr.msk.f32.mxu0 %vm8377_vm15, %v6584_v41  ;;  %vm8384_vm15 = vmmov %vm8380_vm1 }
  0xcb   : > { %5296 = vmatprep.mubr.msk.f32.mxu1 %vm8360_vm2, %v2197_v59  ;;  %vm8385_vm13 = vmmov %vm8380_vm1  ;;  %v8386_v59 = vld [vmem:[#allocation39_spill] sm:$0xff] }
  0xcc   : > { %vm8387_vm2 = vnez %v8386_v59  ;;  %vm8394_vm3 = vmmov %vm8390_vm4 }
  0xcd   : > { %5347 = vmatmul.mubr.msk.f32.gmra.mxu0 %vm8379_vm6, %v6809_v50  ;;  %v8389_v34 = vsel %vm8387_vm2, 0.0, %v8388_v30  ;;  %v8415_v30 = vld [vmem:[#allocation48_spill] sm:$0xff] }
  0xce   : > { %5297 = vmatmul.mubr.msk.f32.gmra.mxu1 %vm8380_vm1, %v6837_v38  ;;  %5401 = vmatprep.mubr.msk.f32.mxu0 %vm8382_vm10, %v8381_v12  ;;  %vm8391_vm1 = vcmask 1043456   ;;  %vm8397_vm10 = vnez %v8396_v1 }
  0xcf   : > { %5351 = vmatprep.mubr.msk.f32.mxu1 %vm8384_vm15, %v8383_v63  ;;  %vm8392_vm6 = vmmov %vm8391_vm1  ;;  %v2833_v12 = vsel %vm8397_vm10, 0.0, %v8395_v7  ;;  %v8406_v63 = vld [vmem:[#allocation47_spill] sm:$0xff] }
  0xd0   : > { %vm8399_vm15 = vmmov %vm8394_vm3 }
  0xd1   : > { %5402 = vmatmul.mubr.msk.f32.vlgmr.msra.gmra.mxu0 %vm8385_vm13, %v8286_v48  ;;  %v8398_v48 = vsel %vm5828_vm5, 0.0, %v5980_v22  ;;  %vm8400_vm13 = vmmov %vm8394_vm3  ;;  %v2835_v22 = vsel %vm6277_vm8, 0.0, %v8406_v63 }
  0xd2   : > { %5352 = vmatmul.mubr.msk.f32.vlgmr.msra.gmra.mxu1 %vm8390_vm4, %v8389_v34  ;;  %5500 = vmatpush3.msk.msra.mxu0 %vm8391_vm1, %v6664_v32  ;;  %vm8401_vm4 = vmmov %vm8394_vm3  ;;  %v8404_v32 = vld [vmem:[#allocation46_spill] sm:$0xff] }
  0xd3   : > { %5450 = vmatpush3.msk.msra.mxu1 %vm8392_vm6, %v6655_v62  ;;  %5354 = vmatprep.mubr.msk.f32.mxu1 %vm8394_vm3, %v8393_v13  ;;  %v8402_v62 = vsel %vm5889_vm7, 0.0, %v6024_v3  ;;  %vm8403_vm1 = vmmov %vm8394_vm3  ;;  %v8412_v3 = vld [vmem:[#allocation49_spill] sm:$0xff] }
  0xd4   : > { %5404 = vmatprep.mubr.msk.f32.mxu0 %vm8399_vm15, %v8398_v48  ;;  %vm8405_vm6 = vmmov %vm8403_vm1 }
  0xd5   : > { %5405 = vmatmul.mubr.msk.f32.gmra.mxu0 %vm8400_vm13, %v8292_v45  ;;  %vm8408_vm5 = vmmov %vm8403_vm1  ;;  %v8414_v45 = vld [vmem:[#allocation51_spill] sm:$0xff]  ;;  %vm8416_vm13 = vnez %v8415_v30 }
  0xd6   : > { %5355 = vmatmul.mubr.msk.f32.gmra.mxu1 %vm8401_vm4, %v2833_v12  ;;  %5407 = vmatprep.mubr.msk.f32.mxu0 %vm8403_vm1, %v8402_v62  ;;  %vm8409_vm3 = vmmov %vm8403_vm1  ;;  %v2837_v34 = vsel %vm8416_vm13, 0.0, %v8414_v45  ;;  %v8423_v12 = vld [vmem:[#allocation50_spill] sm:$0xff] }
  0xd7   : > { %5357 = vmatprep.mubr.msk.f32.mxu1 %vm8405_vm6, %v8404_v32  ;;  %vm8411_vm15 = vmmov %vm8403_vm1  ;;  %v8432_v62 = vld [vmem:[#allocation54_spill] sm:$0xff] }
  0xd8   : > { %vm8413_vm7 = vmmov %vm8403_vm1 }
  0xd9   : > { %5408 = vmatmul.mubr.msk.f32.gmra.mxu0 %vm8408_vm5, %v8298_v57  ;;  %vm8417_vm4 = vmmov %vm8403_vm1  ;;  %v8422_v57 = vld [vmem:[#allocation53_spill] sm:$0xff]  ;;  %vm8424_vm5 = vnez %v8423_v12 }
  0xda   : > { %5358 = vmatmul.mubr.msk.f32.gmra.mxu1 %vm8409_vm3, %v2835_v22  ;;  %5410 = vmatprep.mubr.msk.f32.mxu0 %vm8411_vm15, %v8410_v56  ;;  %vm8419_vm6 = vmmov %vm8403_vm1  ;;  %v2839_v48 = vsel %vm8424_vm5, 0.0, %v8422_v57  ;;  %v3239_v56 = vsel %vm6129_vm0, 0.0, %v8313_v23  ;;  %vm8443_vm0 = vnez %v8100_v16  ;;  %v8446_v23 = vld [vmem:[#allocation61_spill] sm:$0xff] }
  0xdb   : > { %5360 = vmatprep.mubr.msk.f32.mxu1 %vm8413_vm7, %v8412_v3  ;;  %vm8421_vm9 = vmmov %vm8403_vm1  ;;  %v8444_v0 = vsel %vm8443_vm0, 0.0, %v5886_v54  ;;  %v8454_v54 = vld [vmem:[#allocation64_spill] sm:$0xff]  ;;  %v8456_v16 = vld [vmem:[#allocation65_spill] sm:$0xff] }
  0xdc   : > { %vm8425_vm3 = vmmov %vm8403_vm1 }
  0xdd   : > { %5411 = vmatmul.mubr.msk.f32.gmra.mxu0 %vm8417_vm4, %v8303_v17  ;;  %vm8426_vm15 = vmmov %vm8403_vm1  ;;  %v8431_v17 = vld [vmem:[#allocation57_spill] sm:$0xff]  ;;  %vm8433_vm4 = vnez %v8432_v62 }
  0xde   : > { %5361 = vmatmul.mubr.msk.f32.gmra.mxu1 %vm8403_vm1, %v2837_v34  ;;  %5413 = vmatprep.mubr.msk.f32.mxu0 %vm8419_vm6, %v8418_v2  ;;  %vm8428_vm7 = vmmov %vm8403_vm1  ;;  %v2841_v22 = vsel %vm8433_vm4, 0.0, %v8431_v17  ;;  %v8448_v2 = vld [vmem:[#allocation60_spill] sm:$0xff] }
  0xdf   : > { %5363 = vmatprep.mubr.msk.f32.mxu1 %vm8421_vm9, %v8420_v43  ;;  %vm8430_vm11 = vmmov %vm8403_vm1 }
  0xe0   : > { %vm8434_vm6 = vmmov %vm8403_vm1 }
  0xe1   : > { %5414 = vmatmul.mubr.msk.f32.gmra.mxu0 %vm8425_vm3, %v8309_v53  ;;  %vm8435_vm9 = vmmov %vm8403_vm1  ;;  %v8439_v53 = vld [vmem:[#allocation56_spill] sm:$0xff] }
  0xe2   : > { %5364 = vmatmul.mubr.msk.f32.gmra.mxu1 %vm8426_vm15, %v2839_v48  ;;  %5416 = vmatprep.mubr.msk.f32.mxu0 %vm8428_vm7, %v8427_v21  ;;  %vm8437_vm14 = vmmov %vm8403_vm1  ;;  %vm8440_vm3 = vnez %v8439_v53 }
  0xe3   : > { %5366 = vmatprep.mubr.msk.f32.mxu1 %vm8430_vm11, %v8429_v24  ;;  %v2843_v34 = vsel %vm8440_vm3, 0.0, %v8438_v8  ;;  %vm8441_vm15 = vmmov %vm8403_vm1 }
  0xe4   : > { %vm8442_vm7 = vmmov %vm8403_vm1 }
  0xe5   : > { %5417 = vmatmul.mubr.msk.f32.gmra.mxu0 %vm8403_vm1, %v8315_v61  ;;  %vm8445_vm11 = vmmov %vm8403_vm1  ;;  %v8447_v61 = vld [vmem:[#allocation63_spill] sm:$0xff] }
  0xe6   : > { %5367 = vmatmul.mubr.msk.f32.gmra.mxu1 %vm8434_vm6, %v2841_v22  ;;  %5419 = vmatprep.mubr.msk.f32.mxu0 %vm8435_vm9, %v3239_v56  ;;  %vm8449_vm6 = vnez %v8448_v2  ;;  %vm8450_vm9 = vnez %v8319_v26  ;;  %vm8455_vm0 = vmmov %vm8403_vm1  ;;  %v6963_v26 = vpop.f32.mrf.mxu0 }
  0xe7   : > { %5369 = vmatprep.mubr.msk.f32.mxu1 %vm8437_vm14, %v8436_v35  ;;  %v2845_v48 = vsel %vm8449_vm6, 0.0, %v8447_v61  ;;  %v3243_v21 = vsel %vm8450_vm9, 0.0, %v8325_v19  ;;  %vm8451_vm14 = vmmov %vm8403_vm1  ;;  %v6967_v19 = vpop.f32.mrf.mxu1 }
  0xe8   : > { %vm8460_vm9 = vmmov %vm8455_vm0 }
  0xe9   : > { %5420 = vmatmul.mubr.msk.f32.gmra.mxu0 %vm8441_vm15, %v8322_v55  ;;  %vm8452_vm15 = vmmov %vm8403_vm1  ;;  %v8457_v55 = vld [vmem:[#allocation62_spill] sm:$0xff] }
  0xea   : > { %5370 = vmatmul.mubr.msk.f32.gmra.mxu1 %vm8442_vm7, %v2843_v34  ;;  %5422 = vmatprep.mubr.msk.f32.mxu0 %vm8445_vm11, %v8444_v0  ;;  %vm8453_vm7 = vmmov %vm8403_vm1  ;;  %vm8458_vm11 = vnez %v8457_v55  ;;  %v8463_v34 = vld [vmem:[#allocation67_spill] sm:$0xff]  ;;  %v8465_v0 = vld [vmem:[#allocation69_spill] sm:$0xff] }
  0xeb   : > { %5372 = vmatprep.mubr.msk.f32.mxu1 %vm8403_vm1, %v8446_v23  ;;  %v2847_v22 = vsel %vm8458_vm11, 0.0, %v8456_v16  ;;  %vm8459_vm1 = vnez %v8326_v58 }
  0xec   : > { %v3245_v56 = vsel %vm8459_vm1, 0.0, %v8333_v31  ;;  %vm8468_vm1 = vnez %v8334_v39  ;;  %v8475_v39 = vld [vmem:[#allocation71_spill] sm:$0xff] }
  0xed   : > { %5423 = vmatmul.mubr.msk.f32.gmra.mxu0 %vm8451_vm14, %v8329_v27  ;;  %vm8461_vm14 = vmmov %vm8455_vm0  ;;  %v6971_v27 = vpop.f32.mrf.mxu0  ;;  %v3247_v31 = vsel %vm8468_vm1, 0.0, %v8340_v40  ;;  %v8476_v40 = vld [vmem:[#allocation68_spill] sm:$0xff] }
  0xee   : > { %5373 = vmatmul.mubr.msk.f32.gmra.mxu1 %vm8452_vm15, %v2845_v48  ;;  %5425 = vmatprep.mubr.msk.f32.mxu0 %vm8453_vm7, %v3243_v21  ;;  %vm8462_vm15 = vmmov %vm8455_vm0  ;;  %v8466_v48 = vld [vmem:[#allocation66_spill] sm:$0xff]  ;;  %vm8477_vm1 = vnez %v8476_v40  ;;  %v8484_v40 = vld [vmem:[#allocation73_spill] sm:$0xff] }
  0xef   : > { %5375 = vmatprep.mubr.msk.f32.mxu1 %vm8455_vm0, %v8454_v54  ;;  %vm8464_vm7 = vmmov %vm8455_vm0  ;;  %vm8467_vm0 = vnez %v8466_v48  ;;  %v6983_v21 = vpop.f32.mrf.mxu0 }
  0xf0   : > { %v2849_v58 = vsel %vm8467_vm0, 0.0, %v8465_v0  ;;  %vm8478_vm0 = vnez %v8341_v51  ;;  %v8485_v51 = vld [vmem:[#allocation24_spill] sm:$0xff] }
  0xf1   : > { %5426 = vmatmul.mubr.msk.f32.gmra.mxu0 %vm8460_vm9, %v8337_v15  ;;  %v6981_v15 = vpop.f32.mrf.mxu1  ;;  %vm8470_vm9 = vmmov %vm8464_vm7 }
  0xf2   : > { %5376 = vmatmul.mubr.msk.f32.gmra.mxu1 %vm8461_vm14, %v2847_v22  ;;  %5428 = vmatprep.mubr.msk.f32.mxu0 %vm8462_vm15, %v3245_v56  ;;  %8469 = vst [vmem:[#allocation13_spill] sm:$0xff] %v6981_v15  ;;  %vm8472_vm14 = vmmov %vm8464_vm7  ;;  %v6991_v56 = vpop.f32.mrf.mxu0  ;;  %v2851_v15 = vsel %vm8477_vm1, 0.0, %v8475_v39  ;;  %v3251_v39 = vsel %vm8349_vm12, 0.0, %v8355_v11  ;;  %v8495_v11 = vld [vmem:[#allocation20_spill] sm:$0xff] }
  0xf3   : > { %5378 = vmatprep.mubr.msk.f32.mxu1 %vm8464_vm7, %v8463_v34  ;;  %v6987_v22 = vpop.f32.mrf.mxu1  ;;  %vm8473_vm15 = vmmov %vm8464_vm7 }
  0xf4   : > { %8471 = vst [vmem:[#allocation17_spill] sm:$0xff] %v6987_v22  ;;  %v7003_v22 = vpop.f32.mrf.mxu0  ;;  %vm8494_vm12 = vmmov %vm8464_vm7 }
  0xf5   : > { %5429 = vmatmul.mubr.msk.f32.gmra.mxu0 %vm8470_vm9, %v8344_v10  ;;  %v3249_v10 = vsel %vm8478_vm0, 0.0, %v8347_v52  ;;  %v7001_v48 = vpop.f32.mrf.mxu1  ;;  %vm8480_vm9 = vmmov %vm8464_vm7  ;;  %v8486_v52 = vld [vmem:[#allocation72_spill] sm:$0xff] }
  0xf6   : > { %5379 = vmatmul.mubr.msk.f32.gmra.mxu1 %vm8472_vm14, %v2849_v58  ;;  %5431 = vmatprep.mubr.msk.f32.mxu0 %vm8473_vm15, %v3247_v31  ;;  %8479 = vst [vmem:[#allocation22_spill] sm:$0xff] %v7001_v48  ;;  %vm8482_vm14 = vmmov %vm8464_vm7  ;;  %v7011_v31 = vpop.f32.mrf.mxu0  ;;  %vm8487_vm0 = vnez %v8486_v52 }
  0xf7   : > { %5381 = vmatprep.mubr.msk.f32.mxu1 %vm8464_vm7, %v8474_v9  ;;  %v7007_v58 = vpop.f32.mrf.mxu1  ;;  %vm8483_vm15 = vmmov %vm8464_vm7  ;;  %v2853_v48 = vsel %vm8487_vm0, 0.0, %v8485_v51  ;;  %vm8504_vm0 = vnez %v8364_v14 }
  0xf8   : > { %8481 = vst [vmem:[#allocation28_spill] sm:$0xff] %v7007_v58  ;;  %v7023_v58 = vpop.f32.mrf.mxu0 }
  0xf9   : > { %5432 = vmatmul.mubr.msk.f32.gmra.mxu0 %vm8480_vm9, %v8351_v36  ;;  %v7021_v36 = vpop.f32.mrf.mxu1  ;;  %vm8489_vm9 = vmmov %vm8464_vm7 }
  0xfa   : > { %5382 = vmatmul.mubr.msk.f32.gmra.mxu1 %vm8482_vm14, %v2851_v15  ;;  %5434 = vmatprep.mubr.msk.f32.mxu0 %vm8483_vm15, %v3249_v10  ;;  %8488 = vst [vmem:[#allocation34_spill] sm:$0xff] %v7021_v36  ;;  %v7028_v15 = vld [vmem:[%s5794_s7 + $0x120] sm:$0xff]  ;;  %vm8491_vm14 = vmmov %vm8464_vm7  ;;  %v7034_v52 = vpop.f32.mrf.mxu0 }
  0xfb   : > { %5384 = vmatprep.mubr.msk.f32.mxu1 %vm8464_vm7, %v8484_v40  ;;  %v7030_v10 = vpop.f32.mrf.mxu1  ;;  %vm8492_vm15 = vmmov %vm8464_vm7  ;;  %vm8496_vm7 = vnez %v8495_v11 }
  0xfc   : > { %8490 = vst [vmem:[#allocation7_spill] sm:$0xff] %v7030_v10  ;;  %v2855_v36 = vsel %vm8496_vm7, 0.0, %v6572_v60  ;;  %v7047_v10 = vpop.f32.mrf.mxu0  ;;  %vm8502_vm7 = vmmov %vm8494_vm12 }
  0xfd   : > { %5435 = vmatmul.mubr.msk.f32.gmra.mxu0 %vm8489_vm9, %v8359_v25  ;;  %vm8497_vm9 = vnez %v8356_v47  ;;  %v7044_v51 = vpop.f32.mrf.mxu1 }
  0xfe   : > { %5385 = vmatmul.mubr.msk.f32.gmra.mxu1 %vm8491_vm14, %v2853_v48  ;;  %5437 = vmatprep.mubr.msk.f32.mxu0 %vm8492_vm15, %v3251_v39  ;;  %v3253_v25 = vsel %vm8497_vm9, 0.0, %v8363_v49  ;;  %8498 = vst [vmem:[#allocation36_spill] sm:$0xff] %v7044_v51  ;;  %v3221_v48 = vrot.slane %v7028_v15, 7  ;;  %vm8499_vm14 = vmmov %vm8494_vm12  ;;  %v7055_v11 = vpop.f32.mrf.mxu0  ;;  %vm8503_vm9 = vnez %v8249_v5  ;;  %v3255_v49 = vsel %vm8504_vm0, 0.0, %v6816_v37 }
  0xff   : > { %5387 = vmatprep.mubr.msk.f32.mxu1 %vm8494_vm12, %v8493_v6  ;;  %v7051_v39 = vpop.f32.mrf.mxu1  ;;  %vm8501_vm15 = vmmov %vm8494_vm12  ;;  %v2857_v47 = vsel %vm8503_vm9, 0.0, %v6605_v44  ;;  %vm8513_vm9 = vnez %v8373_v20 }
 0x100   : > { %8500 = vst [vmem:[#allocation5_spill] sm:$0xff] %v7051_v39  ;;  %v7075_v60 = vpop.f32.mrf.mxu0  ;;  %vm8509_vm0 = vmmov %vm8502_vm7 }
 0x101   : > { %5438 = vmatmul.mubr.msk.f32.gmra.mxu0 %vm8499_vm14, %v8370_v46  ;;  %v7066_v46 = vld [vmem:[%s5794_s7 + $0x128] sm:$0xff]  ;;  %v7068_v39 = vpop.f32.mrf.mxu1  ;;  %vm8507_vm14 = vcmask 1040384  }
 0x102   : > { %5388 = vmatmul.mubr.msk.f32.gmra.mxu1 %vm8501_vm15, %v2855_v36  ;;  %5440 = vmatprep.mubr.msk.f32.mxu0 %vm8494_vm12, %v3253_v25  ;;  %8505 = vst [vmem:[#allocation8_spill] sm:$0xff] %v7068_v39  ;;  %v2824_v36 = vrot.slane %v6809_v50, 1  ;;  %v8506_v25 = vrot.slane %v6809_v50, 7  ;;  %vm8510_vm15 = vmmov %vm8509_vm0  ;;  %v3223_v14 = vrot.slane %v7066_v46, 7  ;;  %v7084_v37 = vpop.f32.mrf.mxu0  ;;  %v8517_v50 = vrot.slane %v7028_v15, 1 }
 0x103   : > { %5390 = vmatprep.mubr.msk.f32.mxu1 %vm8502_vm7, %v6595_v42  ;;  %v7079_v5 = vpop.f32.mrf.mxu1  ;;  %vm8511_vm12 = vmmov %vm8509_vm0 }
 0x104   : > { %v3222_v51 = vsel %vm8507_vm14, %v8506_v25, %v3221_v48  ;;  %8508 = vst [vmem:[#allocation12_spill] sm:$0xff] %v7079_v5  ;;  %vm8512_vm14 = vnez %v8259_v4  ;;  %v7105_v39 = vpop.f32.mrf.mxu0 }
 0x105   : > { %5441 = vmatmul.mubr.msk.f32.gmra.mxu0 %vm8502_vm7, %v6197_v29  ;;  %v2859_v25 = vsel %vm8512_vm14, 0.0, %v6628_v18  ;;  %v3257_v29 = vsel %vm8513_vm9, 0.0, %v3222_v51  ;;  %v7093_v42 = vpop.f32.mrf.mxu1  ;;  %vm8516_vm7 = vcmask 1046528   ;;  %vm8521_vm9 = vmmov %vm8511_vm12  ;;  %vm8523_vm14 = vcmask 1040384  }
 0x106   : > { %5391 = vmatmul.mubr.msk.f32.gmra.mxu1 %vm8509_vm0, %v2857_v47  ;;  %5443 = vmatprep.mubr.msk.f32.mxu0 %vm8510_vm15, %v3255_v49  ;;  %8514 = vst [vmem:[#allocation6_spill] sm:$0xff] %v7093_v42  ;;  %v8515_v47 = vrot.slane %v6584_v41, 1  ;;  %vm8518_vm0 = vmmov %vm8516_vm7  ;;  %v3224_v51 = vsel %vm8523_vm14, %v3221_v48, %v3223_v14  ;;  %v5593_v14 = vld [vmem:[%s5794_s7 + $0x30] sm:$0xff] }
 0x107   : > { %5393 = vmatprep.mubr.msk.f32.mxu1 %vm8511_vm12, %v6619_v28  ;;  %v7103_v5 = vsel %vm8518_vm0, %v2824_v36, %v8517_v50  ;;  %vm8519_vm15 = vmmov %vm8511_vm12  ;;  %v7109_v20 = vpop.f32.mrf.mxu1  ;;  %v8525_v50 = vld [vmem:[#allocation31_spill] sm:$0xff] }
 0x108   : > { %v7098_v49 = vsel %vm8516_vm7, %v8515_v47, %v2824_v36  ;;  %8520 = vst [vmem:[#allocation11_spill] sm:$0xff] %v7109_v20  ;;  %vm8522_vm12 = vmmov %vm8521_vm9  ;;  %v7114_v47 = vpop.f32.mrf.mxu0  ;;  %vm8526_vm0 = vnez %v8525_v50  ;;  %v5594_v50 = vld [vmem:[%s5794_s7 + $0x38] sm:$0xff] }
 0x109   : > { %5444 = vmatmul.mubr.msk.f32.gmra.mxu0 %vm8519_vm15, %v6837_v38  ;;  %vm8524_vm7 = vmmov %vm8521_vm9  ;;  %v2861_v36 = vsel %vm8526_vm0, 0.0, %v7103_v5  ;;  %v7121_v41 = vpop.f32.mrf.mxu1 }
 0x10a   : > { %5394 = vmatmul.mubr.msk.f32.gmra.mxu1 %vm8521_vm9, %v2859_v25  ;;  %5446 = vmatprep.mubr.msk.f32.mxu0 %vm8522_vm12, %v3257_v29  ;;  %8527 = vst [vmem:[#allocation16_spill] sm:$0xff] %v7121_v41  ;;  %v7123_v38 = vpop.f32.mrf.mxu0  ;;  %vm8528_vm15 = vmmov %vm8524_vm7  ;;  %v7138_v29 = vld [vmem:[%s7832_s2] ss:$0 sm:$0xff] }
 0x10b   : > { %5396 = vmatprep.mubr.msk.f32.mxu1 %vm8524_vm7, %v7098_v49  ;;  %v7126_v25 = vpop.f32.mrf.mxu1  ;;  %vm8530_vm9 = vmmov %vm8524_vm7 }
 0x10c   : > { %8529 = vst [vmem:[#allocation10_spill] sm:$0xff] %v7126_v25  ;;  %vm8531_vm14 = vmmov %vm8524_vm7  ;;  %v7131_v48 = vpop.f32.mrf.mxu0 }
 0x10d   : > { %5447 = vmatmul.mubr.msk.f32.gmra.mxu0 %vm8528_vm15, %v3224_v51  ;;  %vm8532_vm12 = vmmov %vm8524_vm7  ;;  %v7140_v41 = vpop.f32.mrf.mxu1  ;;  %v1218_v51 = vadd.f32 %v6963_v26, %v7138_v29  ;;  %v1217_v26 = vadd.f32 %v7138_v29, %v6971_v27  ;;  %v3895_v27 = vsel %vm6277_vm8, 0.0, %v8414_v45 }
 0x10e   : > { %5397 = vmatmul.mubr.msk.f32.gmra.mxu1 %vm8530_vm9, %v2861_v36  ;;  %5501 = vmatprep.mubr.msk.f32.mxu0 %vm8531_vm14, %v8393_v13  ;;  %8533 = vst [vmem:[#allocation14_spill] sm:$0xff] %v7140_v41  ;;  %v5203_v36 = vpop.f32.mrf.mxu0  ;;  %v8534_v13 = vsel %vm8387_vm2, 0.0, %v8395_v7  ;;  %vm8535_vm15 = vmmov %vm8524_vm7  ;;  %v5595_v7 = vld [vmem:[%s5794_s7 + $0x40] sm:$0xff] }
 0x10f   : > { %5451 = vmatprep.mubr.msk.f32.mxu1 %vm8532_vm12, %v5593_v14  ;;  %v5153_v25 = vpop.f32.mrf.mxu1  ;;  %vm8536_vm9 = vmmov %vm8524_vm7  ;;  %v3893_v14 = vsel %vm8397_vm10, 0.0, %v8406_v63  ;;  %v5596_v63 = vld [vmem:[%s5794_s7 + $0x48] sm:$0xff] }
 0x110   : > { %v1544_v59 = vadd.f32 %v5153_v25, %v1218_v51  ;;  %v1969_v41 = vpop.f32.mrf.mxu0  ;;  %vm8537_vm2 = vmmov %vm8524_vm7 }
 0x111   : > { %5502 = vmatmul.mubr.msk.f32.vlgmr.msra.gmra.mxu0 %vm8524_vm7, %v8534_v13  ;;  %v1384_v13 = vpop.f32.mrf.mxu1  ;;  %vm8538_vm14 = vmmov %vm8537_vm2 }
 0x112   : > { %5452 = vmatmul.mubr.msk.f32.vlgmr.msra.gmra.mxu1 %vm8535_vm15, %v5594_v50  ;;  %5504 = vmatprep.mubr.msk.f32.mxu0 %vm8536_vm9, %v8404_v32  ;;  %v1220_v50 = vadd.f32 %v6983_v21, %v7138_v29  ;;  %v7162_v20 = vadd.f32 %v5203_v36, %v1544_v59  ;;  %v1543_v32 = vadd.f32 %v1384_v13, %v1217_v26  ;;  %v5206_v42 = vpop.f32.mrf.mxu0  ;;  %vm8539_vm10 = vmmov %vm8537_vm2 }
 0x113   : > { %5454 = vmatprep.mubr.msk.f32.mxu1 %vm8537_vm2, %v5595_v7  ;;  %v5156_v1 = vpop.f32.mrf.mxu1  ;;  %vm8540_vm12 = vmmov %vm8537_vm2  ;;  %v1219_v21 = vadd.f32 %v7138_v29, %v6991_v56  ;;  %v1222_v59 = vadd.f32 %v7003_v22, %v7138_v29  ;;  %v5598_v56 = vld [vmem:[%s5794_s7 + $0x58] sm:$0xff] }
 0x114   : > { %v7174_v25 = vadd.f32 %v1969_v41, %v1543_v32  ;;  %v1546_v51 = vadd.f32 %v5156_v1, %v1220_v50  ;;  %v1979_v36 = vpop.f32.mrf.mxu0  ;;  %vm8541_vm7 = vmmov %vm8537_vm2  ;;  %v3897_v41 = vsel %vm8416_vm13, 0.0, %v8422_v57  ;;  %v5599_v32 = vld [vmem:[%s5794_s7 + $0x60] sm:$0xff] }
 0x115   : > { %5505 = vmatmul.mubr.msk.f32.gmra.mxu0 %vm8538_vm14, %v3893_v14  ;;  %v5597_v14 = vld [vmem:[%s5794_s7 + $0x50] sm:$0xff]  ;;  %v1394_v26 = vpop.f32.mrf.mxu1  ;;  %vm8542_vm8 = vmmov %vm8537_vm2 }
 0x116   : > { %5455 = vmatmul.mubr.msk.f32.gmra.mxu1 %vm8539_vm10, %v5596_v63  ;;  %5507 = vmatprep.mubr.msk.f32.mxu0 %vm8540_vm12, %v8412_v3  ;;  %v7180_v3 = vadd.f32 %v5206_v42, %v1546_v51  ;;  %v1545_v7 = vadd.f32 %v1394_v26, %v1219_v21  ;;  %v5209_v33 = vpop.f32.mrf.mxu0  ;;  %vm8543_vm15 = vmmov %vm8537_vm2  ;;  %v1221_v42 = vadd.f32 %v7138_v29, %v7011_v31  ;;  %v5600_v31 = vld [vmem:[%s5794_s7 + $0x68] sm:$0xff]  ;;  %v3899_v21 = vsel %vm8424_vm5, 0.0, %v8431_v17  ;;  %v5601_v26 = vld [vmem:[%s5794_s7 + $0x70] sm:$0xff] }
 0x117   : > { %5457 = vmatprep.mubr.msk.f32.mxu1 %vm8541_vm7, %v5597_v14  ;;  %v5159_v45 = vpop.f32.mrf.mxu1  ;;  %vm8544_vm9 = vmmov %vm8537_vm2  ;;  %v1224_v63 = vadd.f32 %v7023_v58, %v7138_v29  ;;  %v1223_v58 = vadd.f32 %v7138_v29, %v7034_v52  ;;  %v5602_v52 = vld [vmem:[%s5794_s7 + $0x78] sm:$0xff] }
 0x118   : > { %v7192_v22 = vadd.f32 %v1979_v36, %v1545_v7  ;;  %v1548_v13 = vadd.f32 %v5159_v45, %v1222_v59  ;;  %v1989_v50 = vpop.f32.mrf.mxu0  ;;  %vm8545_vm13 = vmmov %vm8537_vm2  ;;  %v1226_v7 = vadd.f32 %v7047_v10, %v7138_v29  ;;  %v3901_v45 = vsel %vm8433_vm4, 0.0, %v8438_v8 }
 0x119   : > { %5508 = vmatmul.mubr.msk.f32.gmra.mxu0 %vm8542_vm8, %v3895_v27  ;;  %v1404_v1 = vpop.f32.mrf.mxu1  ;;  %vm8546_vm14 = vmmov %vm8537_vm2  ;;  %v1225_v10 = vadd.f32 %v7138_v29, %v7055_v11  ;;  %v5604_v11 = vld [vmem:[%s5794_s7 + $0x88] sm:$0xff] }
 0x11a   : > { %5458 = vmatmul.mubr.msk.f32.gmra.mxu1 %vm8543_vm15, %v5598_v56  ;;  %5510 = vmatprep.mubr.msk.f32.mxu0 %vm8544_vm9, %v8420_v43  ;;  %v7198_v43 = vadd.f32 %v5209_v33, %v1548_v13  ;;  %v1547_v27 = vadd.f32 %v1404_v1, %v1221_v42  ;;  %v5212_v30 = vpop.f32.mrf.mxu0  ;;  %vm8547_vm10 = vmmov %vm8537_vm2  ;;  %v5603_v13 = vld [vmem:[%s5794_s7 + $0x80] sm:$0xff] }
 0x11b   : > { %5460 = vmatprep.mubr.msk.f32.mxu1 %vm8537_vm2, %v5599_v32  ;;  %v5162_v57 = vpop.f32.mrf.mxu1  ;;  %vm8548_vm12 = vmmov %vm8537_vm2  ;;  %v1228_v32 = vadd.f32 %v7075_v60, %v7138_v29  ;;  %v1227_v60 = vadd.f32 %v7138_v29, %v7084_v37  ;;  %v5606_v37 = vld [vmem:[%s5794_s7 + $0x98] sm:$0xff] }
 0x11c   : > { %v7210_v51 = vadd.f32 %v1989_v50, %v1547_v27  ;;  %v1550_v36 = vadd.f32 %v5162_v57, %v1224_v63  ;;  %v1999_v14 = vpop.f32.mrf.mxu0  ;;  %vm8549_vm5 = vmmov %vm8537_vm2  ;;  %v3903_v63 = vsel %vm8440_vm3, 0.0, %v8447_v61 }
 0x11d   : > { %5511 = vmatmul.mubr.msk.f32.gmra.mxu0 %vm8545_vm13, %v3897_v41  ;;  %v1414_v59 = vpop.f32.mrf.mxu1  ;;  %vm8550_vm7 = vmmov %vm8537_vm2 }
 0x11e   : > { %5461 = vmatmul.mubr.msk.f32.gmra.mxu1 %vm8546_vm14, %v5600_v31  ;;  %5513 = vmatprep.mubr.msk.f32.mxu0 %vm8547_vm10, %v8429_v24  ;;  %v7216_v24 = vadd.f32 %v5212_v30, %v1550_v36  ;;  %v1549_v33 = vadd.f32 %v1414_v59, %v1223_v58  ;;  %v5215_v12 = vpop.f32.mrf.mxu0  ;;  %vm8551_vm8 = vmmov %vm8537_vm2  ;;  %v5605_v31 = vld [vmem:[%s5794_s7 + $0x90] sm:$0xff]  ;;  %v1230_v58 = vadd.f32 %v7105_v39, %v7138_v29 }
 0x11f   : > { %5463 = vmatprep.mubr.msk.f32.mxu1 %vm8548_vm12, %v5601_v26  ;;  %v5165_v17 = vpop.f32.mrf.mxu1  ;;  %vm8552_vm15 = vmmov %vm8537_vm2  ;;  %v1229_v39 = vadd.f32 %v7138_v29, %v7114_v47  ;;  %v5608_v47 = vld [vmem:[%s5794_s7 + $0xa8] sm:$0xff] }
 0x120   : > { %v7228_v56 = vadd.f32 %v1999_v14, %v1549_v33  ;;  %v1552_v41 = vadd.f32 %v5165_v17, %v1226_v7  ;;  %v2009_v42 = vpop.f32.mrf.mxu0  ;;  %vm8553_vm4 = vmmov %vm8537_vm2  ;;  %v3905_v14 = vsel %vm8449_vm6, 0.0, %v8456_v16  ;;  %v5607_v33 = vld [vmem:[%s5794_s7 + $0xa0] sm:$0xff]  ;;  %v1232_v17 = vadd.f32 %v7123_v38, %v7138_v29 }
 0x121   : > { %5514 = vmatmul.mubr.msk.f32.gmra.mxu0 %vm8549_vm5, %v3899_v21  ;;  %v1424_v50 = vpop.f32.mrf.mxu1  ;;  %vm8554_vm9 = vmmov %vm8537_vm2  ;;  %v1231_v38 = vadd.f32 %v7138_v29, %v7131_v48  ;;  %v5610_v48 = vld [vmem:[%s5794_s7 + $0xb8] sm:$0xff] }
 0x122   : > { %5464 = vmatmul.mubr.msk.f32.gmra.mxu1 %vm8550_vm7, %v5602_v52  ;;  %5516 = vmatprep.mubr.msk.f32.mxu0 %vm8551_vm8, %v8436_v35  ;;  %v7234_v35 = vadd.f32 %v5215_v12, %v1552_v41  ;;  %v1551_v1 = vadd.f32 %v1424_v50, %v1225_v10  ;;  %v5218_v62 = vpop.f32.mrf.mxu0  ;;  %vm8555_vm13 = vmmov %vm8537_vm2 }
 0x123   : > { %5466 = vmatprep.mubr.msk.f32.mxu1 %vm8552_vm15, %v5603_v13  ;;  %v5168_v8 = vpop.f32.mrf.mxu1  ;;  %vm8556_vm3 = vmmov %vm8537_vm2  ;;  %v5609_v13 = vld [vmem:[%s5794_s7 + $0xb0] sm:$0xff] }
 0x124   : > { %v7246_v27 = vadd.f32 %v2009_v42, %v1551_v1  ;;  %v1554_v30 = vadd.f32 %v5168_v8, %v1228_v32  ;;  %v2019_v57 = vpop.f32.mrf.mxu0  ;;  %vm8557_vm14 = vmmov %vm8537_vm2  ;;  %v1234_v32 = vadd.f32 %v6967_v19, %v7138_v29  ;;  %v8568_v8 = vld [vmem:[#allocation66_spill] sm:$0xff] }
 0x125   : > { %5517 = vmatmul.mubr.msk.f32.gmra.mxu0 %vm8553_vm4, %v3901_v45  ;;  %v1434_v21 = vpop.f32.mrf.mxu1  ;;  %vm8558_vm10 = vmmov %vm8537_vm2  ;;  %v3907_v45 = vsel %vm8458_vm11, 0.0, %v8465_v0 }
 0x126   : > { %5467 = vmatmul.mubr.msk.f32.gmra.mxu1 %vm8554_vm9, %v5604_v11  ;;  %5519 = vmatprep.mubr.msk.f32.mxu0 %vm8537_vm2, %v8446_v23  ;;  %v7252_v23 = vadd.f32 %v5218_v62, %v1554_v30  ;;  %v1553_v36 = vadd.f32 %v1434_v21, %v1227_v60  ;;  %v5221_v53 = vpop.f32.mrf.mxu0  ;;  %vm8559_vm12 = vmmov %vm8537_vm2  ;;  %v8567_v62 = vld [vmem:[#allocation71_spill] sm:$0xff]  ;;  %vm8569_vm9 = vnez %v8568_v8 }
 0x127   : > { %5469 = vmatprep.mubr.msk.f32.mxu1 %vm8555_vm13, %v5605_v31  ;;  %v5171_v61 = vpop.f32.mrf.mxu1  ;;  %vm8560_vm6 = vmmov %vm8537_vm2  ;;  %v3909_v11 = vsel %vm8569_vm9, 0.0, %v8567_v62  ;;  %v5611_v31 = vld [vmem:[%s5794_s7 + $0xc0] sm:$0xff] }
 0x128   : > { %v7264_v26 = vadd.f32 %v2019_v57, %v1553_v36  ;;  %v1556_v59 = vadd.f32 %v5171_v61, %v1230_v58  ;;  %v2029_v7 = vpop.f32.mrf.mxu0  ;;  %vm8561_vm5 = vmmov %vm8537_vm2  ;;  %v8571_v58 = vld [vmem:[#allocation17_spill] sm:$0xff] }
 0x129   : > { %5520 = vmatmul.mubr.msk.f32.gmra.mxu0 %vm8556_vm3, %v3903_v63  ;;  %v1444_v12 = vpop.f32.mrf.mxu1  ;;  %vm8562_vm7 = vmmov %vm8537_vm2  ;;  %v8570_v63 = vld [vmem:[#allocation13_spill] sm:$0xff]  ;;  %v1236_v36 = vadd.f32 %v8571_v58, %v7138_v29 }
 0x12a   : > { %5470 = vmatmul.mubr.msk.f32.gmra.mxu1 %vm8557_vm14, %v5606_v37  ;;  %5522 = vmatprep.mubr.msk.f32.mxu0 %vm8558_vm10, %v8454_v54  ;;  %v7270_v54 = vadd.f32 %v5221_v53, %v1556_v59  ;;  %v1555_v52 = vadd.f32 %v1444_v12, %v1229_v39  ;;  %v5224_v2 = vpop.f32.mrf.mxu0  ;;  %vm8563_vm8 = vmmov %vm8537_vm2  ;;  %v1233_v19 = vadd.f32 %v7138_v29, %v8570_v63  ;;  %v8575_v39 = vld [vmem:[#allocation24_spill] sm:$0xff]  ;;  %v5615_v63 = vld [vmem:[%s5794_s7 + $0xe0] sm:$0xff] }
 0x12b   : > { %5472 = vmatprep.mubr.msk.f32.mxu1 %vm8559_vm12, %v5607_v33  ;;  %v5174_v16 = vpop.f32.mrf.mxu1  ;;  %vm8564_vm11 = vmmov %vm8537_vm2  ;;  %v8577_v33 = vld [vmem:[#allocation22_spill] sm:$0xff] }
 0x12c   : > { %v7282_v10 = vadd.f32 %v2029_v7, %v1555_v52  ;;  %v1558_v41 = vadd.f32 %v5174_v16, %v1232_v17  ;;  %v2039_v42 = vpop.f32.mrf.mxu0  ;;  %vm8565_vm15 = vmmov %vm8537_vm2  ;;  %v3911_v7 = vsel %vm8477_vm1, 0.0, %v8575_v39  ;;  %v1235_v12 = vadd.f32 %v7138_v29, %v8577_v33  ;;  %v5613_v16 = vld [vmem:[%s5794_s7 + $0xd0] sm:$0xff] }
 0x12d   : > { %5523 = vmatmul.mubr.msk.f32.gmra.mxu0 %vm8560_vm6, %v3905_v14  ;;  %v1454_v50 = vpop.f32.mrf.mxu1  ;;  %vm8566_vm4 = vmmov %vm8537_vm2  ;;  %v5612_v14 = vld [vmem:[%s5794_s7 + $0xc8] sm:$0xff] }
 0x12e   : > { %5473 = vmatmul.mubr.msk.f32.gmra.mxu1 %vm8561_vm5, %v5608_v47  ;;  %5525 = vmatprep.mubr.msk.f32.mxu0 %vm8562_vm7, %v8463_v34  ;;  %v7288_v34 = vadd.f32 %v5224_v2, %v1558_v41  ;;  %v1557_v1 = vadd.f32 %v1454_v50, %v1231_v38  ;;  %v5227_v55 = vpop.f32.mrf.mxu0  ;;  %vm8572_vm13 = vmmov %vm8537_vm2  ;;  %v5614_v50 = vld [vmem:[%s5794_s7 + $0xd8] sm:$0xff] }
 0x12f   : > { %5475 = vmatprep.mubr.msk.f32.mxu1 %vm8563_vm8, %v5609_v13  ;;  %v5177_v0 = vpop.f32.mrf.mxu1  ;;  %vm8573_vm3 = vmmov %vm8537_vm2 }
 0x130   : > { %v7300_v60 = vadd.f32 %v2039_v42, %v1557_v1  ;;  %v1560_v30 = vadd.f32 %v5177_v0, %v1234_v32  ;;  %v2049_v57 = vpop.f32.mrf.mxu0  ;;  %vm8574_vm14 = vmmov %vm8537_vm2  ;;  %v8583_v32 = vld [vmem:[#allocation75_spill] sm:$0xff]  ;;  %v8584_v1 = vld [vmem:[#allocation72_spill] sm:$0xff] }
 0x131   : > { %5526 = vmatmul.mubr.msk.f32.gmra.mxu0 %vm8564_vm11, %v3907_v45  ;;  %v1464_v21 = vpop.f32.mrf.mxu1  ;;  %vm8578_vm10 = vmmov %vm8537_vm2  ;;  %v8579_v45 = vld [vmem:[#allocation28_spill] sm:$0xff]  ;;  %vm8585_vm5 = vnez %v8584_v1  ;;  %v8586_v0 = vld [vmem:[#allocation34_spill] sm:$0xff] }
 0x132   : > { %5476 = vmatmul.mubr.msk.f32.gmra.mxu1 %vm8565_vm15, %v5610_v48  ;;  %5528 = vmatprep.mubr.msk.f32.mxu0 %vm8566_vm4, %v8474_v9  ;;  %v7306_v9 = vadd.f32 %v5227_v55, %v1560_v30  ;;  %v1559_v53 = vadd.f32 %v1464_v21, %v1233_v19  ;;  %v5230_v61 = vpop.f32.mrf.mxu0  ;;  %v1238_v38 = vadd.f32 %v8579_v45, %v7138_v29  ;;  %vm8580_vm1 = vmmov %vm8537_vm2  ;;  %v3913_v55 = vsel %vm8585_vm5, 0.0, %v8583_v32  ;;  %v8588_v30 = vld [vmem:[#allocation7_spill] sm:$0xff]  ;;  %v8603_v1 = vld [vmem:[#allocation8_spill] sm:$0xff] }
 0x133   : > { %5478 = vmatprep.mubr.msk.f32.mxu1 %vm8537_vm2, %v5611_v31  ;;  %v5180_v37 = vpop.f32.mrf.mxu1  ;;  %vm8581_vm12 = vmmov %vm8580_vm1  ;;  %v1237_v48 = vadd.f32 %v7138_v29, %v8586_v0  ;;  %v3884_v32 = vrot.slane %v7066_v46, 1 }
 0x134   : > { %v7318_v17 = vadd.f32 %v2049_v57, %v1559_v53  ;;  %v1562_v52 = vadd.f32 %v5180_v37, %v1236_v36  ;;  %v2059_v2 = vpop.f32.mrf.mxu0  ;;  %vm8582_vm6 = vmmov %vm8580_vm1  ;;  %v1240_v57 = vadd.f32 %v8588_v30, %v7138_v29  ;;  %v5616_v36 = vld [vmem:[%s5794_s7 + $0xe8] sm:$0xff]  ;;  %v8591_v53 = vld [vmem:[#allocation76_spill] sm:$0xff] }
 0x135   : > { %5529 = vmatmul.mubr.msk.f32.gmra.mxu0 %vm8572_vm13, %v3909_v11  ;;  %v1474_v47 = vpop.f32.mrf.mxu1  ;;  %vm8587_vm7 = vmmov %vm8580_vm1 }
 0x136   : > { %5479 = vmatmul.mubr.msk.f32.gmra.mxu1 %vm8573_vm3, %v5612_v14  ;;  %5531 = vmatprep.mubr.msk.f32.mxu0 %vm8574_vm14, %v8484_v40  ;;  %v7324_v40 = vadd.f32 %v5230_v61, %v1562_v52  ;;  %v1561_v41 = vadd.f32 %v1474_v47, %v1235_v12  ;;  %vm8589_vm8 = vmmov %vm8580_vm1  ;;  %v8593_v61 = vld [vmem:[#allocation20_spill] sm:$0xff]  ;;  %v5617_v12 = vld [vmem:[%s5794_s7 + $0xf0] sm:$0xff] }
 0x137   : > { %5481 = vmatprep.mubr.msk.f32.mxu1 %vm8578_vm10, %v5613_v16  ;;  %vm8590_vm11 = vmmov %vm8580_vm1  ;;  %vm8594_vm4 = vnez %v8593_v61  ;;  %v8595_v14 = vld [vmem:[#allocation36_spill] sm:$0xff]  ;;  %v8597_v16 = vld [vmem:[#allocation5_spill] sm:$0xff] }
 0x138   : > { %v5233_v42 = vpop.f32.mrf.mxu0  ;;  %v5183_v13 = vpop.f32.mrf.mxu1  ;;  %v7336_v62 = vadd.f32 %v2059_v2, %v1561_v41  ;;  %vm8592_vm15 = vmmov %vm8580_vm1  ;;  %v3915_v37 = vsel %vm8594_vm4, 0.0, %v6605_v44  ;;  %v1239_v39 = vadd.f32 %v7138_v29, %v8595_v14  ;;  %v206_v2 = vld [vmem:[%s5794_s7 + $0x130] sm:$0xff]  ;;  %v1242_v47 = vadd.f32 %v8597_v16, %v7138_v29 }
 0x139   : > { %5532 = vmatmul.mubr.msk.f32.gmra.mxu0 %vm8580_vm1, %v3911_v7  ;;  %v1564_v8 = vadd.f32 %v5183_v13, %v1238_v38  ;;  %vm8596_vm9 = vmmov %vm8580_vm1  ;;  %v8601_v13 = vld [vmem:[#allocation25_spill] sm:$0xff] }
 0x13a   : > { %5482 = vmatmul.mubr.msk.f32.gmra.mxu1 %vm8581_vm12, %v5614_v50  ;;  %5534 = vmatprep.mubr.msk.f32.mxu0 %vm8582_vm6, %v8493_v6  ;;  %v2069_v11 = vpop.f32.mrf.mxu0  ;;  %v1484_v19 = vpop.f32.mrf.mxu1  ;;  %vm8598_vm2 = vmmov %vm8580_vm1  ;;  %vm8602_vm14 = vnez %v8601_v13  ;;  %vm8606_vm12 = vnez %v8259_v4  ;;  %v8612_v4 = vld [vmem:[#allocation30_spill] sm:$0xff]  ;;  %v8621_v13 = vld [vmem:[#allocation16_spill] sm:$0xff] }
 0x13b   : > { %5484 = vmatprep.mubr.msk.f32.mxu1 %vm8587_vm7, %v5615_v63  ;;  %v7342_v6 = vadd.f32 %v5233_v42, %v1564_v8  ;;  %v1563_v31 = vadd.f32 %v1484_v19, %v1237_v48  ;;  %v5618_v42 = vld [vmem:[%s5794_s7 + $0xf8] sm:$0xff]  ;;  %vm8599_vm13 = vmmov %vm8580_vm1  ;;  %v3917_v50 = vsel %vm8602_vm14, 0.0, %v6628_v18  ;;  %v3886_v63 = vrot.slane %v206_v2, 1 }
 0x13c   : > { %v5236_v21 = vpop.f32.mrf.mxu0  ;;  %v5186_v58 = vpop.f32.mrf.mxu1  ;;  %vm8600_vm3 = vmmov %vm8580_vm1  ;;  %vm8610_vm7 = vcmask 1046528  }
 0x13d   : > { %5535 = vmatmul.mubr.msk.f32.gmra.mxu0 %vm8589_vm8, %v3913_v55  ;;  %v7354_v59 = vadd.f32 %v2069_v11, %v1563_v31  ;;  %v1566_v7 = vadd.f32 %v5186_v58, %v1240_v57  ;;  %v1241_v55 = vadd.f32 %v7138_v29, %v8603_v1  ;;  %v5619_v11 = vld [vmem:[%s5794_s7 + $0x100] sm:$0xff]  ;;  %vm8604_vm10 = vmmov %vm8580_vm1 }
 0x13e   : > { %5485 = vmatmul.mubr.msk.f32.gmra.mxu1 %vm8590_vm11, %v5616_v36  ;;  %5537 = vmatprep.mubr.msk.f32.mxu0 %vm8592_vm15, %v8591_v53  ;;  %v2079_v33 = vpop.f32.mrf.mxu0  ;;  %v1494_v52 = vpop.f32.mrf.mxu1  ;;  %v5620_v36 = vld [vmem:[%s5794_s7 + $0x108] sm:$0xff]  ;;  %vm8607_vm6 = vmmov %vm8580_vm1  ;;  %v8609_v53 = vrot.slane %v7028_v15, 1  ;;  %s4801_s7 = sshll.u32 %s5727_s16, 12  ;;  %s7790_s16 = scalar_lea.sflag [#allocation3], %s161_s4 }
 0x13f   : > { %5487 = vmatprep.mubr.msk.f32.mxu1 %vm8596_vm9, %v5617_v12  ;;  %v7361_v45 = vadd.f32 %v5236_v21, %v1566_v7  ;;  %v1565_v38 = vadd.f32 %v1494_v52, %v1239_v39  ;;  %v3919_v21 = vsel %vm8606_vm12, 0.0, %v7103_v5  ;;  %vm8608_vm5 = vmmov %vm8580_vm1  ;;  %v8615_v52 = vld [vmem:[#allocation11_spill] sm:$0xff]  ;;  %s7783_s11 = scalar_lea.hbm %s7833_s3, %s4801_s7 }
 0x140   : > { %v5239_v44 = vpop.f32.mrf.mxu0  ;;  %v3885_v61 = vsel %vm8610_vm7, %v8609_v53, %v3884_v32  ;;  %vm8613_vm8 = vmmov %vm8580_vm1 }
 0x141   : > { %5538 = vmatmul.mubr.msk.f32.gmra.mxu0 %vm8598_vm2, %v3915_v37  ;;  %v5189_v41 = vpop.f32.mrf.mxu1  ;;  %v7374_v0 = vadd.f32 %v2079_v33, %v1565_v38  ;;  %v8611_v37 = vld [vmem:[#allocation6_spill] sm:$0xff]  ;;  %vm8614_vm11 = vmmov %vm8610_vm7 }
 0x142   : > { %5488 = vmatmul.mubr.msk.f32.gmra.mxu1 %vm8599_vm13, %v5618_v42  ;;  %5540 = vmatprep.mubr.msk.f32.mxu0 %vm8600_vm3, %v6619_v28  ;;  %v1568_v48 = vadd.f32 %v5189_v41, %v1242_v47  ;;  %v2089_v8 = vpop.f32.mrf.mxu0  ;;  %v8605_v28 = vld [vmem:[#allocation12_spill] sm:$0xff]  ;;  %v1243_v14 = vadd.f32 %v7138_v29, %v8611_v37  ;;  %v3887_v5 = vsel %vm8614_vm11, %v3884_v32, %v3886_v63  ;;  %vm8616_vm15 = vmmov %vm8580_vm1 }
 0x143   : > { %5490 = vmatprep.mubr.msk.f32.mxu1 %vm8604_vm10, %v5619_v11  ;;  %v1504_v19 = vpop.f32.mrf.mxu1  ;;  %v1244_v30 = vadd.f32 %v8605_v28, %v7138_v29  ;;  %vm8618_vm4 = vmmov %vm8580_vm1  ;;  %v3921_v42 = vsel %vm8526_vm0, 0.0, %v3887_v5 }
 0x144   : > { %v7380_v57 = vadd.f32 %v5239_v44, %v1568_v48  ;;  %v1567_v18 = vadd.f32 %v1504_v19, %v1241_v55  ;;  %v5242_v31 = vpop.f32.mrf.mxu0  ;;  %v8617_v44 = vld [vmem:[#allocation9_spill] sm:$0xff]  ;;  %vm8619_vm9 = vmmov %vm8580_vm1 }
 0x145   : > { %5541 = vmatmul.mubr.msk.f32.gmra.mxu0 %vm8580_vm1, %v3917_v50  ;;  %v5192_v58 = vpop.f32.mrf.mxu1  ;;  %v1245_v50 = vadd.f32 %v7138_v29, %v8621_v13  ;;  %vm8622_vm2 = vmmov %vm8580_vm1 }
 0x146   : > { %5491 = vmatmul.mubr.msk.f32.gmra.mxu1 %vm8607_vm6, %v5620_v36  ;;  %5543 = vmatprep.mubr.msk.f32.mxu0 %vm8608_vm5, %v7098_v49  ;;  %v7395_v39 = vadd.f32 %v2089_v8, %v1567_v18  ;;  %v1570_v7 = vadd.f32 %v5192_v58, %v1244_v30  ;;  %v2099_v33 = vpop.f32.mrf.mxu0  ;;  %v1246_v49 = vadd.f32 %v8615_v52, %v7138_v29  ;;  %v8623_v8 = vld [vmem:[#allocation10_spill] sm:$0xff]  ;;  %vm8624_vm13 = vmmov %vm8580_vm1 }
 0x147   : > { %5493 = vmatprep.mubr.msk.f32.mxu1 %vm8613_vm8, %v8612_v4  ;;  %v1514_v12 = vpop.f32.mrf.mxu1  ;;  %v1248_v11 = vadd.f32 %v8623_v8, %v7138_v29  ;;  %vm8625_vm0 = vmmov %vm8580_vm1  ;;  %v8626_v18 = vld [vmem:[#allocation14_spill] sm:$0xff] }
 0x148   : > { %v7402_v2 = vadd.f32 %v5242_v31, %v1570_v7  ;;  %v1569_v16 = vadd.f32 %v1514_v12, %v1243_v14  ;;  %v1247_v31 = vadd.f32 %v7138_v29, %v8626_v18 }
 0x149   : > { %v5245_v47 = vpop.f32.mrf.mxu0  ;;  %5544 = vmatmul.mubr.msk.f32.gmra.mxu0 %vm8616_vm15, %v3919_v21  ;;  %v5195_v38 = vpop.f32.mrf.mxu1 }
 0x14a   : > { %5494 = vmatmul.mubr.msk.f32.gmra.mxu1 %vm8618_vm4, %v8617_v44  ;;  %5546 = vmatprep.mubr.msk.f32.mxu0 %vm8619_vm9, %v3885_v61  ;;  %v7412_v32 = vadd.f32 %v2099_v33, %v1569_v16  ;;  %v1572_v1 = vadd.f32 %v5195_v38, %v1246_v49 }
 0x14b   : > { %v2109_v55 = vpop.f32.mrf.mxu0  ;;  %5496 = vmatprep.mubr.msk.f32.mxu1 %vm8622_vm2, %v7028_v15  ;;  %v1524_v48 = vpop.f32.mrf.mxu1 }
 0x14c   : > { %v7418_v63 = vadd.f32 %v5245_v47, %v1572_v1  ;;  %v1571_v19 = vadd.f32 %v1524_v48, %v1245_v50 }
 0x14d   : > { %v5248_v28 = vpop.f32.mrf.mxu0  ;;  %5547 = vmatmul.mubr.msk.f32.gmra.mxu0 %vm8624_vm13, %v3921_v42  ;;  %v5198_v30 = vpop.f32.mrf.mxu1 }
 0x14e   : > { %5497 = vmatmul.mubr.msk.f32.gmra.mxu1 %vm8625_vm0, %v7066_v46  ;;  %v7425_v21 = vadd.f32 %v2109_v55, %v1571_v19  ;;  %v1574_v15 = vadd.f32 %v5198_v30, %v1248_v11 }
 0x14f   : > { %v2119_v58 = vpop.f32.mrf.mxu0  ;;  %v1534_v36 = vpop.f32.mrf.mxu1 }
 0x150   : > { %v7427_v53 = vadd.f32 %v5248_v28, %v1574_v15  ;;  %v1573_v61 = vadd.f32 %v1534_v36, %v1247_v31 }
 0x151   : > { %v5303_v37 = vpop.f32.mrf.mxu0  ;;  %v5253_v14 = vpop.f32.mrf.mxu1 }
 0x152   : > { %v7429_v7 = vadd.f32 %v2119_v58, %v1573_v61  ;;  %v2526_v33 = vadd.f32 %v5253_v14, %v7162_v20 }
 0x153   : > { %v2632_v4 = vpop.f32.mrf.mxu0  ;;  %v2366_v5 = vpop.f32.mrf.mxu1 }
 0x154   : > { %v7432_v46 = vadd.f32 %v5303_v37, %v2526_v33  ;;  %v2525_v29 = vadd.f32 %v2366_v5, %v7174_v25 }
 0x155   : > { %v5306_v12 = vpop.f32.mrf.mxu0 }
 0x156   : > { %v5256_v52 = vpop.f32.mrf.mxu1  ;;  %v7435_v49 = vadd.f32 %v2632_v4, %v2525_v29 }
 0x157   : > { %v2528_v16 = vadd.f32 %v5256_v52, %v7180_v3  ;;  %v2642_v47 = vpop.f32.mrf.mxu0 }
 0x158   : > { %v2376_v38 = vpop.f32.mrf.mxu1 }
 0x159   : > { %v7438_v44 = vadd.f32 %v5306_v12, %v2528_v16  ;;  %v2527_v41 = vadd.f32 %v2376_v38, %v7192_v22  ;;  %v5309_v42 = vpop.f32.mrf.mxu0 }
 0x15a   : > { %v5259_v20 = vpop.f32.mrf.mxu1 }
 0x15b   : > { %v7441_v13 = vadd.f32 %v2642_v47, %v2527_v41  ;;  %v2530_v50 = vadd.f32 %v5259_v20, %v7198_v43  ;;  %v2652_v1 = vpop.f32.mrf.mxu0 }
 0x15c   : > { %v2386_v25 = vpop.f32.mrf.mxu1 }
 0x15d   : > { %v7444_v55 = vadd.f32 %v5309_v42, %v2530_v50  ;;  %v2529_v48 = vadd.f32 %v2386_v25, %v7210_v51  ;;  %v5312_v8 = vpop.f32.mrf.mxu0 }
 0x15e   : > { %v5262_v3 = vpop.f32.mrf.mxu1 }
 0x15f   : > { %v7447_v11 = vadd.f32 %v2652_v1, %v2529_v48  ;;  %v2532_v19 = vadd.f32 %v5262_v3, %v7216_v24  ;;  %v2662_v28 = vpop.f32.mrf.mxu0 }
 0x160   : > { %v2396_v22 = vpop.f32.mrf.mxu1 }
 0x161   : > { %v7450_v30 = vadd.f32 %v5312_v8, %v2532_v19  ;;  %v2531_v18 = vadd.f32 %v2396_v22, %v7228_v56  ;;  %v5315_v31 = vpop.f32.mrf.mxu0 }
 0x162   : > { %v5265_v43 = vpop.f32.mrf.mxu1 }
 0x163   : > { %v7453_v15 = vadd.f32 %v2662_v28, %v2531_v18  ;;  %v2534_v58 = vadd.f32 %v5265_v43, %v7234_v35  ;;  %v2672_v36 = vpop.f32.mrf.mxu0 }
 0x164   : > { %v2406_v51 = vpop.f32.mrf.mxu1 }
 0x165   : > { %v7456_v61 = vadd.f32 %v5315_v31, %v2534_v58  ;;  %v2533_v37 = vadd.f32 %v2406_v51, %v7246_v27  ;;  %v5318_v14 = vpop.f32.mrf.mxu0 }
 0x166   : > { %v5268_v24 = vpop.f32.mrf.mxu1 }
 0x167   : > { %v7459_v33 = vadd.f32 %v2672_v36, %v2533_v37  ;;  %v2536_v4 = vadd.f32 %v5268_v24, %v7252_v23  ;;  %v2682_v5 = vpop.f32.mrf.mxu0 }
 0x168   : > { %v2416_v56 = vpop.f32.mrf.mxu1 }
 0x169   : > { %v7462_v29 = vadd.f32 %v5318_v14, %v2536_v4  ;;  %v2535_v12 = vadd.f32 %v2416_v56, %v7264_v26  ;;  %v5321_v52 = vpop.f32.mrf.mxu0 }
 0x16a   : > { %v5271_v35 = vpop.f32.mrf.mxu1 }
 0x16b   : > { %v7465_v16 = vadd.f32 %v2682_v5, %v2535_v12  ;;  %v2538_v47 = vadd.f32 %v5271_v35, %v7270_v54  ;;  %v2692_v38 = vpop.f32.mrf.mxu0 }
 0x16c   : > { %v2426_v27 = vpop.f32.mrf.mxu1 }
 0x16d   : > { %v7468_v41 = vadd.f32 %v5321_v52, %v2538_v47  ;;  %v2537_v42 = vadd.f32 %v2426_v27, %v7282_v10  ;;  %v5324_v20 = vpop.f32.mrf.mxu0 }
 0x16e   : > { %v5274_v23 = vpop.f32.mrf.mxu1 }
 0x16f   : > { %v7471_v50 = vadd.f32 %v2692_v38, %v2537_v42  ;;  %v2540_v1 = vadd.f32 %v5274_v23, %v7288_v34  ;;  %v2702_v25 = vpop.f32.mrf.mxu0 }
 0x170   : > { %v2436_v26 = vpop.f32.mrf.mxu1 }
 0x171   : > { %v7474_v48 = vadd.f32 %v5324_v20, %v2540_v1  ;;  %v2539_v8 = vadd.f32 %v2436_v26, %v7300_v60  ;;  %v5327_v3 = vpop.f32.mrf.mxu0 }
 0x172   : > { %v5277_v54 = vpop.f32.mrf.mxu1 }
 0x173   : > { %v7477_v19 = vadd.f32 %v2702_v25, %v2539_v8  ;;  %v2542_v28 = vadd.f32 %v5277_v54, %v7306_v9  ;;  %v2712_v22 = vpop.f32.mrf.mxu0 }
 0x174   : > { %v2446_v10 = vpop.f32.mrf.mxu1 }
 0x175   : > { %v7480_v18 = vadd.f32 %v5327_v3, %v2542_v28  ;;  %v2541_v31 = vadd.f32 %v2446_v10, %v7318_v17  ;;  %v5330_v43 = vpop.f32.mrf.mxu0 }
 0x176   : > { %v5280_v34 = vpop.f32.mrf.mxu1 }
 0x177   : > { %v7483_v58 = vadd.f32 %v2712_v22, %v2541_v31  ;;  %v2544_v36 = vadd.f32 %v5280_v34, %v7324_v40  ;;  %v2722_v51 = vpop.f32.mrf.mxu0 }
 0x178   : > { %v2456_v60 = vpop.f32.mrf.mxu1 }
 0x179   : > { %v7486_v37 = vadd.f32 %v5330_v43, %v2544_v36  ;;  %v2543_v14 = vadd.f32 %v2456_v60, %v7336_v62  ;;  %v5333_v24 = vpop.f32.mrf.mxu0 }
 0x17a   : > { %v5283_v9 = vpop.f32.mrf.mxu1 }
 0x17b   : > { %8627 = vst [vmem:[#allocation19_spill] sm:$0xff] %v7486_v37  ;;  %v7489_v4 = vadd.f32 %v2722_v51, %v2543_v14  ;;  %v2546_v5 = vadd.f32 %v5283_v9, %v7342_v6  ;;  %v2732_v56 = vpop.f32.mrf.mxu0 }
 0x17c   : > { %v2466_v17 = vpop.f32.mrf.mxu1 }
 0x17d   : > { %8628 = vst [vmem:[#allocation15_spill] sm:$0xff] %v7489_v4  ;;  %v7492_v12 = vadd.f32 %v5333_v24, %v2546_v5  ;;  %v2545_v52 = vadd.f32 %v2466_v17, %v7354_v59  ;;  %v5336_v35 = vpop.f32.mrf.mxu0 }
 0x17e   : > { %v5286_v40 = vpop.f32.mrf.mxu1 }
 0x17f   : > { %8629 = vst [vmem:[#allocation18_spill] sm:$0xff] %v7492_v12  ;;  %v7495_v47 = vadd.f32 %v2732_v56, %v2545_v52  ;;  %v2548_v38 = vadd.f32 %v5286_v40, %v7361_v45  ;;  %v2742_v27 = vpop.f32.mrf.mxu0 }
 0x180   : > { %v2476_v62 = vpop.f32.mrf.mxu1 }
 0x181   : > { %8630 = vst [vmem:[#allocation27_spill] sm:$0xff] %v7495_v47  ;;  %v7498_v42 = vadd.f32 %v5336_v35, %v2548_v38  ;;  %v2547_v20 = vadd.f32 %v2476_v62, %v7374_v0  ;;  %v5339_v23 = vpop.f32.mrf.mxu0 }
 0x182   : > { %v5289_v6 = vpop.f32.mrf.mxu1 }
 0x183   : > { %8631 = vst [vmem:[#allocation21_spill] sm:$0xff] %v7498_v42  ;;  %v7501_v1 = vadd.f32 %v2742_v27, %v2547_v20  ;;  %v2550_v25 = vadd.f32 %v5289_v6, %v7380_v57  ;;  %v2752_v26 = vpop.f32.mrf.mxu0 }
 0x184   : > { %v2486_v59 = vpop.f32.mrf.mxu1 }
 0x185   : > { %8632 = vst [vmem:[#allocation23_spill] sm:$0xff] %v7501_v1  ;;  %v7504_v8 = vadd.f32 %v5339_v23, %v2550_v25  ;;  %v2549_v3 = vadd.f32 %v2486_v59, %v7395_v39  ;;  %v5342_v54 = vpop.f32.mrf.mxu0 }
 0x186   : > { %v5292_v45 = vpop.f32.mrf.mxu1 }
 0x187   : > { %8633 = vst [vmem:[#allocation33_spill] sm:$0xff] %v7504_v8  ;;  %v7507_v28 = vadd.f32 %v2752_v26, %v2549_v3  ;;  %v2552_v22 = vadd.f32 %v5292_v45, %v7402_v2  ;;  %v2762_v10 = vpop.f32.mrf.mxu0 }
 0x188   : > { %v2496_v0 = vpop.f32.mrf.mxu1 }
 0x189   : > { %8634 = vst [vmem:[#allocation26_spill] sm:$0xff] %v7507_v28  ;;  %v7510_v31 = vadd.f32 %v5342_v54, %v2552_v22  ;;  %v2551_v43 = vadd.f32 %v2496_v0, %v7412_v32  ;;  %v5345_v34 = vpop.f32.mrf.mxu0 }
 0x18a   : > { %v5295_v57 = vpop.f32.mrf.mxu1 }
 0x18b   : > { %8635 = vst [vmem:[#allocation29_spill] sm:$0xff] %v7510_v31  ;;  %v7513_v36 = vadd.f32 %v2762_v10, %v2551_v43  ;;  %v2554_v51 = vadd.f32 %v5295_v57, %v7418_v63  ;;  %v2772_v60 = vpop.f32.mrf.mxu0 }
 0x18c   : > { %v2506_v39 = vpop.f32.mrf.mxu1 }
 0x18d   : > { %8636 = vst [vmem:[#allocation38_spill] sm:$0xff] %v7513_v36  ;;  %v7516_v14 = vadd.f32 %v5345_v34, %v2554_v51  ;;  %v2553_v24 = vadd.f32 %v2506_v39, %v7425_v21  ;;  %v5348_v9 = vpop.f32.mrf.mxu0 }
 0x18e   : > { %v5298_v2 = vpop.f32.mrf.mxu1 }
 0x18f   : > { %8637 = vst [vmem:[#allocation32_spill] sm:$0xff] %v7516_v14  ;;  %v7519_v5 = vadd.f32 %v2772_v60, %v2553_v24  ;;  %v2556_v56 = vadd.f32 %v5298_v2, %v7427_v53  ;;  %v2782_v17 = vpop.f32.mrf.mxu0 }
 0x190   : > { %v2516_v32 = vpop.f32.mrf.mxu1 }
 0x191   : > { %8638 = vst [vmem:[#allocation35_spill] sm:$0xff] %v7519_v5  ;;  %v7522_v52 = vadd.f32 %v5348_v9, %v2556_v56  ;;  %v2555_v35 = vadd.f32 %v2516_v32, %v7429_v7  ;;  %v7525_v40 = vpop.f32.mrf.mxu0 }
 0x192   : > { %v5353_v63 = vpop.f32.mrf.mxu1 }
 0x193   : > { %8639 = vst [vmem:[#allocation37_spill] sm:$0xff] %v7522_v52  ;;  %v7527_v38 = vadd.f32 %v2782_v17, %v2555_v35  ;;  %v7529_v27 = vpop.f32.mrf.mxu0 }
 0x194   : > { %v3029_v21 = vpop.f32.mrf.mxu1 }
 0x195   : > { %8640 = vst [vmem:[#allocation43_spill] sm:$0xff] %v7527_v38  ;;  %v7531_v62 = vpop.f32.mrf.mxu0 }
 0x196   : > { %v5356_v20 = vpop.f32.mrf.mxu1 }
 0x197   : > { %v7533_v23 = vpop.f32.mrf.mxu0 }
 0x198   : > { %v7535_v53 = vpop.f32.mrf.mxu1 }
 0x199   : > { %v7537_v6 = vpop.f32.mrf.mxu0 }
 0x19a   : > { %v7539_v25 = vpop.f32.mrf.mxu1 }
 0x19b   : > { %v7541_v7 = vpop.f32.mrf.mxu0 }
 0x19c   : > { %v7543_v26 = vpop.f32.mrf.mxu1 }
 0x19d   : > { %v7545_v59 = vpop.f32.mrf.mxu0 }
 0x19e   : > { %v7547_v3 = vpop.f32.mrf.mxu1 }
 0x19f   : > { %v7549_v54 = vpop.f32.mrf.mxu0 }
 0x1a0   : > { %v7551_v45 = vpop.f32.mrf.mxu1 }
 0x1a1   : > { %v7553_v22 = vpop.f32.mrf.mxu0 }
 0x1a2   : > { %v7555_v10 = vpop.f32.mrf.mxu1 }
 0x1a3   : > { %v7557_v0 = vpop.f32.mrf.mxu0 }
 0x1a4   : > { %v7559_v43 = vpop.f32.mrf.mxu1 }
 0x1a5   : > { %v7561_v34 = vpop.f32.mrf.mxu0 }
 0x1a6   : > { %v7563_v57 = vpop.f32.mrf.mxu1 }
 0x1a7   : > { %v7565_v51 = vpop.f32.mrf.mxu0 }
 0x1a8   : > { %v7567_v60 = vpop.f32.mrf.mxu1 }
 0x1a9   : > { %v7569_v39 = vpop.f32.mrf.mxu0 }
 0x1aa   : > { %v7571_v24 = vpop.f32.mrf.mxu1 }
 0x1ab   : > { %v7573_v9 = vpop.f32.mrf.mxu0 }
 0x1ac   : > { %v7575_v2 = vpop.f32.mrf.mxu1 }
 0x1ad   : > { %v7577_v56 = vpop.f32.mrf.mxu0 }
 0x1ae   : > { %v7579_v17 = vpop.f32.mrf.mxu1 }
 0x1af   : > { %v7581_v32 = vpop.f32.mrf.mxu0 }
 0x1b0   : > { %v7583_v35 = vpop.f32.mrf.mxu1 }
 0x1b1   : > { %v7585_v38 = vpop.f32.mrf.mxu0 }
 0x1b2   : > { %v7587_v52 = vpop.f32.mrf.mxu1 }
 0x1b3   : > { %v7589_v5 = vpop.f32.mrf.mxu0 }
 0x1b4   : > { %8641 = vst [vmem:[#allocation39_spill] sm:$0xff] %v7589_v5  ;;  %v7591_v14 = vpop.f32.mrf.mxu1 }
 0x1b5   : > { %v7593_v36 = vpop.f32.mrf.mxu0 }
 0x1b6   : > { %8642 = vst [vmem:[#allocation40_spill] sm:$0xff] %v7593_v36  ;;  %v7595_v31 = vpop.f32.mrf.mxu1 }
 0x1b7   : > { %8643 = vst [vmem:[#allocation44_spill] sm:$0xff] %v7595_v31  ;;  %v7597_v28 = vpop.f32.mrf.mxu0 }
 0x1b8   : > { %8644 = vst [vmem:[#allocation41_spill] sm:$0xff] %v7597_v28  ;;  %v7599_v8 = vpop.f32.mrf.mxu1 }
 0x1b9   : > { %8645 = vst [vmem:[#allocation42_spill] sm:$0xff] %v7599_v8  ;;  %v7601_v1 = vpop.f32.mrf.mxu0 }
 0x1ba   : > { %8646 = vst [vmem:[#allocation46_spill] sm:$0xff] %v7601_v1  ;;  %v7603_v42 = vpop.f32.mrf.mxu1 }
 0x1bb   : > { %8647 = vst [vmem:[#allocation47_spill] sm:$0xff] %v7603_v42  ;;  %v7605_v47 = vpop.f32.mrf.mxu0 }
 0x1bc   : > { %8648 = vst [vmem:[#allocation45_spill] sm:$0xff] %v7605_v47  ;;  %v7607_v12 = vpop.f32.mrf.mxu1 }
 0x1bd   : > { %8649 = vst [vmem:[#allocation49_spill] sm:$0xff] %v7607_v12  ;;  %v7609_v4 = vpop.f32.mrf.mxu0 }
 0x1be   : > { %8650 = vst [vmem:[#allocation51_spill] sm:$0xff] %v7609_v4  ;;  %v7611_v5 = vpop.f32.mrf.mxu1 }
 0x1bf   : > { %8651 = vst [vmem:[#allocation48_spill] sm:$0xff] %v7611_v5  ;;  %v7613_v37 = vpop.f32.mrf.mxu0 }
 0x1c0   : > { %8652 = vst [vmem:[#allocation52_spill] sm:$0xff] %v7613_v37  ;;  %v7615_v36 = vpop.f32.mrf.mxu1 }
 0x1c1   : > { %8653 = vst [vmem:[#allocation53_spill] sm:$0xff] %v7615_v36  ;;  %v7617_v31 = vpop.f32.mrf.mxu0 }
 0x1c2   : > { %8654 = vst [vmem:[#allocation50_spill] sm:$0xff] %v7617_v31  ;;  %v7619_v28 = vpop.f32.mrf.mxu1 }
 0x1c3   : > { %8655 = vst [vmem:[#allocation55_spill] sm:$0xff] %v7619_v28  ;;  %v7621_v8 = vpop.f32.mrf.mxu0 }
 0x1c4   : > { %8656 = vst [vmem:[#allocation57_spill] sm:$0xff] %v7621_v8  ;;  %v7623_v1 = vpop.f32.mrf.mxu1  ;;  %v3189_v8 = vadd.f32 %v5353_v63, %v7432_v46 }
 0x1c5   : > { %8657 = vst [vmem:[#allocation54_spill] sm:$0xff] %v7623_v1  ;;  %v7625_v42 = vpop.f32.mrf.mxu0 }
 0x1c6   : > { %8658 = vst [vmem:[#allocation58_spill] sm:$0xff] %v7625_v42  ;;  %v7627_v47 = vpop.f32.mrf.mxu1 }
 0x1c7   : > { %8659 = vst [vmem:[#allocation59_spill] sm:$0xff] %v7627_v47  ;;  %v7629_v4 = vpop.f32.mrf.mxu0  ;;  %v3188_v47 = vadd.f32 %v3029_v21, %v7435_v49  ;;  %v3193_v49 = vadd.f32 %v7539_v25, %v7444_v55  ;;  %v3195_v25 = vadd.f32 %v7547_v3, %v7450_v30  ;;  %v3194_v3 = vadd.f32 %v7551_v45, %v7453_v15 }
 0x1c8   : > { %8660 = vst [vmem:[#allocation56_spill] sm:$0xff] %v7629_v4  ;;  %v7631_v5 = vpop.f32.mrf.mxu1 }
 0x1c9   : > { %8661 = vst [vmem:[#allocation61_spill] sm:$0xff] %v7631_v5  ;;  %v7633_v37 = vpop.f32.mrf.mxu0  ;;  %v3585_v46 = vadd.f32 %v7529_v27, %v3188_v47  ;;  %v3590_v55 = vadd.f32 %v7537_v6, %v3193_v49  ;;  %v3197_v49 = vadd.f32 %v7555_v10, %v7456_v61 }
 0x1ca   : > { %8662 = vst [vmem:[#allocation63_spill] sm:$0xff] %v7633_v37  ;;  %v7635_v36 = vpop.f32.mrf.mxu1  ;;  %v3586_v37 = vadd.f32 %v7525_v40, %v3189_v8 }
 0x1cb   : > { %8663 = vst [vmem:[#allocation60_spill] sm:$0xff] %v7635_v36  ;;  %v7637_v31 = vpop.f32.mrf.mxu0  ;;  %v3191_v36 = vadd.f32 %v5356_v20, %v7438_v44 }
 0x1cc   : > { %8664 = vst [vmem:[#allocation64_spill] sm:$0xff] %v7637_v31  ;;  %v7639_v28 = vpop.f32.mrf.mxu1 }
 0x1cd   : > { %8665 = vst [vmem:[#allocation65_spill] sm:$0xff] %v7639_v28  ;;  %v7642_v1 = vpop.f32.mrf.mxu0  ;;  %v3588_v8 = vadd.f32 %v7531_v62, %v3191_v36 }
 0x1ce   : > { %8666 = vst [vmem:[#allocation62_spill] sm:$0xff] %v7642_v1  ;;  %v7644_v42 = vpop.f32.mrf.mxu1  ;;  %v3190_v1 = vadd.f32 %v7535_v53, %v7441_v13 }
 0x1cf   : > { %v7647_v4 = vpop.f32.mrf.mxu0 }
 0x1d0   : > { %8667 = vst [vmem:[#allocation67_spill] sm:$0xff] %v7647_v4  ;;  %v7649_v5 = vpop.f32.mrf.mxu1  ;;  %v3192_v4 = vadd.f32 %v7543_v26, %v7447_v11  ;;  %v3587_v53 = vadd.f32 %v7533_v23, %v3190_v1 }
 0x1d1   : > { %v5503_v31 = vpop.f32.mrf.mxu0 }
 0x1d2   : > { %v5453_v28 = vpop.f32.mrf.mxu1  ;;  %v3589_v11 = vadd.f32 %v7541_v7, %v3192_v4 }
 0x1d3   : > { %v3852_v63 = vadd.f32 %v5453_v28, %v3586_v37  ;;  %v4089_v12 = vpop.f32.mrf.mxu0 }
 0x1d4   : > { %v3692_v21 = vpop.f32.mrf.mxu1 }
 0x1d5   : > { %v4249_v40 = vadd.f32 %v5503_v31, %v3852_v63  ;;  %v3851_v44 = vadd.f32 %v3692_v21, %v3585_v46  ;;  %v5506_v20 = vpop.f32.mrf.mxu0  ;;  %v3592_v21 = vadd.f32 %v7545_v59, %v3195_v25  ;;  %v3591_v59 = vadd.f32 %v7549_v54, %v3194_v3 }
 0x1d6   : > { %v5456_v47 = vpop.f32.mrf.mxu1  ;;  %v3200_v3 = vadd.f32 %v7575_v2, %v7471_v50 }
 0x1d7   : > { %vm4281_vm3 = vcmp.ge.f32.partialorder %v4249_v40, 0.0  ;;  %v4313_v37 = vmul.f32 0.01, %v4249_v40  ;;  %v4248_v28 = vadd.f32 %v4089_v12, %v3851_v44  ;;  %v3854_v27 = vadd.f32 %v5456_v47, %v3588_v8  ;;  %v4099_v13 = vpop.f32.mrf.mxu0 }
 0x1d8   : > { %v3702_v36 = vpop.f32.mrf.mxu1  ;;  %v3196_v47 = vadd.f32 %v7559_v43, %v7459_v33 }
 0x1d9   : > { %v4345_v31 = vsel %vm4281_vm3, %v4249_v40, %v4313_v37  ;;  %vm4280_vm14 = vcmp.ge.f32.partialorder %v4248_v28, 0.0  ;;  %v4312_v62 = vmul.f32 0.01, %v4248_v28  ;;  %v4251_v46 = vadd.f32 %v5506_v20, %v3854_v27  ;;  %v5509_v63 = vpop.f32.mrf.mxu0 }
 0x1da   : > { %4377 = vst [vmem:[%s7669_s6 + $0x8] sm:$0xff] %v4345_v31  ;;  %v3853_v12 = vadd.f32 %v3702_v36, %v3587_v53  ;;  %v5459_v1 = vpop.f32.mrf.mxu1  ;;  %v3594_v27 = vadd.f32 %v7553_v22, %v3197_v49  ;;  %v3593_v31 = vadd.f32 %v7557_v0, %v3196_v47  ;;  %v3597_v47 = vadd.f32 %v7573_v9, %v3200_v3  ;;  %v8674_v3 = vld [vmem:[#allocation47_spill] sm:$0xff] }
 0x1db   : > { %v4344_v23 = vsel %vm4280_vm14, %v4248_v28, %v4312_v62  ;;  %vm4283_vm10 = vcmp.ge.f32.partialorder %v4251_v46, 0.0  ;;  %v4315_v6 = vmul.f32 0.01, %v4251_v46  ;;  %v3856_v30 = vadd.f32 %v5459_v1, %v3590_v55  ;;  %v4109_v26 = vpop.f32.mrf.mxu0 }
 0x1dc   : > { %4376 = vst [vmem:[%s7669_s6] sm:$0xff] %v4344_v23  ;;  %v4250_v4 = vadd.f32 %v4099_v13, %v3853_v12  ;;  %v3712_v7 = vpop.f32.mrf.mxu1  ;;  %v3199_v13 = vadd.f32 %v7563_v57, %v7462_v29  ;;  %v3198_v57 = vadd.f32 %v7567_v60, %v7465_v16 }
 0x1dd   : > { %v4347_v8 = vsel %vm4283_vm10, %v4251_v46, %v4315_v6  ;;  %v4253_v40 = vadd.f32 %v5509_v63, %v3856_v30  ;;  %v3855_v44 = vadd.f32 %v3712_v7, %v3589_v11  ;;  %v5512_v20 = vpop.f32.mrf.mxu0  ;;  %v3201_v11 = vadd.f32 %v7571_v24, %v7468_v41 }
 0x1de   : > { %4379 = vst [vmem:[%s7669_s6 + $0x18] sm:$0xff] %v4347_v8  ;;  %vm4282_vm1 = vcmp.ge.f32.partialorder %v4250_v4, 0.0  ;;  %v4314_v37 = vmul.f32 0.01, %v4250_v4  ;;  %v5462_v15 = vpop.f32.mrf.mxu1  ;;  %v3596_v0 = vadd.f32 %v7561_v34, %v3199_v13  ;;  %v3595_v34 = vadd.f32 %v7565_v51, %v3198_v57 }
 0x1df   : > { %vm4285_vm12 = vcmp.ge.f32.partialorder %v4253_v40, 0.0  ;;  %v4317_v45 = vmul.f32 0.01, %v4253_v40  ;;  %v4252_v61 = vadd.f32 %v4109_v26, %v3855_v44  ;;  %v3858_v10 = vadd.f32 %v5462_v15, %v3592_v21  ;;  %v4119_v28 = vpop.f32.mrf.mxu0 }
 0x1e0   : > { %v4346_v53 = vsel %vm4282_vm1, %v4250_v4, %v4314_v37  ;;  %v3722_v55 = vpop.f32.mrf.mxu1  ;;  %v3598_v7 = vadd.f32 %v7569_v39, %v3201_v11  ;;  %v3203_v21 = vadd.f32 %v7579_v17, %v7474_v48  ;;  %v3202_v17 = vadd.f32 %v7583_v35, %v7477_v19 }
 0x1e1   : > { %4378 = vst [vmem:[%s7669_s6 + $0x10] sm:$0xff] %v4346_v53  ;;  %v4349_v33 = vsel %vm4285_vm12, %v4253_v40, %v4317_v45  ;;  %vm4284_vm6 = vcmp.ge.f32.partialorder %v4252_v61, 0.0  ;;  %v4316_v43 = vmul.f32 0.01, %v4252_v61  ;;  %v4255_v25 = vadd.f32 %v5512_v20, %v3858_v10  ;;  %v5515_v36 = vpop.f32.mrf.mxu0 }
 0x1e2   : > { %4381 = vst [vmem:[%s7669_s6 + $0x28] sm:$0xff] %v4349_v33  ;;  %v3857_v62 = vadd.f32 %v3722_v55, %v3591_v59  ;;  %v5465_v46 = vpop.f32.mrf.mxu1  ;;  %v3600_v9 = vadd.f32 %v7577_v56, %v3203_v21  ;;  %v3204_v55 = vadd.f32 %v7591_v14, %v7483_v58  ;;  %v3599_v56 = vadd.f32 %v7581_v32, %v3202_v17  ;;  %v8680_v17 = vld [vmem:[#allocation21_spill] sm:$0xff] }
 0x1e3   : > { %v4348_v54 = vsel %vm4284_vm6, %v4252_v61, %v4316_v43  ;;  %vm4287_vm5 = vcmp.ge.f32.partialorder %v4255_v25, 0.0  ;;  %v4319_v22 = vmul.f32 0.01, %v4255_v25  ;;  %v3860_v63 = vadd.f32 %v5465_v46, %v3594_v27  ;;  %v4129_v29 = vpop.f32.mrf.mxu0 }
 0x1e4   : > { %4380 = vst [vmem:[%s7669_s6 + $0x20] sm:$0xff] %v4348_v54  ;;  %v4254_v12 = vadd.f32 %v4119_v28, %v3857_v62  ;;  %v3732_v1 = vpop.f32.mrf.mxu1  ;;  %v3205_v61 = vadd.f32 %v7587_v52, %v7480_v18 }
 0x1e5   : > { %v4351_v23 = vsel %vm4287_vm5, %v4255_v25, %v4319_v22  ;;  %v4257_v6 = vadd.f32 %v5515_v36, %v3860_v63  ;;  %v3859_v30 = vadd.f32 %v3732_v1, %v3593_v31  ;;  %v5518_v26 = vpop.f32.mrf.mxu0  ;;  %v8668_v36 = vld [vmem:[#allocation19_spill] sm:$0xff]  ;;  %v8669_v31 = vld [vmem:[#allocation44_spill] sm:$0xff] }
 0x1e6   : > { %4383 = vst [vmem:[%s7669_s6 + $0x38] sm:$0xff] %v4351_v23  ;;  %vm4286_vm7 = vcmp.ge.f32.partialorder %v4254_v12, 0.0  ;;  %v4318_v49 = vmul.f32 0.01, %v4254_v12  ;;  %v5468_v16 = vpop.f32.mrf.mxu1  ;;  %v3602_v25 = vadd.f32 %v7585_v38, %v3205_v61  ;;  %v3207_v62 = vadd.f32 %v8669_v31, %v8668_v36  ;;  %v8671_v23 = vld [vmem:[#allocation15_spill] sm:$0xff]  ;;  %v8681_v61 = vld [vmem:[#allocation48_spill] sm:$0xff] }
 0x1e7   : > { %vm4289_vm8 = vcmp.ge.f32.partialorder %v4257_v6, 0.0  ;;  %v4321_v60 = vmul.f32 0.01, %v4257_v6  ;;  %v4256_v41 = vadd.f32 %v4129_v29, %v3859_v30  ;;  %v3862_v24 = vadd.f32 %v5468_v16, %v3596_v0  ;;  %v4139_v4 = vpop.f32.mrf.mxu0  ;;  %v8670_v29 = vld [vmem:[#allocation39_spill] sm:$0xff]  ;;  %v8684_v36 = vld [vmem:[#allocation53_spill] sm:$0xff] }
 0x1e8   : > { %v4350_v8 = vsel %vm4286_vm7, %v4254_v12, %v4318_v49  ;;  %v3742_v40 = vpop.f32.mrf.mxu1  ;;  %v3601_v57 = vadd.f32 %v8670_v29, %v3204_v55  ;;  %v8682_v55 = vld [vmem:[#allocation45_spill] sm:$0xff] }
 0x1e9   : > { %4382 = vst [vmem:[%s7669_s6 + $0x30] sm:$0xff] %v4350_v8  ;;  %v4353_v50 = vsel %vm4289_vm8, %v4257_v6, %v4321_v60  ;;  %vm4288_vm11 = vcmp.ge.f32.partialorder %v4256_v41, 0.0  ;;  %v4320_v2 = vmul.f32 0.01, %v4256_v41  ;;  %v4259_v44 = vadd.f32 %v5518_v26, %v3862_v24  ;;  %v5521_v20 = vpop.f32.mrf.mxu0  ;;  %v8672_v6 = vld [vmem:[#allocation42_spill] sm:$0xff]  ;;  %v8676_v8 = vld [vmem:[#allocation27_spill] sm:$0xff] }
 0x1ea   : > { %4385 = vst [vmem:[%s7669_s6 + $0x48] sm:$0xff] %v4353_v50  ;;  %v3861_v37 = vadd.f32 %v3742_v40, %v3595_v34  ;;  %v5471_v15 = vpop.f32.mrf.mxu1  ;;  %v3206_v30 = vadd.f32 %v8672_v6, %v8671_v23  ;;  %v8673_v26 = vld [vmem:[#allocation18_spill] sm:$0xff]  ;;  %v8677_v40 = vld [vmem:[#allocation49_spill] sm:$0xff] }
 0x1eb   : > { %v4352_v51 = vsel %vm4288_vm11, %v4256_v41, %v4320_v2  ;;  %vm4291_vm15 = vcmp.ge.f32.partialorder %v4259_v44, 0.0  ;;  %v4323_v39 = vmul.f32 0.01, %v4259_v44  ;;  %v3864_v45 = vadd.f32 %v5471_v15, %v3598_v7  ;;  %v4149_v48 = vpop.f32.mrf.mxu0  ;;  %v8675_v41 = vld [vmem:[#allocation40_spill] sm:$0xff] }
 0x1ec   : > { %4384 = vst [vmem:[%s7669_s6 + $0x40] sm:$0xff] %v4352_v51  ;;  %v4258_v10 = vadd.f32 %v4139_v4, %v3861_v37  ;;  %v3752_v28 = vpop.f32.mrf.mxu1  ;;  %v3209_v49 = vadd.f32 %v8674_v3, %v8673_v26  ;;  %v3604_v24 = vadd.f32 %v8675_v41, %v3207_v62  ;;  %v3208_v50 = vadd.f32 %v8677_v40, %v8676_v8  ;;  %v8678_v51 = vld [vmem:[#allocation41_spill] sm:$0xff] }
 0x1ed   : > { %v4355_v59 = vsel %vm4291_vm15, %v4259_v44, %v4323_v39  ;;  %v4261_v27 = vadd.f32 %v5521_v20, %v3864_v45  ;;  %v3863_v13 = vadd.f32 %v3752_v28, %v3597_v47  ;;  %v5524_v53 = vpop.f32.mrf.mxu0  ;;  %v3603_v39 = vadd.f32 %v8678_v51, %v3206_v30  ;;  %v8679_v45 = vld [vmem:[#allocation46_spill] sm:$0xff]  ;;  %v8685_v62 = vld [vmem:[#allocation33_spill] sm:$0xff] }
 0x1ee   : > { %4387 = vst [vmem:[%s7669_s6 + $0x58] sm:$0xff] %v4355_v59  ;;  %vm4290_vm4 = vcmp.ge.f32.partialorder %v4258_v10, 0.0  ;;  %v4322_v33 = vmul.f32 0.01, %v4258_v10  ;;  %v5474_v19 = vpop.f32.mrf.mxu1 }
 0x1ef   : > { %vm4293_vm9 = vcmp.ge.f32.partialorder %v4261_v27, 0.0  ;;  %v4325_v35 = vmul.f32 0.01, %v4261_v27  ;;  %v4260_v18 = vadd.f32 %v4149_v48, %v3863_v13  ;;  %v3866_v52 = vadd.f32 %v5474_v19, %v3600_v9  ;;  %v4159_v43 = vpop.f32.mrf.mxu0 }
 0x1f0   : > { %v4354_v46 = vsel %vm4290_vm4, %v4258_v10, %v4322_v33  ;;  %v3762_v54 = vpop.f32.mrf.mxu1  ;;  %v3606_v48 = vadd.f32 %v8679_v45, %v3209_v49  ;;  %v3211_v10 = vadd.f32 %v8681_v61, %v8680_v17  ;;  %v3605_v33 = vadd.f32 %v8682_v55, %v3208_v50  ;;  %v8690_v49 = vld [vmem:[#allocation52_spill] sm:$0xff]  ;;  %v8696_v17 = vld [vmem:[#allocation61_spill] sm:$0xff] }
 0x1f1   : > { %4386 = vst [vmem:[%s7669_s6 + $0x50] sm:$0xff] %v4354_v46  ;;  %v4357_v58 = vsel %vm4293_vm9, %v4261_v27, %v4325_v35  ;;  %vm4292_vm2 = vcmp.ge.f32.partialorder %v4260_v18, 0.0  ;;  %v4324_v14 = vmul.f32 0.01, %v4260_v18  ;;  %v4263_v22 = vadd.f32 %v5524_v53, %v3866_v52  ;;  %v5527_v63 = vpop.f32.mrf.mxu0  ;;  %v8686_v46 = vld [vmem:[#allocation55_spill] sm:$0xff] }
 0x1f2   : > { %4389 = vst [vmem:[%s7669_s6 + $0x68] sm:$0xff] %v4357_v58  ;;  %v3865_v11 = vadd.f32 %v3762_v54, %v3599_v56  ;;  %v5477_v12 = vpop.f32.mrf.mxu1  ;;  %v3213_v54 = vadd.f32 %v8686_v46, %v8685_v62 }
 0x1f3   : > { %v4356_v32 = vsel %vm4292_vm2, %v4260_v18, %v4324_v14  ;;  %vm4295_vm13 = vcmp.ge.f32.partialorder %v4263_v22, 0.0  ;;  %v4327_v38 = vmul.f32 0.01, %v4263_v22  ;;  %v3868_v1 = vadd.f32 %v5477_v12, %v3602_v25  ;;  %v4169_v0 = vpop.f32.mrf.mxu0  ;;  %v8683_v25 = vld [vmem:[#allocation23_spill] sm:$0xff] }
 0x1f4   : > { %4388 = vst [vmem:[%s7669_s6 + $0x60] sm:$0xff] %v4356_v32  ;;  %v4262_v16 = vadd.f32 %v4159_v43, %v3865_v11  ;;  %v3772_v60 = vpop.f32.mrf.mxu1  ;;  %v3210_v31 = vadd.f32 %v8684_v36, %v8683_v25  ;;  %v8688_v32 = vld [vmem:[#allocation26_spill] sm:$0xff] }
 0x1f5   : > { %v4359_v4 = vsel %vm4295_vm13, %v4263_v22, %v4327_v38  ;;  %v4265_v34 = vadd.f32 %v5527_v63, %v3868_v1  ;;  %v3867_v7 = vadd.f32 %v3772_v60, %v3601_v57  ;;  %v5530_v21 = vpop.f32.mrf.mxu0  ;;  %v8687_v22 = vld [vmem:[#allocation51_spill] sm:$0xff]  ;;  %v8689_v38 = vld [vmem:[#allocation54_spill] sm:$0xff] }
 0x1f6   : > { %4391 = vst [vmem:[%s7669_s6 + $0x78] sm:$0xff] %v4359_v4  ;;  %vm4294_vm0 = vcmp.ge.f32.partialorder %v4262_v16, 0.0  ;;  %v4326_v2 = vmul.f32 0.01, %v4262_v16  ;;  %v5480_v44 = vpop.f32.mrf.mxu1  ;;  %v3608_v63 = vadd.f32 %v8687_v22, %v3211_v10  ;;  %v3212_v1 = vadd.f32 %v8689_v38, %v8688_v32  ;;  %v8691_v60 = vld [vmem:[#allocation50_spill] sm:$0xff]  ;;  %v8693_v4 = vld [vmem:[#allocation59_spill] sm:$0xff] }
 0x1f7   : > { %vm4297_vm3 = vcmp.ge.f32.partialorder %v4265_v34, 0.0  ;;  %v4329_v20 = vmul.f32 0.01, %v4265_v34  ;;  %v4264_v47 = vadd.f32 %v4169_v0, %v3867_v7  ;;  %v3870_v37 = vadd.f32 %v5480_v44, %v3604_v24  ;;  %v4179_v15 = vpop.f32.mrf.mxu0  ;;  %v8692_v24 = vld [vmem:[#allocation29_spill] sm:$0xff]  ;;  %v8697_v10 = vld [vmem:[#allocation32_spill] sm:$0xff] }
 0x1f8   : > { %v4358_v28 = vsel %vm4294_vm0, %v4262_v16, %v4326_v2  ;;  %v3782_v9 = vpop.f32.mrf.mxu1  ;;  %v3607_v16 = vadd.f32 %v8690_v49, %v3210_v31  ;;  %v3610_v41 = vadd.f32 %v8691_v60, %v3213_v54  ;;  %v8694_v44 = vld [vmem:[#allocation57_spill] sm:$0xff]  ;;  %v8702_v54 = vld [vmem:[#allocation56_spill] sm:$0xff] }
 0x1f9   : > { %4390 = vst [vmem:[%s7669_s6 + $0x70] sm:$0xff] %v4358_v28  ;;  %v4361_v59 = vsel %vm4297_vm3, %v4265_v34, %v4329_v20  ;;  %vm4296_vm14 = vcmp.ge.f32.partialorder %v4264_v47, 0.0  ;;  %v4328_v27 = vmul.f32 0.01, %v4264_v47  ;;  %v4267_v13 = vadd.f32 %v5530_v21, %v3870_v37  ;;  %v5533_v53 = vpop.f32.mrf.mxu0  ;;  %v8698_v28 = vld [vmem:[#allocation60_spill] sm:$0xff] }
 0x1fa   : > { %4393 = vst [vmem:[%s7669_s6 + $0x88] sm:$0xff] %v4361_v59  ;;  %v3869_v19 = vadd.f32 %v3782_v9, %v3603_v39  ;;  %v5483_v35 = vpop.f32.mrf.mxu1  ;;  %v3215_v34 = vadd.f32 %v8693_v4, %v8692_v24  ;;  %v3609_v20 = vadd.f32 %v8694_v44, %v3212_v1  ;;  %v3217_v9 = vadd.f32 %v8698_v28, %v8697_v10  ;;  %v8707_v4 = vld [vmem:[#allocation62_spill] sm:$0xff] }
 0x1fb   : > { %v4360_v18 = vsel %vm4296_vm14, %v4264_v47, %v4328_v27  ;;  %vm4299_vm10 = vcmp.ge.f32.partialorder %v4267_v13, 0.0  ;;  %v4331_v52 = vmul.f32 0.01, %v4267_v13  ;;  %v3872_v43 = vadd.f32 %v5483_v35, %v3606_v48  ;;  %v4189_v56 = vpop.f32.mrf.mxu0  ;;  %v8695_v48 = vld [vmem:[#allocation38_spill] sm:$0xff] }
 0x1fc   : > { %4392 = vst [vmem:[%s7669_s6 + $0x80] sm:$0xff] %v4360_v18  ;;  %v4266_v58 = vadd.f32 %v4179_v15, %v3869_v19  ;;  %v3792_v14 = vpop.f32.mrf.mxu1  ;;  %v3214_v61 = vadd.f32 %v8696_v17, %v8695_v48  ;;  %v8700_v18 = vld [vmem:[#allocation35_spill] sm:$0xff] }
 0x1fd   : > { %v4363_v29 = vsel %vm4299_vm10, %v4267_v13, %v4331_v52  ;;  %v4269_v57 = vadd.f32 %v5533_v53, %v3872_v43  ;;  %v3871_v11 = vadd.f32 %v3792_v14, %v3605_v33  ;;  %v5536_v12 = vpop.f32.mrf.mxu0  ;;  %v8699_v13 = vld [vmem:[#allocation58_spill] sm:$0xff]  ;;  %v8701_v52 = vld [vmem:[#allocation65_spill] sm:$0xff]  ;;  %v8703_v14 = vld [vmem:[#allocation63_spill] sm:$0xff] }
 0x1fe   : > { %4395 = vst [vmem:[%s7669_s6 + $0x98] sm:$0xff] %v4363_v29  ;;  %vm4298_vm1 = vcmp.ge.f32.partialorder %v4266_v58, 0.0  ;;  %v4330_v0 = vmul.f32 0.01, %v4266_v58  ;;  %v5486_v23 = vpop.f32.mrf.mxu1  ;;  %v3612_v53 = vadd.f32 %v8699_v13, %v3215_v34  ;;  %v3216_v43 = vadd.f32 %v8701_v52, %v8700_v18 }
 0x1ff   : > { %vm4301_vm12 = vcmp.ge.f32.partialorder %v4269_v57, 0.0  ;;  %v4333_v6 = vmul.f32 0.01, %v4269_v57  ;;  %v4268_v30 = vadd.f32 %v4189_v56, %v3871_v11  ;;  %v3874_v26 = vadd.f32 %v5486_v23, %v3608_v63  ;;  %v4199_v3 = vpop.f32.mrf.mxu0  ;;  %v8704_v63 = vld [vmem:[#allocation37_spill] sm:$0xff] }
 0x200   : > { %v4362_v7 = vsel %vm4298_vm1, %v4266_v58, %v4330_v0  ;;  %v3802_v21 = vpop.f32.mrf.mxu1  ;;  %v3611_v58 = vadd.f32 %v8702_v54, %v3214_v61  ;;  %v3614_v22 = vadd.f32 %v8703_v14, %v3217_v9  ;;  %v3219_v29 = vadd.f32 %v7644_v42, %v8704_v63  ;;  %v8705_v0 = vld [vmem:[#allocation64_spill] sm:$0xff] }
 0x201   : > { %4394 = vst [vmem:[%s7669_s6 + $0x90] sm:$0xff] %v4362_v7  ;;  %v4365_v8 = vsel %vm4301_vm12, %v4269_v57, %v4333_v6  ;;  %vm4300_vm6 = vcmp.ge.f32.partialorder %v4268_v30, 0.0  ;;  %v4332_v40 = vmul.f32 0.01, %v4268_v30  ;;  %v4271_v50 = vadd.f32 %v5536_v12, %v3874_v26  ;;  %v5539_v2 = vpop.f32.mrf.mxu0 }
 0x202   : > { %4397 = vst [vmem:[%s7669_s6 + $0xa8] sm:$0xff] %v4365_v8  ;;  %v3873_v47 = vadd.f32 %v3802_v21, %v3607_v16  ;;  %v5489_v37 = vpop.f32.mrf.mxu1  ;;  %v3613_v23 = vadd.f32 %v8705_v0, %v3216_v43  ;;  %v8706_v16 = vld [vmem:[#allocation43_spill] sm:$0xff]  ;;  %v3616_v34 = vadd.f32 %v8707_v4, %v3219_v29 }
 0x203   : > { %v4364_v15 = vsel %vm4300_vm6, %v4268_v30, %v4332_v40  ;;  %vm4303_vm5 = vcmp.ge.f32.partialorder %v4271_v50, 0.0  ;;  %v4335_v51 = vmul.f32 0.01, %v4271_v50  ;;  %v3876_v39 = vadd.f32 %v5489_v37, %v3610_v41  ;;  %v4209_v45 = vpop.f32.mrf.mxu0 }
 0x204   : > { %4396 = vst [vmem:[%s7669_s6 + $0xa0] sm:$0xff] %v4364_v15  ;;  %v4270_v59 = vadd.f32 %v4199_v3, %v3873_v47  ;;  %v3812_v27 = vpop.f32.mrf.mxu1  ;;  %v3218_v60 = vadd.f32 %v7649_v5, %v8706_v16  ;;  %v8708_v47 = vld [vmem:[#allocation67_spill] sm:$0xff] }
 0x205   : > { %v4367_v55 = vsel %vm4303_vm5, %v4271_v50, %v4335_v51  ;;  %v4273_v33 = vadd.f32 %v5539_v2, %v3876_v39  ;;  %v3875_v19 = vadd.f32 %v3812_v27, %v3609_v20  ;;  %v5542_v35 = vpop.f32.mrf.mxu0 }
 0x206   : > { %4399 = vst [vmem:[%s7669_s6 + $0xb8] sm:$0xff] %v4367_v55  ;;  %vm4302_vm7 = vcmp.ge.f32.partialorder %v4270_v59, 0.0  ;;  %v4334_v56 = vmul.f32 0.01, %v4270_v59  ;;  %v5492_v25 = vpop.f32.mrf.mxu1  ;;  %v3615_v37 = vadd.f32 %v8708_v47, %v3218_v60 }
 0x207   : > { %vm4305_vm8 = vcmp.ge.f32.partialorder %v4273_v33, 0.0  ;;  %v4337_v36 = vmul.f32 0.01, %v4273_v33  ;;  %v4272_v31 = vadd.f32 %v4209_v45, %v3875_v19  ;;  %v3878_v62 = vadd.f32 %v5492_v25, %v3612_v53  ;;  %v4219_v46 = vpop.f32.mrf.mxu0 }
 0x208   : > { %v4366_v57 = vsel %vm4302_vm7, %v4270_v59, %v4334_v56  ;;  %v3822_v11 = vpop.f32.mrf.mxu1 }
 0x209   : > { %4398 = vst [vmem:[%s7669_s6 + $0xb0] sm:$0xff] %v4366_v57  ;;  %v4369_v12 = vsel %vm4305_vm8, %v4273_v33, %v4337_v36  ;;  %vm4304_vm11 = vcmp.ge.f32.partialorder %v4272_v31, 0.0  ;;  %v4336_v32 = vmul.f32 0.01, %v4272_v31  ;;  %v4275_v38 = vadd.f32 %v5542_v35, %v3878_v62  ;;  %v5545_v1 = vpop.f32.mrf.mxu0 }
 0x20a   : > { %4401 = vst [vmem:[%s7669_s6 + $0xc8] sm:$0xff] %v4369_v12  ;;  %v3877_v6 = vadd.f32 %v3822_v11, %v3611_v58  ;;  %v5495_v30 = vpop.f32.mrf.mxu1 }
 0x20b   : > { %v4368_v26 = vsel %vm4304_vm11, %v4272_v31, %v4336_v32  ;;  %vm4307_vm15 = vcmp.ge.f32.partialorder %v4275_v38, 0.0  ;;  %v4339_v3 = vmul.f32 0.01, %v4275_v38  ;;  %v3880_v49 = vadd.f32 %v5495_v30, %v3614_v22  ;;  %v4229_v42 = vpop.f32.mrf.mxu0 }
 0x20c   : > { %4400 = vst [vmem:[%s7669_s6 + $0xc0] sm:$0xff] %v4368_v26  ;;  %v4274_v41 = vadd.f32 %v4219_v46, %v3877_v6  ;;  %v3832_v24 = vpop.f32.mrf.mxu1 }
 0x20d   : > { %v4371_v7 = vsel %vm4307_vm15, %v4275_v38, %v4339_v3  ;;  %v4277_v21 = vadd.f32 %v5545_v1, %v3880_v49  ;;  %v3879_v8 = vadd.f32 %v3832_v24, %v3613_v23  ;;  %v5548_v5 = vpop.f32.mrf.mxu0 }
 0x20e   : > { %4403 = vst [vmem:[%s7669_s6 + $0xd8] sm:$0xff] %v4371_v7  ;;  %vm4306_vm4 = vcmp.ge.f32.partialorder %v4274_v41, 0.0  ;;  %v4338_v40 = vmul.f32 0.01, %v4274_v41  ;;  %v5498_v50 = vpop.f32.mrf.mxu1 }
 0x20f   : > { %vm4309_vm9 = vcmp.ge.f32.partialorder %v4277_v21, 0.0  ;;  %v4341_v2 = vmul.f32 0.01, %v4277_v21  ;;  %v4276_v44 = vadd.f32 %v4229_v42, %v3879_v8  ;;  %v3882_v20 = vadd.f32 %v5498_v50, %v3616_v34  ;;  %v4239_v28 = vpop.f32.mrf.mxu0 }
 0x210   : > { %v4370_v15 = vsel %vm4306_vm4, %v4274_v41, %v4338_v40  ;;  %v3842_v51 = vpop.f32.mrf.mxu1 }
 0x211   : > { %4402 = vst [vmem:[%s7669_s6 + $0xd0] sm:$0xff] %v4370_v15  ;;  %v4373_v39 = vsel %vm4309_vm9, %v4277_v21, %v4341_v2  ;;  %vm4308_vm2 = vcmp.ge.f32.partialorder %v4276_v44, 0.0  ;;  %v4340_v45 = vmul.f32 0.01, %v4276_v44  ;;  %v4279_v48 = vadd.f32 %v5548_v5, %v3882_v20 }
 0x212   : > { %4405 = vst [vmem:[%s7669_s6 + $0xe8] sm:$0xff] %v4373_v39  ;;  %v3881_v17 = vadd.f32 %v3842_v51, %v3615_v37 }
 0x213   : > { %v4372_v61 = vsel %vm4308_vm2, %v4276_v44, %v4340_v45  ;;  %vm4311_vm13 = vcmp.ge.f32.partialorder %v4279_v48, 0.0  ;;  %v4343_v10 = vmul.f32 0.01, %v4279_v48 }
 0x214   : > { %4404 = vst [vmem:[%s7669_s6 + $0xe0] sm:$0xff] %v4372_v61  ;;  %v4278_v9 = vadd.f32 %v4239_v28, %v3881_v17 }
 0x215   : > { %v4375_v59 = vsel %vm4311_vm13, %v4279_v48, %v4343_v10 }
 0x216   : > { %4407 = vst [vmem:[%s7669_s6 + $0xf8] sm:$0xff] %v4375_v59  ;;  %vm4310_vm0 = vcmp.ge.f32.partialorder %v4278_v9, 0.0  ;;  %v4342_v27 = vmul.f32 0.01, %v4278_v9 }
 0x218   : > { %v4374_v13 = vsel %vm4310_vm0, %v4278_v9, %v4342_v27 }
 0x219   : > { %4406 = vst [vmem:[%s7669_s6 + $0xf0] sm:$0xff] %v4374_v13 }
 0x21a   : > { %5634 = shalt.err (!%p5631_p3)
}
 0x21b   : > { %s5635_s25 = scalar_lea.hbm %s7783_s11, 4096  ;;  %s5639_s28 = scalar_lea.hbm %s7833_s3, 8192 }
 0x21c   : > { %p5636_p4 = scmp.ne.s32.totalorder %s7783_s11, %s5635_s25  ;;  %p5640_p9 = scmp.lt.s32.totalorder %s7783_s11, %s7833_s3 }
 0x21d   : > { %p5641_p10 = scmp.lt.s32.totalorder %s5639_s28, %s5635_s25 }
 0x21e   : > { %p5637_p7 = pnand %p5636_p4, %p5744_p5 }
 0x21f   : > { %p5642_p11 = por %p5641_p10, %p5640_p9 }
 0x220   : > { %p5638_p8 = pneg %p5637_p7 }
 0x222   : > { %p5643_p12 = pnand %p5642_p11, %p5638_p8 }
 0x224   : > { %5646 = shalt.err (!%p5643_p12)
}
 0x225   : > { %s5684_s4 = smov 128   ;;  %s5685_s5 = smov 8  }
 0x226   : > { %5552 = dma.vmem_to_hbm [thread:$0]  (%p5744_p5), %s7785_s8, 4096, %s7783_s11, %s7790_s16, %s5684_s4, %s5684_s4, %s5685_s5  }
 0x227 PF: > { %p5558_p13 = scmp.ge.s32.totalorder %s5681_s15, 2  ;;  %s4437_s6 = sand.u32 1, %s5669_s12  }
 0x228   : > { %s4438_s7 = scalar_lea.sflag [#allocation3], %s4437_s6 }
 0x229   : > { %p5555_p0 = pnand %p5558_p13, %p5748_p6 }
 0x22b   : > { %p5556_p1 = pneg %p5555_p0 }
 0x22d   : > { %5664 = dma.done.wait (%p5556_p1), %s4438_s7, 4096  }
 0x22e   : > { %5666 = vsyncadd (%p5556_p1), %s4438_s7, 4294963200  ;;  %p13_p2 = scmp.ge.s32.totalorder %s5731_s18, 4   ;;  %s8709_s12 = smov %s5673_s13 }
 0x22f   : > { %s8710_s13 = smov %s5677_s14  ;;  %s8711_s14 = smov %s5742_s21 }
 0x230   : > { %s8712_s15 = smov %s5731_s18  ;;  %15 = sbr.rel (!%p13_p2) target bundleno = 3 (0x3), region = 75 }
 0x235   :  { %4443 = vsyncpa [#allocation3], 1 }
 0x236   :  { %4445 = vsyncpa [#allocation3 + $0x1], 1 }

</bundles_post_ra>
